<compile_context>
chip_gen: v7x
topology: tpu7x:2x2x1
jax: 0.10.0
libtpu: 0.0.40
codegen_flags: <defaults>
</compile_context>

<pallas_src>
import functools

import jax
import jax.numpy as jnp
import numpy as np
from jax.experimental import pallas as pl
from jax.experimental.pallas import tpu as pltpu

_EPS = 1e-5
_PREC = jax.lax.Precision.HIGHEST  # reference only


def _round_up(x, m):
    return ((x + m - 1) // m) * m


def _gelu_exact(x):
    # erf-based GELU (matches F.gelu default); used in the XLA glue and the reference.
    return 0.5 * x * (1.0 + jax.lax.erf(x * 0.7071067811865476))


def _gelu_tanh(x):
    # tanh-approx GELU inside the kernels: runs on the EUP slot, not a long VPU polynomial.
    c = 0.7978845608028654  # sqrt(2/pi)
    return 0.5 * x * (1.0 + jnp.tanh(c * (x + 0.044715 * x * x * x)))


# ---------------------------------------------------------------------------
# Small in-kernel helpers.
# ---------------------------------------------------------------------------
def _mxu(x_bf16, w_ref):
    # bf16 operands on the MXU, f32 accumulation (weights pre-cast in the wrapper).
    return jnp.dot(x_bf16, w_ref[...], preferred_element_type=jnp.float32)


def _pos_from_pe(pe2, wd2_ref, bd2_ref):
    # fc_delta2 applied as DP(=3/4) unrolled broadcast-FMAs on the VPU -- a depth-3/4
    # matmul would waste the MXU / extended slot (perf-review item).
    DP = wd2_ref.shape[0]
    wd2 = wd2_ref[...]
    pos = bd2_ref[...] + pe2[:, 0:1] * wd2[0:1, :]
    for i in range(1, DP):
        pos = pos + pe2[:, i:i + 1] * wd2[i:i + 1, :]
    return pos  # (R, DF) f32


def _moments_block(x3, bn_valid):
    # Per-tile per-channel sum / sum-of-squares, with padded query rows masked out.
    T, _, C = x3.shape
    rid = pl.program_id(0) * T + jax.lax.broadcasted_iota(jnp.int32, (T, 1), 0)
    valid = jnp.where(rid < bn_valid, 1.0, 0.0)                 # (T, 1) f32
    xm = (x3 * valid[:, :, None]).reshape(-1, C)
    s = jnp.sum(xm, axis=0, keepdims=True)
    ss = jnp.sum(xm * xm, axis=0, keepdims=True)
    return jnp.concatenate([s, ss], axis=0)[None]               # (1, 2, C)


# ---------------------------------------------------------------------------
# Pass 1: query/key projections + positional FMA -> xg1 (bf16) + bn_gamma1 moments.
# ---------------------------------------------------------------------------
def _k1_kernel(bn_valid,
               feats_ref, kf_ref, pe_ref,
               wq_ref, bq_ref, wk_ref, bk_ref, wd2_ref, bd2_ref,
               xg1_ref, st_ref):
    T, K, DF = kf_ref.shape
    DP = pe_ref.shape[-1]
    R = T * K

    q = _mxu(feats_ref[...], wq_ref) + bq_ref[...]              # (T, DF), query once per row
    key = _mxu(kf_ref[...].reshape(R, DF), wk_ref) + bk_ref[...]
    pos = _pos_from_pe(pe_ref[...].reshape(R, DP), wd2_ref, bd2_ref)

    xg1 = q[:, None, :] - key.reshape(T, K, DF) + pos.reshape(T, K, DF)
    xg1_ref[...] = xg1.astype(jnp.bfloat16)
    st_ref[...] = _moments_block(xg1, bn_valid)


# ---------------------------------------------------------------------------
# Pass 2: gelu(bn_gamma1(xg1)) @ fc_gamma1 -> xg2 (bf16) + bn_gamma2 moments.
# ---------------------------------------------------------------------------
def _k2_kernel(bn_valid,
               xg1_ref, wg1_ref, bg1_ref, s1_ref, t1_ref,
               xg2_ref, st_ref):
    T, K, DF = xg1_ref.shape
    R = T * K

    h = _gelu_tanh(xg1_ref[...].astype(jnp.float32).reshape(R, DF) * s1_ref[...] + t1_ref[...])
    xg2 = (_mxu(h.astype(jnp.bfloat16), wg1_ref) + bg1_ref[...]).reshape(T, K, DF)
    xg2_ref[...] = xg2.astype(jnp.bfloat16)
    st_ref[...] = _moments_block(xg2, bn_valid)


# ---------------------------------------------------------------------------
# Pass 3: gelu(bn_gamma2(xg2)) @ fc_gamma2, value projection, softmax-over-k, weighted sum.
# ---------------------------------------------------------------------------
def _k3_kernel(xg2_ref, kf_ref, pe_ref,
               wg2_ref, bg2_ref, wv_ref, bv_ref, wd2_ref, bd2_ref,
               s2_ref, t2_ref,
               out_ref):
    T, K, DF = kf_ref.shape
    DP = pe_ref.shape[-1]
    R = T * K

    h = _gelu_tanh(xg2_ref[...].astype(jnp.float32).reshape(R, DF) * s2_ref[...] + t2_ref[...])
    gamma = (_mxu(h.astype(jnp.bfloat16), wg2_ref) + bg2_ref[...]).reshape(T, K, DF)

    val = _mxu(kf_ref[...].reshape(R, DF), wv_ref) + bv_ref[...]
    pos = _pos_from_pe(pe_ref[...].reshape(R, DP), wd2_ref, bd2_ref)
    val3 = (val + pos).reshape(T, K, DF)

    m = jnp.max(gamma, axis=1, keepdims=True)
    e = jnp.exp(gamma - m)
    rho = e * pl.reciprocal(jnp.sum(e, axis=1, keepdims=True), approx=True)
    out_ref[...] = jnp.sum(rho * val3, axis=1)                  # (T, DF)


# ---------------------------------------------------------------------------
# Plain-JAX glue.
# ---------------------------------------------------------------------------
def _knn_indices(points, k, chunk=1024):
    # TODO(synk): knn_cuda top-k neighbor search has no Pallas equivalent; blockwise
    # pairwise distances + lax.top_k so the O(N^2) matrix is never fully resident.
    B, N, _ = points.shape
    chunk = min(int(chunk), N)
    idxs = []
    for s in range(0, N, chunk):
        q = points[:, s:s + chunk, :]
        d2 = jnp.sum(jnp.square(q[:, :, None, :] - points[:, None, :, :]), axis=-1)
        _, idx = jax.lax.top_k(-d2, k)
        idxs.append(idx)
    return idxs[0] if len(idxs) == 1 else jnp.concatenate(idxs, axis=1)


def _fold_bn(x2, gamma, beta):
    """Training-mode BN2d stats (biased var) over rows -> per-channel (scale, shift)."""
    mean = jnp.mean(x2, axis=0, keepdims=True)
    var = jnp.mean(jnp.square(x2 - mean), axis=0, keepdims=True)
    scale = gamma * jax.lax.rsqrt(var + _EPS)
    shift = beta - mean * scale
    return scale, shift


def _fold_from_moments(s, ss, n, gamma, beta):
    """Fold accumulated per-channel sum / sum-of-squares into BN scale/shift."""
    mean = s / n
    var = jnp.maximum(ss / n - mean * mean, 0.0)
    scale = gamma * jax.lax.rsqrt(var + _EPS)
    shift = beta - mean * scale
    return scale, shift                                         # (1, C) each


def _vmem_limit_bytes():
    try:
        cap = int(pltpu.get_tpu_info().vmem_capacity_bytes)
        return min(int(cap * 0.85), 100 * 1024 * 1024)   # ~54 MiB on v7x, 100 MiB on v5e/v6e
    except Exception:
        return 56 * 1024 * 1024                          # safe on v7x's 64 MiB VMEM


def _pick_tile(bn, k, df, dp, requested, vmem_limit):
    # Largest sublane-aligned (bf16-safe, multiple of 16) row tile whose double-buffered
    # bf16 streams plus live f32 temporaries fit a conservative slice of the VMEM budget.
    tile = min(_round_up(int(requested), 16), _round_up(bn, 16))
    per_row = k * (df * (2 * 2 * 2 + 4 * 6) + dp * 4 * 2) + df * 16   # rough bytes/row
    budget = int(vmem_limit * 0.7)
    while tile > 64 and tile * per_row > budget:
        tile //= 2
    return max(_round_up(tile, 16), 16)


# ---------------------------------------------------------------------------
# Wrapper.
# ---------------------------------------------------------------------------
def point_transformer_layer(feats, points, params, *, k, tile_bn=512, knn_chunk=1024):
    B, N, DF = feats.shape
    DP = points.shape[-1]
    BN = B * N

    # --- neighbor search + gathers (plain-JAX glue) ---
    knn_idx = _knn_indices(points, k, chunk=knn_chunk)           # (B, N, k)

    def gather(x, idx):                                          # == get_points
        flat = idx.reshape(B, N * k)
        g = jnp.take_along_axis(x, flat[..., None], axis=1)
        return g.reshape(B, N, k, x.shape[-1])

    knn_feats = gather(feats, knn_idx)                           # (B, N, k, DF)
    knn_points = gather(points, knn_idx)                         # (B, N, k, DP)
    rel_pos = points[:, :, None, :] - knn_points                 # (B, N, k, DP)

    # --- bn_delta branch: DP(=3/4)-channel stats + pe = gelu(bn_delta(fc_delta1(.))) ---
    # Negligible FLOPs / bytes (DP-wide), so it stays in XLA; fc_delta2 is applied inside
    # the kernels as VPU FMAs, so no (BN,k,DF) positional tensor ever hits HBM.
    xd = rel_pos.reshape(-1, DP) @ params['wd1'] + params['bd1']
    sd, td = _fold_bn(xd, params['bn_d_g'], params['bn_d_b'])
    pe = _gelu_exact(xd * sd + td).reshape(BN, k, DP).astype(jnp.float32)

    # --- bf16 streams & weights, cast once in the wrapper (not per grid step) ---
    feats2 = feats.reshape(BN, DF).astype(jnp.bfloat16)
    kf3 = knn_feats.reshape(BN, k, DF).astype(jnp.bfloat16)
    wq = params['wq'].astype(jnp.bfloat16)
    wk = params['wk'].astype(jnp.bfloat16)
    wv = params['wv'].astype(jnp.bfloat16)
    wg1 = params['wg1'].astype(jnp.bfloat16)
    wg2 = params['wg2'].astype(jnp.bfloat16)
    wd2 = params['wd2'].astype(jnp.float32)                      # VPU FMA path stays f32
    bq, bk, bv = params['bq'], params['bk'], params['bv']
    bg1, bg2, bd2 = params['bg1'], params['bg2'], params['bd2']

    # --- tiling: big VMEM-aware tiles, even #tiles so ("parallel",) can use both TCs ---
    vmem_limit = _vmem_limit_bytes()
    tile = _pick_tile(BN, k, DF, DP, tile_bn, vmem_limit)
    num_tiles = -(-BN // tile)
    if num_tiles > 1 and num_tiles % 2 == 1:
        num_tiles += 1                                           # at most one pad tile
    padded = num_tiles * tile
    if padded != BN:
        pad = padded - BN
        feats2 = jnp.pad(feats2, ((0, pad), (0, 0)))
        kf3 = jnp.pad(kf3, ((0, pad), (0, 0), (0, 0)))
        pe = jnp.pad(pe, ((0, pad), (0, 0), (0, 0)))
    grid = (num_tiles,)

    row2 = pl.BlockSpec((tile, DF), lambda i: (i, 0))
    row3 = pl.BlockSpec((tile, k, DF), lambda i: (i, 0, 0))
    pe_spec = pl.BlockSpec((tile, k, DP), lambda i: (i, 0, 0))
    stat_spec = pl.BlockSpec((1, 2, DF), lambda i: (i, 0, 0))

    def const(a):                                                # VMEM-resident across steps
        return pl.BlockSpec(a.shape, lambda i: (0, 0))

    cparams = pltpu.CompilerParams(dimension_semantics=("parallel",),
                                   vmem_limit_bytes=vmem_limit)
    xg_shape = jax.ShapeDtypeStruct((padded, k, DF), jnp.bfloat16)
    st_shape = jax.ShapeDtypeStruct((num_tiles, 2, DF), jnp.float32)
    nk = float(BN * k)

    # --- pass 1: q/key projections + positional FMA -> xg1 + bn_gamma1 moments ---
    xg1, st1 = pl.pallas_call(
        functools.partial(_k1_kernel, BN),
        grid=grid,
        in_specs=[row2, row3, pe_spec,
                  const(wq), const(bq), const(wk), const(bk), const(wd2), const(bd2)],
        out_specs=[row3, stat_spec],
        out_shape=[xg_shape, st_shape],
        compiler_params=cparams,
    )(feats2, kf3, pe, wq, bq, wk, bk, wd2, bd2)

    s1, t1 = _fold_from_moments(jnp.sum(st1[:, 0], axis=0, keepdims=True),
                                jnp.sum(st1[:, 1], axis=0, keepdims=True),
                                nk, params['bn_g1_g'], params['bn_g1_b'])

    # --- pass 2: gelu(bn_gamma1(xg1)) @ fc_gamma1 -> xg2 + bn_gamma2 moments ---
    xg2, st2 = pl.pallas_call(
        functools.partial(_k2_kernel, BN),
        grid=grid,
        in_specs=[row3, const(wg1), const(bg1), const(s1), const(t1)],
        out_specs=[row3, stat_spec],
        out_shape=[xg_shape, st_shape],
        compiler_params=cparams,
    )(xg1, wg1, bg1, s1, t1)

    s2, t2 = _fold_from_moments(jnp.sum(st2[:, 0], axis=0, keepdims=True),
                                jnp.sum(st2[:, 1], axis=0, keepdims=True),
                                nk, params['bn_g2_g'], params['bn_g2_b'])

    # --- pass 3: gelu(bn_gamma2(xg2)) @ fc_gamma2, value proj, softmax-over-k, sum ---
    out = pl.pallas_call(
        _k3_kernel,
        grid=grid,
        in_specs=[row3, row3, pe_spec,
                  const(wg2), const(bg2), const(wv), const(bv),
                  const(wd2), const(bd2), const(s2), const(t2)],
        out_specs=row2,
        out_shape=jax.ShapeDtypeStruct((padded, DF), jnp.float32),
        compiler_params=cparams,
    )(xg2, kf3, pe, wg2, bg2, wv, bv, wd2, bd2, s2, t2)

    return out[:BN].reshape(B, N, DF)


# ---------------------------------------------------------------------------
# Parameter init (PyTorch nn.Linear-like) and pure-JAX reference.
# ---------------------------------------------------------------------------
def init_params(key, d_points, d_feats):
    ks = jax.random.split(key, 7)

    def lin_init(kk, fan_in, fan_out):
        s = 1.0 / float(np.sqrt(fan_in))
        kw, kb = jax.random.split(kk)
        w = jax.random.uniform(kw, (fan_in, fan_out), jnp.float32, -s, s)
        b = jax.random.uniform(kb, (1, fan_out), jnp.float32, -s, s)
        return w, b

    p = {}
    p['wq'], p['bq'] = lin_init(ks[0], d_feats, d_feats)
    p['wk'], p['bk'] = lin_init(ks[1], d_feats, d_feats)
    p['wv'], p['bv'] = lin_init(ks[2], d_feats, d_feats)
    p['wd1'], p['bd1'] = lin_init(ks[3], d_points, d_points)
    p['wd2'], p['bd2'] = lin_init(ks[4], d_points, d_feats)
    p['wg1'], p['bg1'] = lin_init(ks[5], d_feats, d_feats)
    p['wg2'], p['bg2'] = lin_init(ks[6], d_feats, d_feats)
    p['bn_d_g'] = jnp.ones((1, d_points), jnp.float32)
    p['bn_d_b'] = jnp.zeros((1, d_points), jnp.float32)
    p['bn_g1_g'] = jnp.ones((1, d_feats), jnp.float32)
    p['bn_g1_b'] = jnp.zeros((1, d_feats), jnp.float32)
    p['bn_g2_g'] = jnp.ones((1, d_feats), jnp.float32)
    p['bn_g2_b'] = jnp.zeros((1, d_feats), jnp.float32)
    return p


def reference(feats, points, p, k):
    """Pure-JAX mirror of the PyTorch forward (training-mode BN, f32 HIGHEST, erf GELU)."""
    B, N, d_feats = feats.shape
    knn_idx = _knn_indices(points, k)

    def gather(x, idx):
        flat = idx.reshape(B, N * k)
        return jnp.take_along_axis(x, flat[..., None], axis=1).reshape(B, N, k, x.shape[-1])

    def lin(x, w, b):
        return jnp.einsum('...i,io->...o', x, w, precision=_PREC) + b[0]

    def bn(x, g, b):
        mean = jnp.mean(x, axis=(0, 1, 2), keepdims=True)
        var = jnp.mean(jnp.square(x - mean), axis=(0, 1, 2), keepdims=True)
        return (x - mean) / jnp.sqrt(var + _EPS) * g[0] + b[0]

    knn_feats = gather(feats, knn_idx)
    knn_points = gather(points, knn_idx)

    pos = points[:, :, None, :] - knn_points
    pos = lin(pos, p['wd1'], p['bd1'])
    pos = _gelu_exact(bn(pos, p['bn_d_g'], p['bn_d_b']))
    pos = lin(pos, p['wd2'], p['bd2'])

    q = lin(feats, p['wq'], p['bq'])
    key = lin(knn_feats, p['wk'], p['bk'])
    gamma = q[:, :, None, :] - key + pos
    gamma = _gelu_exact(bn(gamma, p['bn_g1_g'], p['bn_g1_b']))
    gamma = lin(gamma, p['wg1'], p['bg1'])
    gamma = _gelu_exact(bn(gamma, p['bn_g2_g'], p['bn_g2_b']))
    gamma = lin(gamma, p['wg2'], p['bg2'])

    rho = jax.nn.softmax(gamma, axis=-2)
    val = lin(knn_feats, p['wv'], p['bv']) + pos
    return jnp.einsum('bnkd,bnkd->bnd', rho, val)


if __name__ == "__main__":
    B, N, d_points, d_feats, k = 2, 16, 4, 32, 8

    key = jax.random.PRNGKey(0)
    kf_, kp_, kw_ = jax.random.split(key, 3)
    feats = jax.random.normal(kf_, (B, N, d_feats), jnp.float32)
    points = jax.random.normal(kp_, (B, N, d_points), jnp.float32)
    params = init_params(kw_, d_points, d_feats)

    # tile_bn=16 -> 2 grid steps at this size, exercising the tiled, even "parallel" grid.
    fn = jax.jit(functools.partial(point_transformer_layer, k=k, tile_bn=16))
    out = jax.block_until_ready(fn(feats, points, params))
    assert out.shape == (B, N, d_feats)

    # Tolerance covers the documented approximations: bf16 MXU operands / bf16 intermediate
    # storage, tanh-approx GELU, approximate softmax reciprocal.
    ref = reference(feats, points, params, k)
    np.testing.assert_allclose(np.asarray(out), np.asarray(ref), rtol=3e-2, atol=3e-2)

    print("KERNEL_OK")
</pallas_src>

<mosaic_0001>
module attributes {stable_mosaic.version = 11 : i64} {
  func.func @_k1_kernel(%arg0: i32, %arg1: memref<16x32xbf16, #tpu.memory_space<vmem>>, %arg2: memref<16x8x32xbf16, #tpu.memory_space<vmem>>, %arg3: memref<16x8x4xf32, #tpu.memory_space<vmem>>, %arg4: memref<32x32xbf16, #tpu.memory_space<vmem>>, %arg5: memref<1x32xf32, #tpu.memory_space<vmem>>, %arg6: memref<32x32xbf16, #tpu.memory_space<vmem>>, %arg7: memref<1x32xf32, #tpu.memory_space<vmem>>, %arg8: memref<4x32xf32, #tpu.memory_space<vmem>>, %arg9: memref<1x32xf32, #tpu.memory_space<vmem>>, %arg10: memref<16x8x32xbf16, #tpu.memory_space<vmem>>, %arg11: memref<1x2x32xf32, #tpu.memory_space<vmem>>) attributes {dimension_semantics = [#tpu.dimension_semantics<parallel>], iteration_bounds = array<i64: 2>, scalar_prefetch = 0 : i64, scratch_operands = 0 : i64, tpu.core_type = #tpu.core_type<tc>, window_params = [{transform_indices = @transform_0, window_bounds = array<i64: 16, 32>}, {transform_indices = @transform_1, window_bounds = array<i64: 16, 8, 32>}, {transform_indices = @transform_2, window_bounds = array<i64: 16, 8, 4>}, {pipeline_mode = #tpu.pipeline_mode<synchronous>, transform_indices = @transform_3, window_bounds = array<i64: 32, 32>}, {pipeline_mode = #tpu.pipeline_mode<synchronous>, transform_indices = @transform_4, window_bounds = array<i64: 1, 32>}, {pipeline_mode = #tpu.pipeline_mode<synchronous>, transform_indices = @transform_5, window_bounds = array<i64: 32, 32>}, {pipeline_mode = #tpu.pipeline_mode<synchronous>, transform_indices = @transform_6, window_bounds = array<i64: 1, 32>}, {pipeline_mode = #tpu.pipeline_mode<synchronous>, transform_indices = @transform_7, window_bounds = array<i64: 4, 32>}, {pipeline_mode = #tpu.pipeline_mode<synchronous>, transform_indices = @transform_8, window_bounds = array<i64: 1, 32>}, {transform_indices = @transform_9, window_bounds = array<i64: 16, 8, 32>}, {transform_indices = @transform_10, window_bounds = array<i64: 1, 2, 32>}]} {
    %c0 = arith.constant 0 : index
    %c0_0 = arith.constant 0 : index
    %0 = vector.load %arg1[%c0, %c0_0] : memref<16x32xbf16, #tpu.memory_space<vmem>>, vector<16x32xbf16>
    %c0_1 = arith.constant 0 : index
    %c0_2 = arith.constant 0 : index
    %1 = vector.load %arg4[%c0_1, %c0_2] : memref<32x32xbf16, #tpu.memory_space<vmem>>, vector<32x32xbf16>
    %cst = arith.constant dense<0.000000e+00> : vector<16x32xf32>
    %2 = tpu.matmul %0, %1, %cst {dimension_numbers = #tpu.dot_dimension_numbers<[1], [0], [0], [1], [0, 0, 1, 1], [], []>} : vector<16x32xbf16>, vector<32x32xbf16>, vector<16x32xf32> -> vector<16x32xf32>
    %c0_3 = arith.constant 0 : index
    %c0_4 = arith.constant 0 : index
    %3 = vector.load %arg5[%c0_3, %c0_4] : memref<1x32xf32, #tpu.memory_space<vmem>>, vector<1x32xf32>
    %4 = vector.broadcast %3 : vector<1x32xf32> to vector<16x32xf32>
    %5 = arith.addf %2, %4 : vector<16x32xf32>
    %c0_5 = arith.constant 0 : index
    %c0_6 = arith.constant 0 : index
    %c0_7 = arith.constant 0 : index
    %6 = vector.load %arg2[%c0_5, %c0_6, %c0_7] : memref<16x8x32xbf16, #tpu.memory_space<vmem>>, vector<16x8x32xbf16>
    %7 = vector.shape_cast %6 : vector<16x8x32xbf16> to vector<128x32xbf16>
    %c0_8 = arith.constant 0 : index
    %c0_9 = arith.constant 0 : index
    %8 = vector.load %arg6[%c0_8, %c0_9] : memref<32x32xbf16, #tpu.memory_space<vmem>>, vector<32x32xbf16>
    %cst_10 = arith.constant dense<0.000000e+00> : vector<128x32xf32>
    %9 = tpu.matmul %7, %8, %cst_10 {dimension_numbers = #tpu.dot_dimension_numbers<[1], [0], [0], [1], [0, 0, 1, 1], [], []>} : vector<128x32xbf16>, vector<32x32xbf16>, vector<128x32xf32> -> vector<128x32xf32>
    %c0_11 = arith.constant 0 : index
    %c0_12 = arith.constant 0 : index
    %10 = vector.load %arg7[%c0_11, %c0_12] : memref<1x32xf32, #tpu.memory_space<vmem>>, vector<1x32xf32>
    %11 = vector.broadcast %10 : vector<1x32xf32> to vector<128x32xf32>
    %12 = arith.addf %9, %11 : vector<128x32xf32>
    %c0_13 = arith.constant 0 : index
    %c0_14 = arith.constant 0 : index
    %c0_15 = arith.constant 0 : index
    %13 = vector.load %arg3[%c0_13, %c0_14, %c0_15] : memref<16x8x4xf32, #tpu.memory_space<vmem>>, vector<16x8x4xf32>
    %14 = vector.shape_cast %13 : vector<16x8x4xf32> to vector<128x4xf32>
    %c0_16 = arith.constant 0 : index
    %c0_17 = arith.constant 0 : index
    %15 = vector.load %arg8[%c0_16, %c0_17] : memref<4x32xf32, #tpu.memory_space<vmem>>, vector<4x32xf32>
    %c0_18 = arith.constant 0 : index
    %c0_19 = arith.constant 0 : index
    %16 = vector.load %arg9[%c0_18, %c0_19] : memref<1x32xf32, #tpu.memory_space<vmem>>, vector<1x32xf32>
    %17 = vector.extract_strided_slice %14 {offsets = [0, 0], sizes = [128, 1], strides = [1, 1]} : vector<128x4xf32> to vector<128x1xf32>
    %18 = vector.extract_strided_slice %15 {offsets = [0, 0], sizes = [1, 32], strides = [1, 1]} : vector<4x32xf32> to vector<1x32xf32>
    %19 = vector.broadcast %17 : vector<128x1xf32> to vector<128x32xf32>
    %20 = vector.broadcast %18 : vector<1x32xf32> to vector<128x32xf32>
    %21 = arith.mulf %19, %20 : vector<128x32xf32>
    %22 = vector.broadcast %16 : vector<1x32xf32> to vector<128x32xf32>
    %23 = arith.addf %22, %21 : vector<128x32xf32>
    %24 = vector.extract_strided_slice %14 {offsets = [0, 1], sizes = [128, 1], strides = [1, 1]} : vector<128x4xf32> to vector<128x1xf32>
    %25 = vector.extract_strided_slice %15 {offsets = [1, 0], sizes = [1, 32], strides = [1, 1]} : vector<4x32xf32> to vector<1x32xf32>
    %26 = vector.broadcast %24 : vector<128x1xf32> to vector<128x32xf32>
    %27 = vector.broadcast %25 : vector<1x32xf32> to vector<128x32xf32>
    %28 = arith.mulf %26, %27 : vector<128x32xf32>
    %29 = arith.addf %23, %28 : vector<128x32xf32>
    %30 = vector.extract_strided_slice %14 {offsets = [0, 2], sizes = [128, 1], strides = [1, 1]} : vector<128x4xf32> to vector<128x1xf32>
    %31 = vector.extract_strided_slice %15 {offsets = [2, 0], sizes = [1, 32], strides = [1, 1]} : vector<4x32xf32> to vector<1x32xf32>
    %32 = vector.broadcast %30 : vector<128x1xf32> to vector<128x32xf32>
    %33 = vector.broadcast %31 : vector<1x32xf32> to vector<128x32xf32>
    %34 = arith.mulf %32, %33 : vector<128x32xf32>
    %35 = arith.addf %29, %34 : vector<128x32xf32>
    %36 = vector.extract_strided_slice %14 {offsets = [0, 3], sizes = [128, 1], strides = [1, 1]} : vector<128x4xf32> to vector<128x1xf32>
    %37 = vector.extract_strided_slice %15 {offsets = [3, 0], sizes = [1, 32], strides = [1, 1]} : vector<4x32xf32> to vector<1x32xf32>
    %38 = vector.broadcast %36 : vector<128x1xf32> to vector<128x32xf32>
    %39 = vector.broadcast %37 : vector<1x32xf32> to vector<128x32xf32>
    %40 = arith.mulf %38, %39 : vector<128x32xf32>
    %41 = arith.addf %35, %40 : vector<128x32xf32>
    %42 = vector.shape_cast %5 : vector<16x32xf32> to vector<16x1x32xf32>
    %43 = vector.shape_cast %12 : vector<128x32xf32> to vector<16x8x32xf32>
    %44 = vector.broadcast %42 : vector<16x1x32xf32> to vector<16x8x32xf32>
    %45 = arith.subf %44, %43 : vector<16x8x32xf32>
    %46 = vector.shape_cast %41 : vector<128x32xf32> to vector<16x8x32xf32>
    %47 = arith.addf %45, %46 : vector<16x8x32xf32>
    %48 = arith.truncf %47 : vector<16x8x32xf32> to vector<16x8x32xbf16>
    %c0_20 = arith.constant 0 : index
    %c0_21 = arith.constant 0 : index
    %c0_22 = arith.constant 0 : index
    %49 = vector.load %arg10[%c0_20, %c0_21, %c0_22] : memref<16x8x32xbf16, #tpu.memory_space<vmem>>, vector<16x8x32xbf16>
    tpu.vector_store %arg10[%c0_20, %c0_21, %c0_22], %48 {strides = array<i32>} : memref<16x8x32xbf16, #tpu.memory_space<vmem>>, vector<16x8x32xbf16>,
    %c16_i32 = arith.constant 16 : i32
    %50 = arith.muli %arg0, %c16_i32 : i32
    %51 = tpu.iota {dimensions = array<i32: 0>} : vector<16x1xi32>
    %52 = vector.broadcast %50 : i32 to vector<16x1xi32>
    %53 = arith.addi %52, %51 : vector<16x1xi32>
    %c32_i32 = arith.constant 32 : i32
    %54 = vector.broadcast %c32_i32 : i32 to vector<16x1xi32>
    %55 = arith.cmpi slt, %53, %54 : vector<16x1xi32>
    %cst_23 = arith.constant 1.000000e+00 : f32
    %cst_24 = arith.constant 0.000000e+00 : f32
    %56 = vector.broadcast %cst_23 : f32 to vector<16x1xf32>
    %57 = vector.broadcast %cst_24 : f32 to vector<16x1xf32>
    %58 = arith.select %55, %56, %57 : vector<16x1xi1>, vector<16x1xf32>
    %59 = vector.shape_cast %58 : vector<16x1xf32> to vector<16x1x1xf32>
    %60 = vector.broadcast %59 : vector<16x1x1xf32> to vector<16x8x32xf32>
    %61 = arith.mulf %47, %60 : vector<16x8x32xf32>
    %62 = vector.shape_cast %61 : vector<16x8x32xf32> to vector<128x32xf32>
    %cst_25 = arith.constant dense<0.000000e+00> : vector<32xf32>
    %63 = vector.multi_reduction <add>, %62, %cst_25 [0] : vector<128x32xf32> to vector<32xf32>
    %64 = vector.shape_cast %63 : vector<32xf32> to vector<1x32xf32>
    %65 = arith.mulf %62, %62 : vector<128x32xf32>
    %cst_26 = arith.constant dense<0.000000e+00> : vector<32xf32>
    %66 = vector.multi_reduction <add>, %65, %cst_26 [0] : vector<128x32xf32> to vector<32xf32>
    %67 = vector.shape_cast %66 : vector<32xf32> to vector<1x32xf32>
    %68 = tpu.concatenate %64, %67 in 0 : vector<1x32xf32>, vector<1x32xf32> -> vector<2x32xf32>
    %69 = vector.shape_cast %68 : vector<2x32xf32> to vector<1x2x32xf32>
    %c0_27 = arith.constant 0 : index
    %c0_28 = arith.constant 0 : index
    %c0_29 = arith.constant 0 : index
    %70 = vector.load %arg11[%c0_27, %c0_28, %c0_29] : memref<1x2x32xf32, #tpu.memory_space<vmem>>, vector<1x2x32xf32>
    tpu.vector_store %arg11[%c0_27, %c0_28, %c0_29], %69 {strides = array<i32>} : memref<1x2x32xf32, #tpu.memory_space<vmem>>, vector<1x2x32xf32>,
    return
  }
  func.func @transform_0(%arg0: i32) -> (i32, i32) {
    %c0_i32 = arith.constant 0 : i32
    %c0_i32_0 = arith.constant 0 : i32
    return %arg0, %c0_i32 : i32, i32
  }
  func.func @transform_1(%arg0: i32) -> (i32, i32, i32) {
    %c0_i32 = arith.constant 0 : i32
    %c0_i32_0 = arith.constant 0 : i32
    %c0_i32_1 = arith.constant 0 : i32
    return %arg0, %c0_i32, %c0_i32_0 : i32, i32, i32
  }
  func.func @transform_2(%arg0: i32) -> (i32, i32, i32) {
    %c0_i32 = arith.constant 0 : i32
    %c0_i32_0 = arith.constant 0 : i32
    %c0_i32_1 = arith.constant 0 : i32
    return %arg0, %c0_i32, %c0_i32_0 : i32, i32, i32
  }
  func.func @transform_3(%arg0: i32) -> (i32, i32) {
    %c0_i32 = arith.constant 0 : i32
    %c0_i32_0 = arith.constant 0 : i32
    %c0_i32_1 = arith.constant 0 : i32
    return %c0_i32, %c0_i32_0 : i32, i32
  }
  func.func @transform_4(%arg0: i32) -> (i32, i32) {
    %c0_i32 = arith.constant 0 : i32
    %c0_i32_0 = arith.constant 0 : i32
    %c0_i32_1 = arith.constant 0 : i32
    return %c0_i32, %c0_i32_0 : i32, i32
  }
  func.func @transform_5(%arg0: i32) -> (i32, i32) {
    %c0_i32 = arith.constant 0 : i32
    %c0_i32_0 = arith.constant 0 : i32
    %c0_i32_1 = arith.constant 0 : i32
    return %c0_i32, %c0_i32_0 : i32, i32
  }
  func.func @transform_6(%arg0: i32) -> (i32, i32) {
    %c0_i32 = arith.constant 0 : i32
    %c0_i32_0 = arith.constant 0 : i32
    %c0_i32_1 = arith.constant 0 : i32
    return %c0_i32, %c0_i32_0 : i32, i32
  }
  func.func @transform_7(%arg0: i32) -> (i32, i32) {
    %c0_i32 = arith.constant 0 : i32
    %c0_i32_0 = arith.constant 0 : i32
    %c0_i32_1 = arith.constant 0 : i32
    return %c0_i32, %c0_i32_0 : i32, i32
  }
  func.func @transform_8(%arg0: i32) -> (i32, i32) {
    %c0_i32 = arith.constant 0 : i32
    %c0_i32_0 = arith.constant 0 : i32
    %c0_i32_1 = arith.constant 0 : i32
    return %c0_i32, %c0_i32_0 : i32, i32
  }
  func.func @transform_9(%arg0: i32) -> (i32, i32, i32) {
    %c0_i32 = arith.constant 0 : i32
    %c0_i32_0 = arith.constant 0 : i32
    %c0_i32_1 = arith.constant 0 : i32
    return %arg0, %c0_i32, %c0_i32_0 : i32, i32, i32
  }
  func.func @transform_10(%arg0: i32) -> (i32, i32, i32) {
    %c0_i32 = arith.constant 0 : i32
    %c0_i32_0 = arith.constant 0 : i32
    %c0_i32_1 = arith.constant 0 : i32
    return %arg0, %c0_i32, %c0_i32_0 : i32, i32, i32
  }
}

module attributes {stable_mosaic.version = 11 : i64} {
  func.func @_k2_kernel(%arg0: i32, %arg1: memref<16x8x32xbf16, #tpu.memory_space<vmem>>, %arg2: memref<32x32xbf16, #tpu.memory_space<vmem>>, %arg3: memref<1x32xf32, #tpu.memory_space<vmem>>, %arg4: memref<1x32xf32, #tpu.memory_space<vmem>>, %arg5: memref<1x32xf32, #tpu.memory_space<vmem>>, %arg6: memref<16x8x32xbf16, #tpu.memory_space<vmem>>, %arg7: memref<1x2x32xf32, #tpu.memory_space<vmem>>) attributes {dimension_semantics = [#tpu.dimension_semantics<parallel>], iteration_bounds = array<i64: 2>, scalar_prefetch = 0 : i64, scratch_operands = 0 : i64, tpu.core_type = #tpu.core_type<tc>, window_params = [{transform_indices = @transform_0, window_bounds = array<i64: 16, 8, 32>}, {pipeline_mode = #tpu.pipeline_mode<synchronous>, transform_indices = @transform_1, window_bounds = array<i64: 32, 32>}, {pipeline_mode = #tpu.pipeline_mode<synchronous>, transform_indices = @transform_2, window_bounds = array<i64: 1, 32>}, {pipeline_mode = #tpu.pipeline_mode<synchronous>, transform_indices = @transform_3, window_bounds = array<i64: 1, 32>}, {pipeline_mode = #tpu.pipeline_mode<synchronous>, transform_indices = @transform_4, window_bounds = array<i64: 1, 32>}, {transform_indices = @transform_5, window_bounds = array<i64: 16, 8, 32>}, {transform_indices = @transform_6, window_bounds = array<i64: 1, 2, 32>}]} {
    %c0 = arith.constant 0 : index
    %c0_0 = arith.constant 0 : index
    %c0_1 = arith.constant 0 : index
    %0 = vector.load %arg1[%c0, %c0_0, %c0_1] : memref<16x8x32xbf16, #tpu.memory_space<vmem>>, vector<16x8x32xbf16>
    %1 = arith.extf %0 : vector<16x8x32xbf16> to vector<16x8x32xf32>
    %2 = vector.shape_cast %1 : vector<16x8x32xf32> to vector<128x32xf32>
    %c0_2 = arith.constant 0 : index
    %c0_3 = arith.constant 0 : index
    %3 = vector.load %arg4[%c0_2, %c0_3] : memref<1x32xf32, #tpu.memory_space<vmem>>, vector<1x32xf32>
    %4 = vector.broadcast %3 : vector<1x32xf32> to vector<128x32xf32>
    %5 = arith.mulf %2, %4 : vector<128x32xf32>
    %c0_4 = arith.constant 0 : index
    %c0_5 = arith.constant 0 : index
    %6 = vector.load %arg5[%c0_4, %c0_5] : memref<1x32xf32, #tpu.memory_space<vmem>>, vector<1x32xf32>
    %7 = vector.broadcast %6 : vector<1x32xf32> to vector<128x32xf32>
    %8 = arith.addf %5, %7 : vector<128x32xf32>
    %cst = arith.constant 5.000000e-01 : f32
    %9 = vector.broadcast %cst : f32 to vector<128x32xf32>
    %10 = arith.mulf %9, %8 : vector<128x32xf32>
    %cst_6 = arith.constant 4.471500e-02 : f32
    %11 = vector.broadcast %cst_6 : f32 to vector<128x32xf32>
    %12 = arith.mulf %11, %8 : vector<128x32xf32>
    %13 = arith.mulf %12, %8 : vector<128x32xf32>
    %14 = arith.mulf %13, %8 : vector<128x32xf32>
    %15 = arith.addf %8, %14 : vector<128x32xf32>
    %cst_7 = arith.constant 0.797884583 : f32
    %16 = vector.broadcast %cst_7 : f32 to vector<128x32xf32>
    %17 = arith.mulf %16, %15 : vector<128x32xf32>
    %18 = math.tanh %17 : vector<128x32xf32>
    %cst_8 = arith.constant 1.000000e+00 : f32
    %19 = vector.broadcast %cst_8 : f32 to vector<128x32xf32>
    %20 = arith.addf %19, %18 : vector<128x32xf32>
    %21 = arith.mulf %10, %20 : vector<128x32xf32>
    %22 = arith.truncf %21 : vector<128x32xf32> to vector<128x32xbf16>
    %c0_9 = arith.constant 0 : index
    %c0_10 = arith.constant 0 : index
    %23 = vector.load %arg2[%c0_9, %c0_10] : memref<32x32xbf16, #tpu.memory_space<vmem>>, vector<32x32xbf16>
    %cst_11 = arith.constant dense<0.000000e+00> : vector<128x32xf32>
    %24 = tpu.matmul %22, %23, %cst_11 {dimension_numbers = #tpu.dot_dimension_numbers<[1], [0], [0], [1], [0, 0, 1, 1], [], []>} : vector<128x32xbf16>, vector<32x32xbf16>, vector<128x32xf32> -> vector<128x32xf32>
    %c0_12 = arith.constant 0 : index
    %c0_13 = arith.constant 0 : index
    %25 = vector.load %arg3[%c0_12, %c0_13] : memref<1x32xf32, #tpu.memory_space<vmem>>, vector<1x32xf32>
    %26 = vector.broadcast %25 : vector<1x32xf32> to vector<128x32xf32>
    %27 = arith.addf %24, %26 : vector<128x32xf32>
    %28 = vector.shape_cast %27 : vector<128x32xf32> to vector<16x8x32xf32>
    %29 = arith.truncf %28 : vector<16x8x32xf32> to vector<16x8x32xbf16>
    %c0_14 = arith.constant 0 : index
    %c0_15 = arith.constant 0 : index
    %c0_16 = arith.constant 0 : index
    %30 = vector.load %arg6[%c0_14, %c0_15, %c0_16] : memref<16x8x32xbf16, #tpu.memory_space<vmem>>, vector<16x8x32xbf16>
    tpu.vector_store %arg6[%c0_14, %c0_15, %c0_16], %29 {strides = array<i32>} : memref<16x8x32xbf16, #tpu.memory_space<vmem>>, vector<16x8x32xbf16>,
    %c16_i32 = arith.constant 16 : i32
    %31 = arith.muli %arg0, %c16_i32 : i32
    %32 = tpu.iota {dimensions = array<i32: 0>} : vector<16x1xi32>
    %33 = vector.broadcast %31 : i32 to vector<16x1xi32>
    %34 = arith.addi %33, %32 : vector<16x1xi32>
    %c32_i32 = arith.constant 32 : i32
    %35 = vector.broadcast %c32_i32 : i32 to vector<16x1xi32>
    %36 = arith.cmpi slt, %34, %35 : vector<16x1xi32>
    %cst_17 = arith.constant 1.000000e+00 : f32
    %cst_18 = arith.constant 0.000000e+00 : f32
    %37 = vector.broadcast %cst_17 : f32 to vector<16x1xf32>
    %38 = vector.broadcast %cst_18 : f32 to vector<16x1xf32>
    %39 = arith.select %36, %37, %38 : vector<16x1xi1>, vector<16x1xf32>
    %40 = vector.shape_cast %39 : vector<16x1xf32> to vector<16x1x1xf32>
    %41 = vector.broadcast %40 : vector<16x1x1xf32> to vector<16x8x32xf32>
    %42 = arith.mulf %28, %41 : vector<16x8x32xf32>
    %43 = vector.shape_cast %42 : vector<16x8x32xf32> to vector<128x32xf32>
    %cst_19 = arith.constant dense<0.000000e+00> : vector<32xf32>
    %44 = vector.multi_reduction <add>, %43, %cst_19 [0] : vector<128x32xf32> to vector<32xf32>
    %45 = vector.shape_cast %44 : vector<32xf32> to vector<1x32xf32>
    %46 = arith.mulf %43, %43 : vector<128x32xf32>
    %cst_20 = arith.constant dense<0.000000e+00> : vector<32xf32>
    %47 = vector.multi_reduction <add>, %46, %cst_20 [0] : vector<128x32xf32> to vector<32xf32>
    %48 = vector.shape_cast %47 : vector<32xf32> to vector<1x32xf32>
    %49 = tpu.concatenate %45, %48 in 0 : vector<1x32xf32>, vector<1x32xf32> -> vector<2x32xf32>
    %50 = vector.shape_cast %49 : vector<2x32xf32> to vector<1x2x32xf32>
    %c0_21 = arith.constant 0 : index
    %c0_22 = arith.constant 0 : index
    %c0_23 = arith.constant 0 : index
    %51 = vector.load %arg7[%c0_21, %c0_22, %c0_23] : memref<1x2x32xf32, #tpu.memory_space<vmem>>, vector<1x2x32xf32>
    tpu.vector_store %arg7[%c0_21, %c0_22, %c0_23], %50 {strides = array<i32>} : memref<1x2x32xf32, #tpu.memory_space<vmem>>, vector<1x2x32xf32>,
    return
  }
  func.func @transform_0(%arg0: i32) -> (i32, i32, i32) {
    %c0_i32 = arith.constant 0 : i32
    %c0_i32_0 = arith.constant 0 : i32
    %c0_i32_1 = arith.constant 0 : i32
    return %arg0, %c0_i32, %c0_i32_0 : i32, i32, i32
  }
  func.func @transform_1(%arg0: i32) -> (i32, i32) {
    %c0_i32 = arith.constant 0 : i32
    %c0_i32_0 = arith.constant 0 : i32
    %c0_i32_1 = arith.constant 0 : i32
    return %c0_i32, %c0_i32_0 : i32, i32
  }
  func.func @transform_2(%arg0: i32) -> (i32, i32) {
    %c0_i32 = arith.constant 0 : i32
    %c0_i32_0 = arith.constant 0 : i32
    %c0_i32_1 = arith.constant 0 : i32
    return %c0_i32, %c0_i32_0 : i32, i32
  }
  func.func @transform_3(%arg0: i32) -> (i32, i32) {
    %c0_i32 = arith.constant 0 : i32
    %c0_i32_0 = arith.constant 0 : i32
    %c0_i32_1 = arith.constant 0 : i32
    return %c0_i32, %c0_i32_0 : i32, i32
  }
  func.func @transform_4(%arg0: i32) -> (i32, i32) {
    %c0_i32 = arith.constant 0 : i32
    %c0_i32_0 = arith.constant 0 : i32
    %c0_i32_1 = arith.constant 0 : i32
    return %c0_i32, %c0_i32_0 : i32, i32
  }
  func.func @transform_5(%arg0: i32) -> (i32, i32, i32) {
    %c0_i32 = arith.constant 0 : i32
    %c0_i32_0 = arith.constant 0 : i32
    %c0_i32_1 = arith.constant 0 : i32
    return %arg0, %c0_i32, %c0_i32_0 : i32, i32, i32
  }
  func.func @transform_6(%arg0: i32) -> (i32, i32, i32) {
    %c0_i32 = arith.constant 0 : i32
    %c0_i32_0 = arith.constant 0 : i32
    %c0_i32_1 = arith.constant 0 : i32
    return %arg0, %c0_i32, %c0_i32_0 : i32, i32, i32
  }
}

module attributes {stable_mosaic.version = 11 : i64} {
  func.func @_k3_kernel(%arg0: i32, %arg1: memref<16x8x32xbf16, #tpu.memory_space<vmem>>, %arg2: memref<16x8x32xbf16, #tpu.memory_space<vmem>>, %arg3: memref<16x8x4xf32, #tpu.memory_space<vmem>>, %arg4: memref<32x32xbf16, #tpu.memory_space<vmem>>, %arg5: memref<1x32xf32, #tpu.memory_space<vmem>>, %arg6: memref<32x32xbf16, #tpu.memory_space<vmem>>, %arg7: memref<1x32xf32, #tpu.memory_space<vmem>>, %arg8: memref<4x32xf32, #tpu.memory_space<vmem>>, %arg9: memref<1x32xf32, #tpu.memory_space<vmem>>, %arg10: memref<1x32xf32, #tpu.memory_space<vmem>>, %arg11: memref<1x32xf32, #tpu.memory_space<vmem>>, %arg12: memref<16x32xf32, #tpu.memory_space<vmem>>) attributes {dimension_semantics = [#tpu.dimension_semantics<parallel>], iteration_bounds = array<i64: 2>, scalar_prefetch = 0 : i64, scratch_operands = 0 : i64, tpu.core_type = #tpu.core_type<tc>, window_params = [{transform_indices = @transform_0, window_bounds = array<i64: 16, 8, 32>}, {transform_indices = @transform_1, window_bounds = array<i64: 16, 8, 32>}, {transform_indices = @transform_2, window_bounds = array<i64: 16, 8, 4>}, {pipeline_mode = #tpu.pipeline_mode<synchronous>, transform_indices = @transform_3, window_bounds = array<i64: 32, 32>}, {pipeline_mode = #tpu.pipeline_mode<synchronous>, transform_indices = @transform_4, window_bounds = array<i64: 1, 32>}, {pipeline_mode = #tpu.pipeline_mode<synchronous>, transform_indices = @transform_5, window_bounds = array<i64: 32, 32>}, {pipeline_mode = #tpu.pipeline_mode<synchronous>, transform_indices = @transform_6, window_bounds = array<i64: 1, 32>}, {pipeline_mode = #tpu.pipeline_mode<synchronous>, transform_indices = @transform_7, window_bounds = array<i64: 4, 32>}, {pipeline_mode = #tpu.pipeline_mode<synchronous>, transform_indices = @transform_8, window_bounds = array<i64: 1, 32>}, {pipeline_mode = #tpu.pipeline_mode<synchronous>, transform_indices = @transform_9, window_bounds = array<i64: 1, 32>}, {pipeline_mode = #tpu.pipeline_mode<synchronous>, transform_indices = @transform_10, window_bounds = array<i64: 1, 32>}, {transform_indices = @transform_11, window_bounds = array<i64: 16, 32>}]} {
    %c0 = arith.constant 0 : index
    %c0_0 = arith.constant 0 : index
    %c0_1 = arith.constant 0 : index
    %0 = vector.load %arg1[%c0, %c0_0, %c0_1] : memref<16x8x32xbf16, #tpu.memory_space<vmem>>, vector<16x8x32xbf16>
    %1 = arith.extf %0 : vector<16x8x32xbf16> to vector<16x8x32xf32>
    %2 = vector.shape_cast %1 : vector<16x8x32xf32> to vector<128x32xf32>
    %c0_2 = arith.constant 0 : index
    %c0_3 = arith.constant 0 : index
    %3 = vector.load %arg10[%c0_2, %c0_3] : memref<1x32xf32, #tpu.memory_space<vmem>>, vector<1x32xf32>
    %4 = vector.broadcast %3 : vector<1x32xf32> to vector<128x32xf32>
    %5 = arith.mulf %2, %4 : vector<128x32xf32>
    %c0_4 = arith.constant 0 : index
    %c0_5 = arith.constant 0 : index
    %6 = vector.load %arg11[%c0_4, %c0_5] : memref<1x32xf32, #tpu.memory_space<vmem>>, vector<1x32xf32>
    %7 = vector.broadcast %6 : vector<1x32xf32> to vector<128x32xf32>
    %8 = arith.addf %5, %7 : vector<128x32xf32>
    %cst = arith.constant 5.000000e-01 : f32
    %9 = vector.broadcast %cst : f32 to vector<128x32xf32>
    %10 = arith.mulf %9, %8 : vector<128x32xf32>
    %cst_6 = arith.constant 4.471500e-02 : f32
    %11 = vector.broadcast %cst_6 : f32 to vector<128x32xf32>
    %12 = arith.mulf %11, %8 : vector<128x32xf32>
    %13 = arith.mulf %12, %8 : vector<128x32xf32>
    %14 = arith.mulf %13, %8 : vector<128x32xf32>
    %15 = arith.addf %8, %14 : vector<128x32xf32>
    %cst_7 = arith.constant 0.797884583 : f32
    %16 = vector.broadcast %cst_7 : f32 to vector<128x32xf32>
    %17 = arith.mulf %16, %15 : vector<128x32xf32>
    %18 = math.tanh %17 : vector<128x32xf32>
    %cst_8 = arith.constant 1.000000e+00 : f32
    %19 = vector.broadcast %cst_8 : f32 to vector<128x32xf32>
    %20 = arith.addf %19, %18 : vector<128x32xf32>
    %21 = arith.mulf %10, %20 : vector<128x32xf32>
    %22 = arith.truncf %21 : vector<128x32xf32> to vector<128x32xbf16>
    %c0_9 = arith.constant 0 : index
    %c0_10 = arith.constant 0 : index
    %23 = vector.load %arg4[%c0_9, %c0_10] : memref<32x32xbf16, #tpu.memory_space<vmem>>, vector<32x32xbf16>
    %cst_11 = arith.constant dense<0.000000e+00> : vector<128x32xf32>
    %24 = tpu.matmul %22, %23, %cst_11 {dimension_numbers = #tpu.dot_dimension_numbers<[1], [0], [0], [1], [0, 0, 1, 1], [], []>} : vector<128x32xbf16>, vector<32x32xbf16>, vector<128x32xf32> -> vector<128x32xf32>
    %c0_12 = arith.constant 0 : index
    %c0_13 = arith.constant 0 : index
    %25 = vector.load %arg5[%c0_12, %c0_13] : memref<1x32xf32, #tpu.memory_space<vmem>>, vector<1x32xf32>
    %26 = vector.broadcast %25 : vector<1x32xf32> to vector<128x32xf32>
    %27 = arith.addf %24, %26 : vector<128x32xf32>
    %28 = vector.shape_cast %27 : vector<128x32xf32> to vector<16x8x32xf32>
    %c0_14 = arith.constant 0 : index
    %c0_15 = arith.constant 0 : index
    %c0_16 = arith.constant 0 : index
    %29 = vector.load %arg2[%c0_14, %c0_15, %c0_16] : memref<16x8x32xbf16, #tpu.memory_space<vmem>>, vector<16x8x32xbf16>
    %30 = vector.shape_cast %29 : vector<16x8x32xbf16> to vector<128x32xbf16>
    %c0_17 = arith.constant 0 : index
    %c0_18 = arith.constant 0 : index
    %31 = vector.load %arg6[%c0_17, %c0_18] : memref<32x32xbf16, #tpu.memory_space<vmem>>, vector<32x32xbf16>
    %cst_19 = arith.constant dense<0.000000e+00> : vector<128x32xf32>
    %32 = tpu.matmul %30, %31, %cst_19 {dimension_numbers = #tpu.dot_dimension_numbers<[1], [0], [0], [1], [0, 0, 1, 1], [], []>} : vector<128x32xbf16>, vector<32x32xbf16>, vector<128x32xf32> -> vector<128x32xf32>
    %c0_20 = arith.constant 0 : index
    %c0_21 = arith.constant 0 : index
    %33 = vector.load %arg7[%c0_20, %c0_21] : memref<1x32xf32, #tpu.memory_space<vmem>>, vector<1x32xf32>
    %34 = vector.broadcast %33 : vector<1x32xf32> to vector<128x32xf32>
    %35 = arith.addf %32, %34 : vector<128x32xf32>
    %c0_22 = arith.constant 0 : index
    %c0_23 = arith.constant 0 : index
    %c0_24 = arith.constant 0 : index
    %36 = vector.load %arg3[%c0_22, %c0_23, %c0_24] : memref<16x8x4xf32, #tpu.memory_space<vmem>>, vector<16x8x4xf32>
    %37 = vector.shape_cast %36 : vector<16x8x4xf32> to vector<128x4xf32>
    %c0_25 = arith.constant 0 : index
    %c0_26 = arith.constant 0 : index
    %38 = vector.load %arg8[%c0_25, %c0_26] : memref<4x32xf32, #tpu.memory_space<vmem>>, vector<4x32xf32>
    %c0_27 = arith.constant 0 : index
    %c0_28 = arith.constant 0 : index
    %39 = vector.load %arg9[%c0_27, %c0_28] : memref<1x32xf32, #tpu.memory_space<vmem>>, vector<1x32xf32>
    %40 = vector.extract_strided_slice %37 {offsets = [0, 0], sizes = [128, 1], strides = [1, 1]} : vector<128x4xf32> to vector<128x1xf32>
    %41 = vector.extract_strided_slice %38 {offsets = [0, 0], sizes = [1, 32], strides = [1, 1]} : vector<4x32xf32> to vector<1x32xf32>
    %42 = vector.broadcast %40 : vector<128x1xf32> to vector<128x32xf32>
    %43 = vector.broadcast %41 : vector<1x32xf32> to vector<128x32xf32>
    %44 = arith.mulf %42, %43 : vector<128x32xf32>
    %45 = vector.broadcast %39 : vector<1x32xf32> to vector<128x32xf32>
    %46 = arith.addf %45, %44 : vector<128x32xf32>
    %47 = vector.extract_strided_slice %37 {offsets = [0, 1], sizes = [128, 1], strides = [1, 1]} : vector<128x4xf32> to vector<128x1xf32>
    %48 = vector.extract_strided_slice %38 {offsets = [1, 0], sizes = [1, 32], strides = [1, 1]} : vector<4x32xf32> to vector<1x32xf32>
    %49 = vector.broadcast %47 : vector<128x1xf32> to vector<128x32xf32>
    %50 = vector.broadcast %48 : vector<1x32xf32> to vector<128x32xf32>
    %51 = arith.mulf %49, %50 : vector<128x32xf32>
    %52 = arith.addf %46, %51 : vector<128x32xf32>
    %53 = vector.extract_strided_slice %37 {offsets = [0, 2], sizes = [128, 1], strides = [1, 1]} : vector<128x4xf32> to vector<128x1xf32>
    %54 = vector.extract_strided_slice %38 {offsets = [2, 0], sizes = [1, 32], strides = [1, 1]} : vector<4x32xf32> to vector<1x32xf32>
    %55 = vector.broadcast %53 : vector<128x1xf32> to vector<128x32xf32>
    %56 = vector.broadcast %54 : vector<1x32xf32> to vector<128x32xf32>
    %57 = arith.mulf %55, %56 : vector<128x32xf32>
    %58 = arith.addf %52, %57 : vector<128x32xf32>
    %59 = vector.extract_strided_slice %37 {offsets = [0, 3], sizes = [128, 1], strides = [1, 1]} : vector<128x4xf32> to vector<128x1xf32>
    %60 = vector.extract_strided_slice %38 {offsets = [3, 0], sizes = [1, 32], strides = [1, 1]} : vector<4x32xf32> to vector<1x32xf32>
    %61 = vector.broadcast %59 : vector<128x1xf32> to vector<128x32xf32>
    %62 = vector.broadcast %60 : vector<1x32xf32> to vector<128x32xf32>
    %63 = arith.mulf %61, %62 : vector<128x32xf32>
    %64 = arith.addf %58, %63 : vector<128x32xf32>
    %65 = arith.addf %35, %64 : vector<128x32xf32>
    %66 = vector.shape_cast %65 : vector<128x32xf32> to vector<16x8x32xf32>
    %cst_29 = arith.constant dense<0xFF800000> : vector<16x32xf32>
    %67 = vector.multi_reduction <maximumf>, %28, %cst_29 [1] : vector<16x8x32xf32> to vector<16x32xf32>
    %68 = vector.shape_cast %67 : vector<16x32xf32> to vector<16x1x32xf32>
    %69 = vector.broadcast %68 : vector<16x1x32xf32> to vector<16x8x32xf32>
    %70 = arith.subf %28, %69 : vector<16x8x32xf32>
    %71 = math.exp %70 : vector<16x8x32xf32>
    %cst_30 = arith.constant dense<0.000000e+00> : vector<16x32xf32>
    %72 = vector.multi_reduction <add>, %71, %cst_30 [1] : vector<16x8x32xf32> to vector<16x32xf32>
    %73 = vector.shape_cast %72 : vector<16x32xf32> to vector<16x1x32xf32>
    %74 = tpu.reciprocal %73 {approx = true} : vector<16x1x32xf32> -> vector<16x1x32xf32>
    %75 = vector.broadcast %74 : vector<16x1x32xf32> to vector<16x8x32xf32>
    %76 = arith.mulf %71, %75 : vector<16x8x32xf32>
    %77 = arith.mulf %76, %66 : vector<16x8x32xf32>
    %cst_31 = arith.constant dense<0.000000e+00> : vector<16x32xf32>
    %78 = vector.multi_reduction <add>, %77, %cst_31 [1] : vector<16x8x32xf32> to vector<16x32xf32>
    %c0_32 = arith.constant 0 : index
    %c0_33 = arith.constant 0 : index
    %79 = vector.load %arg12[%c0_32, %c0_33] : memref<16x32xf32, #tpu.memory_space<vmem>>, vector<16x32xf32>
    tpu.vector_store %arg12[%c0_32, %c0_33], %78 {strides = array<i32>} : memref<16x32xf32, #tpu.memory_space<vmem>>, vector<16x32xf32>,
    return
  }
  func.func @transform_0(%arg0: i32) -> (i32, i32, i32) {
    %c0_i32 = arith.constant 0 : i32
    %c0_i32_0 = arith.constant 0 : i32
    %c0_i32_1 = arith.constant 0 : i32
    return %arg0, %c0_i32, %c0_i32_0 : i32, i32, i32
  }
  func.func @transform_1(%arg0: i32) -> (i32, i32, i32) {
    %c0_i32 = arith.constant 0 : i32
    %c0_i32_0 = arith.constant 0 : i32
    %c0_i32_1 = arith.constant 0 : i32
    return %arg0, %c0_i32, %c0_i32_0 : i32, i32, i32
  }
  func.func @transform_2(%arg0: i32) -> (i32, i32, i32) {
    %c0_i32 = arith.constant 0 : i32
    %c0_i32_0 = arith.constant 0 : i32
    %c0_i32_1 = arith.constant 0 : i32
    return %arg0, %c0_i32, %c0_i32_0 : i32, i32, i32
  }
  func.func @transform_3(%arg0: i32) -> (i32, i32) {
    %c0_i32 = arith.constant 0 : i32
    %c0_i32_0 = arith.constant 0 : i32
    %c0_i32_1 = arith.constant 0 : i32
    return %c0_i32, %c0_i32_0 : i32, i32
  }
  func.func @transform_4(%arg0: i32) -> (i32, i32) {
    %c0_i32 = arith.constant 0 : i32
    %c0_i32_0 = arith.constant 0 : i32
    %c0_i32_1 = arith.constant 0 : i32
    return %c0_i32, %c0_i32_0 : i32, i32
  }
  func.func @transform_5(%arg0: i32) -> (i32, i32) {
    %c0_i32 = arith.constant 0 : i32
    %c0_i32_0 = arith.constant 0 : i32
    %c0_i32_1 = arith.constant 0 : i32
    return %c0_i32, %c0_i32_0 : i32, i32
  }
  func.func @transform_6(%arg0: i32) -> (i32, i32) {
    %c0_i32 = arith.constant 0 : i32
    %c0_i32_0 = arith.constant 0 : i32
    %c0_i32_1 = arith.constant 0 : i32
    return %c0_i32, %c0_i32_0 : i32, i32
  }
  func.func @transform_7(%arg0: i32) -> (i32, i32) {
    %c0_i32 = arith.constant 0 : i32
    %c0_i32_0 = arith.constant 0 : i32
    %c0_i32_1 = arith.constant 0 : i32
    return %c0_i32, %c0_i32_0 : i32, i32
  }
  func.func @transform_8(%arg0: i32) -> (i32, i32) {
    %c0_i32 = arith.constant 0 : i32
    %c0_i32_0 = arith.constant 0 : i32
    %c0_i32_1 = arith.constant 0 : i32
    return %c0_i32, %c0_i32_0 : i32, i32
  }
  func.func @transform_9(%arg0: i32) -> (i32, i32) {
    %c0_i32 = arith.constant 0 : i32
    %c0_i32_0 = arith.constant 0 : i32
    %c0_i32_1 = arith.constant 0 : i32
    return %c0_i32, %c0_i32_0 : i32, i32
  }
  func.func @transform_10(%arg0: i32) -> (i32, i32) {
    %c0_i32 = arith.constant 0 : i32
    %c0_i32_0 = arith.constant 0 : i32
    %c0_i32_1 = arith.constant 0 : i32
    return %c0_i32, %c0_i32_0 : i32, i32
  }
  func.func @transform_11(%arg0: i32) -> (i32, i32) {
    %c0_i32 = arith.constant 0 : i32
    %c0_i32_0 = arith.constant 0 : i32
    return %arg0, %c0_i32 : i32, i32
  }
}

</mosaic_0001>

<bundles_post_ra>
// kernel: neg.1
= control target key start
LH: loop header
LB: loop body
LE: loop exit
PB: predicated region body
PF: predicated region fallthrough
CT: control target
= control target key end

     0   :  { %s72_s0 = inlined_call_operand.vmem [shape: f32[2,16,16], index: 0, kind: input, shape index: {}]   ;;  %s73_s1 = inlined_call_operand.vmem [shape: f32[2,16,16], index: 1, kind: output, shape index: {}]  }
   0x1   :  { %v2_v0 = vld [vmem:[%s72_s0] sm:$0xff]  ;;  %v32_v1 = vld [vmem:[%s72_s0 + $0x10] sm:$0xff]  ;;  %v34_v2 = vld [vmem:[%s72_s0 + $0x8] sm:$0xff] }
   0x2   :  { %v5_v3 = vxor.u32 2147483648, %v2_v0  ;;  %v12_v4 = vxor.u32 2147483648, %v32_v1  ;;  %v20_v5 = vxor.u32 2147483648, %v34_v2  ;;  %v36_v6 = vld [vmem:[%s72_s0 + $0x18] sm:$0xff] }
   0x3   :  { %v28_v7 = vxor.u32 2147483648, %v36_v6 }
   0x4   :  { %7 = vst [vmem:[%s73_s1] sm:$0xff] %v5_v3  ;;  %33 = vst [vmem:[%s73_s1 + $0x10] sm:$0xff] %v12_v4 }
   0x5   :  { %35 = vst [vmem:[%s73_s1 + $0x8] sm:$0xff] %v20_v5  ;;  %37 = vst [vmem:[%s73_s1 + $0x18] sm:$0xff] %v28_v7 }

// kernel: point_transformer_layer.4
= control target key start
LH: loop header
LB: loop body
LE: loop exit
PB: predicated region body
PF: predicated region fallthrough
CT: control target
= control target key end

     0   :  { %s1151_s21 = smov 0   ;;  %s1484_s0 = inlined_call_operand.vmem [shape: bf16[32,8,32], index: 0, kind: input, shape index: {}]   ;;  %s1485_s1 = inlined_call_operand.vmem [shape: bf16[32,32], index: 1, kind: input, shape index: {}]   ;;  %s1486_s2 = inlined_call_operand.vmem [shape: f32[1,32], index: 2, kind: input, shape index: {}]   ;;  %s1487_s3 = inlined_call_operand.vmem [shape: f32[1,32], index: 3, kind: input, shape index: {}]   ;;  %s1488_s4 = inlined_call_operand.vmem [shape: f32[1,32], index: 4, kind: input, shape index: {}]   ;;  %s1489_s5 = inlined_call_operand.vmem [shape: bf16[32,8,32], index: 5, kind: output, shape index: {0}]   ;;  %s1490_s6 = inlined_call_operand.vmem [shape: f32[2,2,32], index: 6, kind: output, shape index: {1}]  }
   0x1 LB: > { %s1157_s22 = sadd.s32 4294967295, %s1113_s21   ;;  %p969_p0 = scmp.ge.s32.totalorder %s1113_s21, 1  ;;  %s1113_s21 = sphi %s1151_s21, %s17_s21  }
   0x2   : > { %p216_p1 = scmp.lt.s32.totalorder %s1113_s21, 3 }
   0x4   : > { %p217_p2 = pnand %p969_p0, %p216_p1 }
   0x5   : > { %v1073_v0 = vld [vmem:[%s1485_s1] sm:$0xff] (!%p217_p2)   ;;  %s1165_s25 = sshll.u32 (!%p217_p2), %s1157_s22, 4  ;;  %v1074_v1 = vld [vmem:[%s1485_s1 + $0x8] sm:$0xff] (!%p217_p2)   ;;  %vm520_vm0 = vcmask (!%p217_p2), 261120   ;;  %vm658_vm2 = vcmask (!%p217_p2), 257024   ;;  %p262_p4 = scmp.lt.s32.totalorder (!%p217_p2), %s1157_s22, 1 }
   0x6   : > { %220 = sbr.rel (%p217_p2) target bundleno = 328 (0x148), region = 40  ;;  %p251_p3 = scmp.lt.s32.totalorder (!%p217_p2), %s1165_s25, 31  ;;  %1040 = vmatprep.subr.bf16.mxu0 (!%p217_p2), %v1073_v0  ;;  %1060 = vmatprep.subr.bf16.mxu1 (!%p217_p2), %v1073_v0  ;;  %v1185_v2 = vld [vmem:[%s1487_s3] ss:$0 sm:$0xff] (!%p217_p2)  ;;  %vm874_vm4 = vcmask (!%p217_p2), 1040384   ;;  %vm876_vm5 = vcmask (!%p217_p2), 254976  }
   0x7   : > { %1041 = vmatpush3.bf16.msra.mxu0 (!%p217_p2), %v1073_v0  ;;  %1062 = vmatpush3.bf16.msra.mxu1 (!%p217_p2), %v1073_v0  ;;  %v1194_v11 = vld [vmem:[%s1488_s4] ss:$0 sm:$0xff] (!%p217_p2) }
   0x8   : > { %1042 = vmatprep.subr.bf16.mxu0 (!%p217_p2), %v1074_v1  ;;  %1061 = vmatprep.subr.bf16.mxu1 (!%p217_p2), %v1074_v1 }
   0xb   : > { %1043 = vmatpush3.bf16.msra.mxu0 (!%p217_p2), %v1074_v1  ;;  %1063 = vmatpush3.bf16.msra.mxu1 (!%p217_p2), %v1074_v1 }
   0xd   : > { %s1172_s28 = scalar_select %p251_p3, %s1165_s25, 31 }
   0xe   : > { %s1492_s22 = smov (!%p262_p4, %s1157_s22), 1 }
   0xf   : > { %s971_s29 = sshll.u32 %s1172_s28, 2  ;;  %s974_s18 = sshll.u32 %s1492_s22, 1 }
  0x10   : > { %s1180_s8 = scalar_lea.vmem %s1484_s0, %s971_s29  ;;  %s1356_s17 = scalar_lea.vmem %s1489_s5, %s971_s29 }
  0x11   : > { %v992_v3 = vld [vmem:[%s1180_s8] sm:$0xff]   ;;  %v1023_v4 = vld [vmem:[%s1180_s8 + $0x8] sm:$0xff]   ;;  %v1024_v5 = vld [vmem:[%s1180_s8 + $0x10] sm:$0xff]   ;;  %s265_s23 = scalar_lea.vmem %s1490_s6, %s974_s18 }
  0x12   : > { %v993_v6 = vunpack.c.l.bf16 %v992_v3  ;;  %v994_v7 = vunpack.c.h.bf16 %v992_v3  ;;  %v997_v8 = vunpack.c.l.bf16 %v1023_v4  ;;  %v998_v9 = vunpack.c.h.bf16 %v1023_v4  ;;  %v1025_v10 = vld [vmem:[%s1180_s8 + $0x18] sm:$0xff]   ;;  %v1026_v60 = vld [vmem:[%s1180_s8 + $0x20] sm:$0xff]  }
  0x13   : > { %v1001_v12 = vunpack.c.l.bf16 %v1024_v5  ;;  %v1002_v13 = vunpack.c.h.bf16 %v1024_v5  ;;  %v1005_v14 = vunpack.c.l.bf16 %v1025_v10  ;;  %v1006_v15 = vunpack.c.h.bf16 %v1025_v10 }
  0x14   : > { %v306_v16 = vmul.f32 %v993_v6, %v1185_v2  ;;  %v307_v17 = vmul.f32 %v994_v7, %v1185_v2  ;;  %v308_v18 = vmul.f32 %v997_v8, %v1185_v2  ;;  %v309_v19 = vmul.f32 %v998_v9, %v1185_v2  ;;  %v1027_v9 = vld [vmem:[%s1180_s8 + $0x28] sm:$0xff]  }
  0x15   : > { %v310_v20 = vmul.f32 %v1001_v12, %v1185_v2  ;;  %v311_v21 = vmul.f32 %v1002_v13, %v1185_v2  ;;  %v312_v22 = vmul.f32 %v1005_v14, %v1185_v2  ;;  %v313_v23 = vmul.f32 %v1006_v15, %v1185_v2 }
  0x16   : > { %v329_v24 = vadd.f32 %v1194_v11, %v306_v16  ;;  %v330_v25 = vadd.f32 %v1194_v11, %v307_v17  ;;  %v331_v26 = vadd.f32 %v1194_v11, %v308_v18  ;;  %v332_v27 = vadd.f32 %v1194_v11, %v309_v19 }
  0x17   : > { %v1209_v28 = vadd.f32 %v1194_v11, %v310_v20  ;;  %v1212_v29 = vadd.f32 %v1194_v11, %v311_v21  ;;  %v1215_v34 = vadd.f32 %v1194_v11, %v312_v22  ;;  %v1218_v35 = vadd.f32 %v1194_v11, %v313_v23  ;;  %v1028_v20 = vld [vmem:[%s1180_s8 + $0x30] sm:$0xff]  }
  0x18   : > { %v361_v30 = vmul.f32 0.044715, %v329_v24  ;;  %v362_v31 = vmul.f32 0.044715, %v330_v25  ;;  %v363_v32 = vmul.f32 0.044715, %v331_v26  ;;  %v1009_v8 = vunpack.c.l.bf16 %v1026_v60 }
  0x19   : > { %v364_v33 = vmul.f32 0.044715, %v332_v27  ;;  %v1220_v36 = vmul.f32 0.5, %v329_v24  ;;  %v1222_v37 = vmul.f32 0.5, %v330_v25  ;;  %v365_v42 = vmul.f32 0.044715, %v1209_v28 }
  0x1a   : > { %v377_v38 = vmul.f32 %v361_v30, %v329_v24  ;;  %v378_v39 = vmul.f32 %v362_v31, %v330_v25  ;;  %v379_v40 = vmul.f32 %v363_v32, %v331_v26  ;;  %v366_v43 = vmul.f32 0.044715, %v1212_v29 }
  0x1b   : > { %v380_v41 = vmul.f32 %v364_v33, %v332_v27  ;;  %v1226_v46 = vmul.f32 0.5, %v331_v26  ;;  %v1228_v47 = vmul.f32 0.5, %v332_v27  ;;  %v381_v50 = vmul.f32 %v365_v42, %v1209_v28 }
  0x1c   : > { %v393_v44 = vmul.f32 %v377_v38, %v329_v24  ;;  %v394_v45 = vmul.f32 %v378_v39, %v330_v25  ;;  %v395_v48 = vmul.f32 %v379_v40, %v331_v26  ;;  %v382_v51 = vmul.f32 %v366_v43, %v1212_v29  ;;  %v1265_v39 = vld [vmem:[%s1180_s8 + $0x38] sm:$0xff]  }
  0x1d   : > { %v396_v49 = vmul.f32 %v380_v41, %v332_v27  ;;  %v367_v54 = vmul.f32 0.044715, %v1215_v34  ;;  %v368_v55 = vmul.f32 0.044715, %v1218_v35  ;;  %v397_v58 = vmul.f32 %v381_v50, %v1209_v28 }
  0x1e   : > { %v409_v52 = vadd.f32 %v393_v44, %v329_v24  ;;  %v410_v53 = vadd.f32 %v394_v45, %v330_v25  ;;  %v411_v56 = vadd.f32 %v395_v48, %v331_v26  ;;  %v398_v59 = vmul.f32 %v382_v51, %v1212_v29 }
  0x1f   : > { %v412_v57 = vadd.f32 %v396_v49, %v332_v27  ;;  %v383_v63 = vmul.f32 %v367_v54, %v1215_v34  ;;  %v384_v0 = vmul.f32 %v368_v55, %v1218_v35  ;;  %v413_v4 = vadd.f32 %v397_v58, %v1209_v28 }
  0x20   : > { %v425_v61 = vmul.f32 0.7978846, %v409_v52  ;;  %v426_v62 = vmul.f32 0.7978846, %v410_v53  ;;  %v427_v1 = vmul.f32 0.7978846, %v411_v56  ;;  %v414_v5 = vadd.f32 %v398_v59, %v1212_v29 }
  0x21   : > { %v428_v3 = vmul.f32 0.7978846, %v412_v57  ;;  %v399_v6 = vmul.f32 %v383_v63, %v1215_v34  ;;  %v400_v7 = vmul.f32 %v384_v0, %v1218_v35  ;;  %v429_v10 = vmul.f32 0.7978846, %v413_v4 }
  0x22   : > { %1075 = vtanh.f32 %v425_v61  ;;  %v430_v12 = vmul.f32 0.7978846, %v414_v5  ;;  %v1010_v13 = vunpack.c.h.bf16 %v1026_v60  ;;  %v314_v16 = vmul.f32 %v1009_v8, %v1185_v2 }
  0x23   : > { %1077 = vtanh.f32 %v426_v62  ;;  %v415_v14 = vadd.f32 %v399_v6, %v1215_v34  ;;  %v416_v15 = vadd.f32 %v400_v7, %v1218_v35  ;;  %v1013_v18 = vunpack.c.l.bf16 %v1027_v9 }
  0x24   : > { %1079 = vtanh.f32 %v427_v1  ;;  %v315_v17 = vmul.f32 %v1010_v13, %v1185_v2  ;;  %v1014_v19 = vunpack.c.h.bf16 %v1027_v9  ;;  %v1250_v23 = vadd.f32 %v1194_v11, %v314_v16 }
  0x25   : > { %1081 = vtanh.f32 %v428_v3  ;;  %v431_v21 = vmul.f32 0.7978846, %v415_v14  ;;  %v432_v22 = vmul.f32 0.7978846, %v416_v15  ;;  %v316_v25 = vmul.f32 %v1013_v18, %v1185_v2 }
  0x26   : > { %1083 = vtanh.f32 %v429_v10  ;;  %v1253_v24 = vadd.f32 %v1194_v11, %v315_v17  ;;  %v317_v26 = vmul.f32 %v1014_v19, %v1185_v2  ;;  %v349_v27 = vmul.f32 0.5, %v1209_v28 }
  0x27   : > { %1085 = vtanh.f32 %v430_v12  ;;  %v369_v30 = vmul.f32 0.044715, %v1250_v23  ;;  %v1017_v31 = vunpack.c.l.bf16 %v1028_v20  ;;  %v350_v32 = vmul.f32 0.5, %v1212_v29 }
  0x28   : > { %1087 = vtanh.f32 %v431_v21  ;;  %v370_v33 = vmul.f32 0.044715, %v1253_v24  ;;  %v1262_v38 = vadd.f32 %v1194_v11, %v316_v25  ;;  %v1269_v41 = vadd.f32 %v1194_v11, %v317_v26 }
  0x29   : > { %1089 = vtanh.f32 %v432_v22  ;;  %v385_v40 = vmul.f32 %v369_v30, %v1250_v23  ;;  %v1018_v28 = vunpack.c.h.bf16 %v1028_v20  ;;  %v318_v42 = vmul.f32 %v1017_v31, %v1185_v2 }
  0x2a   : > { %v351_v43 = vmul.f32 0.5, %v1215_v34  ;;  %v352_v29 = vmul.f32 0.5, %v1218_v35  ;;  %v386_v44 = vmul.f32 %v370_v33, %v1253_v24  ;;  %v371_v45 = vmul.f32 0.044715, %v1262_v38 }
  0x2b   : > { %v401_v49 = vmul.f32 %v385_v40, %v1250_v23  ;;  %v372_v50 = vmul.f32 0.044715, %v1269_v41  ;;  %v319_v51 = vmul.f32 %v1018_v28, %v1185_v2  ;;  %v1021_v52 = vunpack.c.l.bf16 %v1265_v39 }
  0x2c   : > { %v1076_v48 = vpop.eup %1075  ;;  %v402_v55 = vmul.f32 %v386_v44, %v1253_v24  ;;  %v387_v34 = vmul.f32 %v371_v45, %v1262_v38  ;;  %v1283_v35 = vadd.f32 %v1194_v11, %v318_v42  ;;  %v1022_v33 = vunpack.c.h.bf16 %v1265_v39 }
  0x2d   : > { %v1078_v53 = vpop.eup %1077  ;;  %v457_v54 = vadd.f32 1.0, %v1076_v48  ;;  %v417_v58 = vadd.f32 %v401_v49, %v1250_v23  ;;  %v388_v59 = vmul.f32 %v372_v50, %v1269_v41  ;;  %v1288_v60 = vadd.f32 %v1194_v11, %v319_v51 }
  0x2e   : > { %v1080_v56 = vpop.eup %1079  ;;  %v458_v57 = vadd.f32 1.0, %v1078_v53  ;;  %v418_v0 = vadd.f32 %v402_v55, %v1253_v24  ;;  %v403_v1 = vmul.f32 %v387_v34, %v1262_v38  ;;  %v373_v31 = vmul.f32 0.044715, %v1283_v35 }
  0x2f   : > { %v1082_v61 = vpop.eup %1081  ;;  %v473_v62 = vmul.f32 %v457_v54, %v1220_v36  ;;  %v459_v63 = vadd.f32 1.0, %v1080_v56  ;;  %v433_v6 = vmul.f32 0.7978846, %v417_v58  ;;  %v404_v7 = vmul.f32 %v388_v59, %v1269_v41 }
  0x30   : > { %v1084_v3 = vpop.eup %1083  ;;  %v474_v4 = vmul.f32 %v458_v57, %v1222_v37  ;;  %v460_v5 = vadd.f32 1.0, %v1082_v61  ;;  %v434_v12 = vmul.f32 0.7978846, %v418_v0  ;;  %v419_v13 = vadd.f32 %v403_v1, %v1262_v38 }
  0x31   : > { %v1086_v8 = vpop.eup %1085  ;;  %v475_v9 = vmul.f32 %v459_v63, %v1226_v46  ;;  %v461_v10 = vadd.f32 1.0, %v1084_v3  ;;  %1091 = vtanh.f32 %v433_v6  ;;  %v420_v19 = vadd.f32 %v404_v7, %v1269_v41 }
  0x32   : > { %v1088_v36 = vpop.eup %1087  ;;  %v489_v14 = vpack.c.bf16 %v474_v4, %v473_v62  ;;  %v476_v15 = vmul.f32 %v460_v5, %v1228_v47  ;;  %v462_v16 = vadd.f32 1.0, %v1086_v8  ;;  %1093 = vtanh.f32 %v434_v12 }
  0x33   : > { %v1090_v17 = vpop.eup %1089  ;;  %v477_v18 = vmul.f32 %v461_v10, %v349_v27  ;;  %v463_v37 = vadd.f32 1.0, %v1088_v36  ;;  %v435_v22 = vmul.f32 0.7978846, %v419_v13  ;;  %v436_v26 = vmul.f32 0.7978846, %v420_v19 }
  0x34   : > { %1044 = vmatprep.mubr.msk.bf16.mxu0 %vm520_vm0, %v489_v14  ;;  %v490_v20 = vpack.c.bf16 %v476_v15, %v475_v9  ;;  %v478_v46 = vmul.f32 %v462_v16, %v350_v32  ;;  %v464_v21 = vadd.f32 1.0, %v1090_v17  ;;  %v374_v27 = vmul.f32 0.044715, %v1288_v60 }
  0x35   : > { %v479_v25 = vmul.f32 %v463_v37, %v351_v43  ;;  %1095 = vtanh.f32 %v435_v22  ;;  %v320_v40 = vmul.f32 %v1021_v52, %v1185_v2  ;;  %v389_v32 = vmul.f32 %v373_v31, %v1283_v35 }
  0x36   : > { %1045 = vmatmul.mubr.msk.bf16.vlgmr.msra.gmra.mrb[0].mxu0 %vm520_vm0, %v490_v20  ;;  %v491_v30 = vpack.c.bf16 %v478_v46, %v477_v18  ;;  %v480_v47 = vmul.f32 %v464_v21, %v352_v29  ;;  %1097 = vtanh.f32 %v436_v26  ;;  %v390_v28 = vmul.f32 %v374_v27, %v1288_v60 }
  0x37   : > { %v321_v42 = vmul.f32 %v1022_v33, %v1185_v2  ;;  %v343_v43 = vadd.f32 %v1194_v11, %v320_v40  ;;  %v405_v44 = vmul.f32 %v389_v32, %v1283_v35  ;;  %v353_v45 = vmul.f32 0.5, %v1250_v23 }
  0x38   : > { %1048 = vmatprep.mubr.msk.bf16.mxu0 %vm520_vm0, %v491_v30  ;;  %v492_v29 = vpack.c.bf16 %v480_v47, %v479_v25  ;;  %v406_v48 = vmul.f32 %v390_v28, %v1288_v60  ;;  %v354_v51 = vmul.f32 0.5, %v1253_v24  ;;  %v355_v58 = vmul.f32 0.5, %v1262_v38 }
  0x39   : > { %v344_v39 = vadd.f32 %v1194_v11, %v321_v42  ;;  %v375_v49 = vmul.f32 0.044715, %v343_v43  ;;  %v421_v52 = vadd.f32 %v405_v44, %v1283_v35  ;;  %v356_v24 = vmul.f32 0.5, %v1269_v41 }
  0x3a   : > { %v422_v2 = vadd.f32 %v406_v48, %v1288_v60  ;;  %v357_v41 = vmul.f32 0.5, %v1283_v35  ;;  %v358_v36 = vmul.f32 0.5, %v1288_v60  ;;  %v359_v37 = vmul.f32 0.5, %v343_v43 }
  0x3b   : > { %v1092_v50 = vpop.eup %1091  ;;  %v376_v55 = vmul.f32 0.044715, %v344_v39  ;;  %v437_v56 = vmul.f32 0.7978846, %v421_v52  ;;  %v391_v23 = vmul.f32 %v375_v49, %v343_v43  ;;  %v360_v46 = vmul.f32 0.5, %v344_v39 }
  0x3c   : > { %v1094_v53 = vpop.eup %1093  ;;  %v465_v54 = vadd.f32 1.0, %v1092_v50  ;;  %v438_v11 = vmul.f32 0.7978846, %v422_v2  ;;  %v676_v60 = vlaneseq  ;;  %v679_v31 = vstv %s1165_s25 }
  0x3d   : > { %v466_v34 = vadd.f32 1.0, %v1094_v53  ;;  %v392_v59 = vmul.f32 %v376_v55, %v344_v39  ;;  %1099 = vtanh.f32 %v437_v56  ;;  %v407_v63 = vmul.f32 %v391_v23, %v343_v43 }
  0x3e   : > { %1049 = vmatmul.mubr.msk.bf16.gmra.mrb[4].mxu0 %vm520_vm0, %v492_v29  ;;  %v481_v57 = vmul.f32 %v465_v54, %v353_v45  ;;  %1101 = vtanh.f32 %v438_v11  ;;  %v1326_v47 = vshrl.u32 %v676_v60, 7  ;;  %v1115_v40 = vmov 0.0   ;;  %v1338_v29 = vld [vmem:[%s1486_s2] ss:$0 sm:$0xff] }
  0x3f   : > { %v1096_v61 = vpop.eup %1095  ;;  %v482_v62 = vmul.f32 %v466_v34, %v354_v51  ;;  %v408_v3 = vmul.f32 %v392_v59, %v344_v39  ;;  %v423_v6 = vadd.f32 %v407_v63, %v343_v43 }
  0x40   : > { %v1098_v0 = vpop.eup %1097  ;;  %v467_v1 = vadd.f32 1.0, %v1096_v61  ;;  %v680_v27 = vadd.s32 %v679_v31, %v1326_v47  ;;  %v698_v33 = vsub.s32 2, %v1326_v47  ;;  %v690_v28 = vsub.s32 0, %v1326_v47 }
  0x41   : > { %v493_v4 = vpack.c.bf16 %v482_v62, %v481_v57  ;;  %v468_v5 = vadd.f32 1.0, %v1098_v0  ;;  %v424_v8 = vadd.f32 %v408_v3, %v344_v39  ;;  %v439_v9 = vmul.f32 0.7978846, %v423_v6 }
  0x42   : > { %v483_v7 = vmul.f32 %v467_v1, %v355_v58  ;;  %vm682_vm1 = vcmp.lt.s32.totalorder %v680_v27, 32  ;;  %v702_v42 = vsub.s32 3, %v1326_v47  ;;  %v694_v43 = vsub.s32 1, %v1326_v47 }
  0x43   : > { %1052 = vmatprep.mubr.msk.bf16.mxu1 %vm520_vm0, %v493_v4  ;;  %v484_v38 = vmul.f32 %v468_v5, %v356_v24  ;;  %v440_v10 = vmul.f32 0.7978846, %v424_v8  ;;  %1103 = vtanh.f32 %v439_v9  ;;  %v684_v32 = vsel %vm682_vm1, 1.0, %v1115_v40 }
  0x44   : > { %v699_v44 = vrot.slane %v684_v32, %v698_v33  ;;  %v678_v45 = vadd.s32 8, %v1326_v47  ;;  %v691_v39 = vrot.slane %v684_v32, %v690_v28  ;;  %v703_v51 = vrot.slane %v684_v32, %v702_v42 }
  0x45   : > { %v494_v12 = vpack.c.bf16 %v484_v38, %v483_v7  ;;  %1105 = vtanh.f32 %v440_v10  ;;  %v695_v52 = vrot.slane %v684_v32, %v694_v43  ;;  %v714_v53 = vsub.s32 6, %v1326_v47 }
  0x46   : > { %v706_v55 = vsub.s32 4, %v1326_v47  ;;  %v718_v34 = vsub.s32 7, %v1326_v47  ;;  %v710_v56 = vsub.s32 5, %v1326_v47  ;;  %v681_v59 = vadd.s32 %v679_v31, %v678_v45 }
  0x47   : > { %1053 = vmatmul.mubr.msk.bf16.vlgmr.msra.gmra.mrb[0].mxu1 %vm520_vm0, %v494_v12  ;;  %v1100_v13 = vpop.eup %1099  ;;  %v715_v6 = vrot.slane %v684_v32, %v714_v53 }
  0x48   : > { %v1102_v14 = vpop.eup %1101  ;;  %v469_v15 = vadd.f32 1.0, %v1100_v13  ;;  %v707_v7 = vrot.slane %v684_v32, %v706_v55  ;;  %v719_v8 = vrot.slane %v684_v32, %v718_v34  ;;  %v711_v38 = vrot.slane %v684_v32, %v710_v56 }
  0x49   : > { %v470_v16 = vadd.f32 1.0, %v1102_v14  ;;  %vm683_vm3 = vcmp.lt.s32.totalorder %v681_v59, 32 }
  0x4a   : > { %v485_v17 = vmul.f32 %v469_v15, %v357_v41  ;;  %v1395_v45 = vsel %vm683_vm3, 1.0, %v1115_v40 }
  0x4b   : > { %v486_v18 = vmul.f32 %v470_v16, %v358_v36 }
  0x4d   : > { %v1104_v19 = vpop.eup %1103  ;;  %v495_v20 = vpack.c.bf16 %v486_v18, %v485_v17 }
  0x4e   : > { %v471_v22 = vadd.f32 1.0, %v1104_v19 }
  0x4f   : > { %v1106_v21 = vpop.eup %1105  ;;  %1056 = vmatprep.mubr.msk.bf16.mxu1 %vm520_vm0, %v495_v20 }
  0x50   : > { %v472_v25 = vadd.f32 1.0, %v1106_v21  ;;  %v487_v26 = vmul.f32 %v471_v22, %v359_v37 }
  0x52   : > { %v488_v35 = vmul.f32 %v472_v25, %v360_v46 }
  0x54   : > { %v496_v30 = vpack.c.bf16 %v488_v35, %v487_v26 }
  0x56   : > { %1057 = vmatmul.mubr.msk.bf16.gmra.mrb[4].mxu1 %vm520_vm0, %v496_v30 }
 0x109   : > { %v1046_v48 = vpop.f32.mrb[0].mxu0 }
 0x10a   : > { %v588_v49 = vadd.f32 %v1046_v48, %v1338_v29  ;;  %v579_v50 = vpop.f32.mrb[1].mxu0 }
 0x10b   : > { %v580_v54 = vadd.f32 %v1338_v29, %v579_v50  ;;  %v1047_v2 = vpop.f32.mrb[2].mxu0 }
 0x10c   : > { %v644_v23 = vpack.c.bf16 %v588_v49, %v588_v49  ;;  %v770_v57 = vmul.f32 %v699_v44, %v588_v49  ;;  %v591_v58 = vadd.f32 %v1047_v2, %v1338_v29  ;;  %v582_v11 = vpop.f32.mrb[3].mxu0 }
 0x10d   : > { %v642_v61 = vpack.c.bf16 %v580_v54, %v580_v54  ;;  %v768_v62 = vmul.f32 %v691_v39, %v580_v54  ;;  %v583_v24 = vadd.f32 %v1338_v29, %v582_v11  ;;  %v731_v11 = vrot.slane %v1395_v45, %v698_v33 }
 0x10e   : > { %661 = vst.msk [vmem:[%s1356_s17 + $0x8] sm:$0xf] %vm658_vm2, %v644_v23  ;;  %v823_v63 = vmul.f32 %v770_v57, %v770_v57  ;;  %v645_v0 = vpack.c.bf16 %v591_v58, %v591_v58  ;;  %v771_v1 = vmul.f32 %v703_v51, %v591_v58  ;;  %v787_v9 = vsel %vm520_vm0, %v770_v57, 0.0 }
 0x10f   : > { %659 = vst.msk [vmem:[%s1356_s17] sm:$0xf] %vm658_vm2, %v642_v61  ;;  %v821_v3 = vmul.f32 %v768_v62, %v768_v62  ;;  %v643_v4 = vpack.c.bf16 %v583_v24, %v583_v24  ;;  %v769_v5 = vmul.f32 %v695_v52, %v583_v24  ;;  %v784_v10 = vsel %vm520_vm0, %v768_v62, 0.0 }
 0x110   : > { %662 = vst.msk [vmem:[%s1356_s17 + $0xc] sm:$0xf] %vm658_vm2, %v645_v0  ;;  %v840_v36 = vsel %vm520_vm0, %v823_v63, 0.0  ;;  %v789_v14 = vsel %vm520_vm0, %v771_v1, 0.0  ;;  %v824_v37 = vmul.f32 %v771_v1, %v771_v1  ;;  %v723_v24 = vrot.slane %v1395_v45, %v690_v28 }
 0x111   : > { %660 = vst.msk [vmem:[%s1356_s17 + $0x4] sm:$0xf] %vm658_vm2, %v643_v4  ;;  %v785_v12 = vsel %vm520_vm0, %v769_v5, 0.0  ;;  %v822_v41 = vmul.f32 %v769_v5, %v769_v5  ;;  %v1050_v13 = vpop.f32.mrb[4].mxu0  ;;  %v837_v18 = vsel %vm520_vm0, %v821_v3, 0.0  ;;  %v735_v63 = vrot.slane %v1395_v45, %v702_v42 }
 0x112   : > { %v786_v15 = vadd.f32 %v785_v12, %v784_v10  ;;  %v604_v16 = vadd.f32 %v1050_v13, %v1338_v29  ;;  %v595_v17 = vpop.f32.mrb[5].mxu0  ;;  %v842_v48 = vsel %vm520_vm0, %v824_v37, 0.0  ;;  %v727_v33 = vrot.slane %v1395_v45, %v694_v43 }
 0x113   : > { %v838_v19 = vsel %vm520_vm0, %v822_v41, 0.0  ;;  %v596_v20 = vadd.f32 %v1338_v29, %v595_v17  ;;  %v1051_v46 = vpop.f32.mrb[6].mxu0 }
 0x114   : > { %v788_v21 = vadd.f32 %v787_v9, %v786_v15  ;;  %v839_v22 = vadd.f32 %v838_v19, %v837_v18  ;;  %v648_v25 = vpack.c.bf16 %v604_v16, %v604_v16  ;;  %v774_v26 = vmul.f32 %v715_v6, %v604_v16  ;;  %v598_v35 = vpop.f32.mrb[7].mxu0 }
 0x115   : > { %v646_v30 = vpack.c.bf16 %v596_v20, %v596_v20  ;;  %v772_v60 = vmul.f32 %v707_v7, %v596_v20  ;;  %v607_v31 = vadd.f32 %v1051_v46, %v1338_v29  ;;  %v599_v27 = vadd.f32 %v1338_v29, %v598_v35 }
 0x116   : > { %v841_v32 = vadd.f32 %v840_v36, %v839_v22  ;;  %665 = vst.msk [vmem:[%s1356_s17 + $0x18] sm:$0xf] %vm658_vm2, %v648_v25  ;;  %v790_v44 = vadd.f32 %v789_v14, %v788_v21  ;;  %v827_v23 = vmul.f32 %v774_v26, %v774_v26  ;;  %v795_v5 = vsel %vm520_vm0, %v774_v26, 0.0 }
 0x117   : > { %663 = vst.msk [vmem:[%s1356_s17 + $0x10] sm:$0xf] %vm658_vm2, %v646_v30  ;;  %v791_v39 = vsel %vm520_vm0, %v772_v60, 0.0  ;;  %v825_v49 = vmul.f32 %v772_v60, %v772_v60  ;;  %v649_v50 = vpack.c.bf16 %v607_v31, %v607_v31  ;;  %v775_v54 = vmul.f32 %v719_v8, %v607_v31 }
 0x118   : > { %v792_v51 = vadd.f32 %v791_v39, %v790_v44  ;;  %v843_v52 = vadd.f32 %v842_v48, %v841_v32  ;;  %v647_v2 = vpack.c.bf16 %v599_v27, %v599_v27  ;;  %v773_v58 = vmul.f32 %v711_v38, %v599_v27 }
 0x119   : > { %v844_v57 = vsel %vm520_vm0, %v825_v49, 0.0  ;;  %666 = vst.msk [vmem:[%s1356_s17 + $0x1c] sm:$0xf] %vm658_vm2, %v649_v50  ;;  %v828_v0 = vmul.f32 %v775_v54, %v775_v54  ;;  %v848_v6 = vsel %vm520_vm0, %v827_v23, 0.0  ;;  %v797_v8 = vsel %vm520_vm0, %v775_v54, 0.0 }
 0x11a   : > { %v845_v40 = vadd.f32 %v844_v57, %v843_v52  ;;  %664 = vst.msk [vmem:[%s1356_s17 + $0x14] sm:$0xf] %vm658_vm2, %v647_v2  ;;  %v793_v59 = vsel %vm520_vm0, %v773_v58, 0.0  ;;  %v826_v61 = vmul.f32 %v773_v58, %v773_v58  ;;  %v1054_v62 = vpop.f32.mrb[0].mxu1  ;;  %v747_v57 = vrot.slane %v1395_v45, %v714_v53 }
 0x11b   : > { %v794_v1 = vadd.f32 %v793_v59, %v792_v51  ;;  %v620_v3 = vadd.f32 %v1054_v62, %v1338_v29  ;;  %v611_v4 = vpop.f32.mrb[1].mxu1  ;;  %v850_v14 = vsel %vm520_vm0, %v828_v0, 0.0  ;;  %v739_v58 = vrot.slane %v1395_v45, %v706_v55 }
 0x11c   : > { %v846_v28 = vsel %vm520_vm0, %v826_v61, 0.0  ;;  %v612_v7 = vadd.f32 %v1338_v29, %v611_v4  ;;  %v1055_v42 = vpop.f32.mrb[2].mxu1  ;;  %v751_v61 = vrot.slane %v1395_v45, %v718_v34  ;;  %v743_v53 = vrot.slane %v1395_v45, %v710_v56 }
 0x11d   : > { %v796_v38 = vadd.f32 %v795_v5, %v794_v1  ;;  %v847_v9 = vadd.f32 %v846_v28, %v845_v40  ;;  %v652_v10 = vpack.c.bf16 %v620_v3, %v620_v3  ;;  %v614_v12 = vpop.f32.mrb[3].mxu1  ;;  %v623_v43 = vadd.f32 %v1055_v42, %v1338_v29 }
 0x11e   : > { %v650_v41 = vpack.c.bf16 %v612_v7, %v612_v7  ;;  %v776_v13 = vmul.f32 %v723_v24, %v612_v7  ;;  %v615_v36 = vadd.f32 %v1338_v29, %v614_v12  ;;  %v778_v17 = vmul.f32 %v731_v11, %v620_v3 }
 0x11f   : > { %v849_v15 = vadd.f32 %v848_v6, %v847_v9  ;;  %669 = vst.msk [vmem:[%s1356_s17 + $0x28] sm:$0xf] %vm658_vm2, %v652_v10  ;;  %v798_v16 = vadd.f32 %v797_v8, %v796_v38  ;;  %v653_v19 = vpack.c.bf16 %v623_v43, %v623_v43  ;;  %v779_v25 = vmul.f32 %v735_v63, %v623_v43 }
 0x120   : > { %667 = vst.msk [vmem:[%s1356_s17 + $0x20] sm:$0xf] %vm658_vm2, %v650_v41  ;;  %v799_v18 = vsel %vm520_vm0, %v776_v13, 0.0  ;;  %v829_v37 = vmul.f32 %v776_v13, %v776_v13  ;;  %v651_v21 = vpack.c.bf16 %v615_v36, %v615_v36  ;;  %v777_v26 = vmul.f32 %v727_v33, %v615_v36 }
 0x121   : > { %v800_v20 = vadd.f32 %v799_v18, %v798_v16  ;;  %v851_v46 = vadd.f32 %v850_v14, %v849_v15  ;;  %670 = vst.msk [vmem:[%s1356_s17 + $0x2c] sm:$0xf] %vm658_vm2, %v653_v19  ;;  %v831_v30 = vmul.f32 %v778_v17, %v778_v17  ;;  %v803_v32 = vsel %vm520_vm0, %v778_v17, 0.0 }
 0x122   : > { %v852_v22 = vsel %vm520_vm0, %v829_v37, 0.0  ;;  %668 = vst.msk [vmem:[%s1356_s17 + $0x24] sm:$0xf] %vm658_vm2, %v651_v21  ;;  %v801_v60 = vsel %vm520_vm0, %v777_v26, 0.0  ;;  %v830_v31 = vmul.f32 %v777_v26, %v777_v26  ;;  %v832_v44 = vmul.f32 %v779_v25, %v779_v25 }
 0x123   : > { %v853_v35 = vadd.f32 %v852_v22, %v851_v46  ;;  %v802_v27 = vadd.f32 %v801_v60, %v800_v20  ;;  %v856_v50 = vsel %vm520_vm0, %v831_v30, 0.0  ;;  %v805_v51 = vsel %vm520_vm0, %v779_v25, 0.0 }
 0x124   : > { %v854_v48 = vsel %vm520_vm0, %v830_v31, 0.0  ;;  %v858_v2 = vsel %vm520_vm0, %v832_v44, 0.0 }
 0x125   : > { %v804_v39 = vadd.f32 %v803_v32, %v802_v27  ;;  %v855_v49 = vadd.f32 %v854_v48, %v853_v35 }
 0x127   : > { %v857_v52 = vadd.f32 %v856_v50, %v855_v49  ;;  %v806_v54 = vadd.f32 %v805_v51, %v804_v39 }
 0x129   : > { %v1058_v23 = vpop.f32.mrb[4].mxu1  ;;  %v859_v59 = vadd.f32 %v858_v2, %v857_v52 }
 0x12a   : > { %v636_v40 = vadd.f32 %v1058_v23, %v1338_v29  ;;  %v627_v11 = vpop.f32.mrb[5].mxu1 }
 0x12b   : > { %v628_v62 = vadd.f32 %v1338_v29, %v627_v11  ;;  %v1059_v24 = vpop.f32.mrb[6].mxu1 }
 0x12c   : > { %v656_v63 = vpack.c.bf16 %v636_v40, %v636_v40  ;;  %v639_v55 = vadd.f32 %v1059_v24, %v1338_v29  ;;  %v630_v0 = vpop.f32.mrb[7].mxu1  ;;  %v782_v1 = vmul.f32 %v747_v57, %v636_v40 }
 0x12d   : > { %v654_v3 = vpack.c.bf16 %v628_v62, %v628_v62  ;;  %v780_v4 = vmul.f32 %v739_v58, %v628_v62  ;;  %v631_v33 = vadd.f32 %v1338_v29, %v630_v0 }
 0x12e   : > { %673 = vst.msk [vmem:[%s1356_s17 + $0x38] sm:$0xf] %vm658_vm2, %v656_v63  ;;  %v657_v34 = vpack.c.bf16 %v639_v55, %v639_v55  ;;  %v783_v5 = vmul.f32 %v751_v61, %v639_v55  ;;  %v835_v7 = vmul.f32 %v782_v1, %v782_v1  ;;  %v811_v10 = vsel %vm520_vm0, %v782_v1, 0.0 }
 0x12f   : > { %671 = vst.msk [vmem:[%s1356_s17 + $0x30] sm:$0xf] %vm658_vm2, %v654_v3  ;;  %v807_v47 = vsel %vm520_vm0, %v780_v4, 0.0  ;;  %v833_v56 = vmul.f32 %v780_v4, %v780_v4  ;;  %v655_v45 = vpack.c.bf16 %v631_v33, %v631_v33  ;;  %v781_v6 = vmul.f32 %v743_v53, %v631_v33 }
 0x130   : > { %v808_v28 = vadd.f32 %v807_v47, %v806_v54  ;;  %674 = vst.msk [vmem:[%s1356_s17 + $0x3c] sm:$0xf] %vm658_vm2, %v657_v34  ;;  %v836_v12 = vmul.f32 %v783_v5, %v783_v5  ;;  %v864_v36 = vsel %vm520_vm0, %v835_v7, 0.0  ;;  %v813_v14 = vsel %vm520_vm0, %v783_v5, 0.0 }
 0x131   : > { %v860_v42 = vsel %vm520_vm0, %v833_v56, 0.0  ;;  %672 = vst.msk [vmem:[%s1356_s17 + $0x34] sm:$0xf] %vm658_vm2, %v655_v45  ;;  %v809_v29 = vsel %vm520_vm0, %v781_v6, 0.0  ;;  %v834_v8 = vmul.f32 %v781_v6, %v781_v6 }
 0x132   : > { %v861_v38 = vadd.f32 %v860_v42, %v859_v59  ;;  %v810_v9 = vadd.f32 %v809_v29, %v808_v28  ;;  %v866_v17 = vsel %vm520_vm0, %v836_v12, 0.0 }
 0x133   : > { %v862_v41 = vsel %vm520_vm0, %v834_v8, 0.0 }
 0x134   : > { %v812_v13 = vadd.f32 %v811_v10, %v810_v9  ;;  %v863_v43 = vadd.f32 %v862_v41, %v861_v38 }
 0x136   : > { %v814_v15 = vadd.f32 %v813_v14, %v812_v13  ;;  %v865_v16 = vadd.f32 %v864_v36, %v863_v43 }
 0x138   : > { %v815_v18 = vrot.slane %v814_v15, 4  ;;  %v867_v37 = vadd.f32 %v866_v17, %v865_v16 }
 0x13a   : > { %v816_v19 = vadd.f32 %v815_v18, %v814_v15  ;;  %v868_v20 = vrot.slane %v867_v37, 4 }
 0x13c   : > { %v817_v46 = vrot.slane %v816_v19, 2  ;;  %v869_v21 = vadd.f32 %v868_v20, %v867_v37 }
 0x13e   : > { %v818_v22 = vadd.f32 %v817_v46, %v816_v19  ;;  %v870_v25 = vrot.slane %v869_v21, 2 }
 0x140   : > { %v819_v26 = vrot.slane %v818_v22, 1  ;;  %v871_v35 = vadd.f32 %v870_v25, %v869_v21 }
 0x142   : > { %v872_v30 = vrot.slane %v871_v35, 1  ;;  %v820_v60 = vadd.f32 %v819_v26, %v818_v22 }
 0x144   : > { %v873_v31 = vadd.f32 %v872_v30, %v871_v35 }
 0x146   : > { %v875_v27 = vsel %vm874_vm4, %v820_v60, %v873_v31 }
 0x147   : > { %877 = vst.msk [vmem:[%s265_s23] sm:$0x3] %vm876_vm5, %v875_v27 }
 0x148 PF: > { %s17_s21 = sadd.s32 1, %s1113_s21  }
 0x149   : > { %p14_p5 = scmp.ge.s32.totalorder %s17_s21, 4  }
 0x14b   :  { %16 = sbr.rel (!%p14_p5) target bundleno = 1 (0x1), region = 82 }

// kernel: point_transformer_layer.3
= control target key start
LH: loop header
LB: loop body
LE: loop exit
PB: predicated region body
PF: predicated region fallthrough
CT: control target
= control target key end

     0   :  { %s1898_s13 = smov 0   ;;  %s2612_s0 = inlined_call_operand.vmem [shape: bf16[32,32], index: 0, kind: input, shape index: {}]   ;;  %s2613_s1 = inlined_call_operand.vmem [shape: bf16[32,8,32], index: 1, kind: input, shape index: {}]   ;;  %s2614_s2 = inlined_call_operand.vmem [shape: f32[32,8,4], index: 2, kind: input, shape index: {}]   ;;  %s2615_s3 = inlined_call_operand.vmem [shape: bf16[32,32], index: 3, kind: input, shape index: {}]   ;;  %s2616_s4 = inlined_call_operand.vmem [shape: f32[1,32], index: 4, kind: input, shape index: {}]   ;;  %s2617_s5 = inlined_call_operand.vmem [shape: bf16[32,32], index: 5, kind: input, shape index: {}]   ;;  %s2618_s6 = inlined_call_operand.vmem [shape: f32[1,32], index: 6, kind: input, shape index: {}]   ;;  %s2619_s7 = inlined_call_operand.vmem [shape: f32[4,32], index: 7, kind: input, shape index: {}]   ;;  %s2620_s8 = inlined_call_operand.vmem [shape: f32[1,32], index: 8, kind: input, shape index: {}]   ;;  %s2621_s9 = inlined_call_operand.vmem [shape: bf16[32,8,32], index: 9, kind: output, shape index: {0}]   ;;  %s2622_s10 = inlined_call_operand.vmem [shape: f32[2,2,32], index: 10, kind: output, shape index: {1}]  }
   0x1 LB: > { %s1904_s14 = sadd.s32 4294967295, %s1834_s13   ;;  %p1697_p0 = scmp.ge.s32.totalorder %s1834_s13, 1  ;;  %s1834_s13 = sphi %s1898_s13, %s21_s13  }
   0x2   : > { %p338_p1 = scmp.lt.s32.totalorder %s1834_s13, 3 }
   0x4   : > { %p339_p2 = pnand %p1697_p0, %p338_p1 }
   0x6   : > { %342 = sbr.rel (%p339_p2) target bundleno = 334 (0x14e), region = 56 }
   0xd   : > { %s1700_s15 = sshll.u32 %s1904_s14, 4  ;;  %v792_v0 = vlaneseq  ;;  %v1836_v1 = vmov 0.0   ;;  %v1815_v3 = vld [vmem:[%s2615_s3] sm:$0xff]   ;;  %v1817_v6 = vld [vmem:[%s2615_s3 + $0x8] sm:$0xff]   ;;  %v1837_v7 = vmov 0   ;;  %s1698_s24 = sshll.u32 %s1904_s14, 1 }
   0xe   : > { %p397_p3 = scmp.lt.s32.totalorder %s1700_s15, 31  ;;  %1748 = vmatprep.subr.bf16.mxu0 %v1836_v1  ;;  %v1383_v2 = vstv %s1700_s15  ;;  %v1816_v5 = vld [vmem:[%s2617_s5] sm:$0xff]   ;;  %1796 = vset.pattern.permute.xlu1 %v1837_v7  ;;  %v1818_v8 = vld [vmem:[%s2617_s5 + $0x8] sm:$0xff]   ;;  %vm1838_vm1 = vmmov 0   ;;  %vm449_vm2 = vcmask 261120   ;;  %p391_p4 = scmp.lt.s32.totalorder %s1698_s24, 3 }
   0xf   : > { %v1912_v4 = vshrl.u32 %v792_v0, 7  ;;  %1749 = vmatpush3.bf16.msra.mxu0 %v1815_v3  ;;  %1776 = vmatprep.subr.bf16.mxu1 %v1816_v5  ;;  %v1839_v39 = vmov 1   ;;  %v1840_v40 = vmov 2   ;;  %v1841_v41 = vmov 3   ;;  %v710_v61 = vld [vmem:[%s2619_s7] sm:$0xf] }
  0x10   : > { %s2647_s15 = smov (!%p397_p3, %s1700_s15), 31  ;;  %1750 = vmatprep.subr.bf16.mxu0 %v1836_v1  ;;  %1778 = vmatpush3.bf16.msra.mxu1 %v1816_v5  ;;  %s2649_s24 = smov (!%p391_p4, %s1698_s24), 3  ;;  %vm1362_vm4 = vcmask 257024   ;;  %vm1578_vm5 = vcmask 1040384   ;;  %vm1580_vm6 = vcmask 254976  }
  0x11   : > { %v1382_v9 = vadd.s32 8, %v1912_v4  ;;  %v1384_v10 = vadd.s32 %v1383_v2, %v1912_v4  ;;  %s1701_s25 = sshll.u32 %s2647_s15, 2  ;;  %s1703_s26 = sshll.u32 %s2647_s15, 3  ;;  %1795 = vset.pattern.permute.xlu0 %v1837_v7  ;;  %1777 = vmatprep.subr.bf16.mxu1 %v1818_v8  ;;  %v2089_v60 = vsub.s32 0, %v1912_v4 }
  0x12   : > { %s1935_s29 = scalar_lea.vmem %s2613_s1, %s1701_s25  ;;  %s1940_s12 = scalar_lea.vmem %s2614_s2, %s1703_s26  ;;  %1752 = vmatprep.mubr.msk.bf16.mxu0 %vm1838_vm1, %v1836_v1 }
  0x13   : > { %v1385_v11 = vadd.s32 %v1383_v2, %v1382_v9  ;;  %vm1386_vm0 = vcmp.lt.s32.totalorder %v1384_v10, 32  ;;  %1751 = vmatpush3.bf16.msra.mxu0 %v1817_v6  ;;  %v1945_v13 = vld [vmem:[%s1940_s12 + $0x10] sm:$0xff]  ;;  %v1948_v14 = vld [vmem:[%s1940_s12] sm:$0xff]  ;;  %v1821_v17 = vld [vmem:[%s1935_s29 + $0x18] sm:$0xff]   ;;  %s1699_s16 = sshll.u32 %s2649_s24, 2  ;;  %v2099_v0 = vrot.slane %v710_v61, %v2089_v60  ;;  %v2103_v2 = vsub.s32 1, %v1912_v4  ;;  %s2355_s11 = scalar_lea.vmem %s2621_s9, %s1701_s25 }
  0x14   : > { %v1942_v12 = vsel %vm1386_vm0, 1.0, %v1836_v1  ;;  %724 = vperm.xlu1 %1796, %v1945_v13   ;;  %714 = vperm.xlu0 %1795, %v1948_v14   ;;  %v1820_v15 = vld [vmem:[%s1935_s29 + $0x10] sm:$0xff]   ;;  %v1957_v18 = vld [vmem:[%s1940_s12 + $0x18] sm:$0xff]  ;;  %v1961_v19 = vld [vmem:[%s1940_s12 + $0x8] sm:$0xff]  ;;  %s394_s19 = scalar_lea.vmem %s2612_s0, %s1699_s16  ;;  %p414_p5 = scmp.lt.s32.totalorder %s1904_s14, 1 }
  0x15   : > { %vm1387_vm3 = vcmp.lt.s32.totalorder %v1385_v11, 32  ;;  %1779 = vmatpush3.bf16.msra.mxu1 %v1818_v8  ;;  %1756 = vmatprep.subr.bf16.mxu0 %v1816_v5  ;;  %v1964_v20 = vld [vmem:[%s1940_s12 + $0x28] sm:$0xff]  ;;  %v1972_v21 = vld [vmem:[%s1940_s12 + $0x20] sm:$0xff]  ;;  %v1981_v26 = vld [vmem:[%s1940_s12 + $0x38] sm:$0xff]  ;;  %v2117_v9 = vrot.slane %v710_v61, %v2103_v2 }
  0x16   : > { %v1953_v16 = vsel %vm1387_vm3, 1.0, %v1836_v1  ;;  %1764 = vmatprep.mubr.msk.bf16.mxu1 %vm449_vm2, %v1820_v15  ;;  %v1822_v22 = vld [vmem:[%s1935_s29] sm:$0xff]   ;;  %v1825_v25 = vld [vmem:[%s1935_s29 + $0x28] sm:$0xff]   ;;  %v1985_v27 = vld [vmem:[%s1940_s12 + $0x30] sm:$0xff]  ;;  %s2651_s14 = smov (!%p414_p5, %s1904_s14), 1 }
  0x17   : > { %v1819_v23 = vld [vmem:[%s394_s19] sm:$0xff]   ;;  %v1826_v28 = vld [vmem:[%s1935_s29 + $0x30] sm:$0xff]   ;;  %v1823_v29 = vld [vmem:[%s1935_s29 + $0x8] sm:$0xff]   ;;  %s1706_s15 = sshll.u32 %s2651_s14, 1 }
  0x18   : > { %1765 = vmatmul.mubr.msk.bf16.vlgmr.msra.gmra.mrb[0].mxu1 %vm449_vm2, %v1821_v17  ;;  %729 = vperm.xlu1 %1796, %v1957_v18   ;;  %v1824_v24 = vld [vmem:[%s1935_s29 + $0x20] sm:$0xff]   ;;  %v1995_v30 = vld [vmem:[%s1940_s12 + $0x48] sm:$0xff]  ;;  %v1827_v32 = vld [vmem:[%s1935_s29 + $0x38] sm:$0xff]   ;;  %s417_s16 = scalar_lea.vmem %s2622_s10, %s1706_s15 }
  0x19   : > { %719 = vperm.xlu0 %1795, %v1961_v19   ;;  %1753 = vmatmul.mubr.msk.bf16.vlgmr.msra.gmra.mrb[0].mxu0 %vm449_vm2, %v1819_v23  ;;  %v1998_v31 = vld [vmem:[%s1940_s12 + $0x40] sm:$0xff]  ;;  %v2006_v33 = vld [vmem:[%s1940_s12 + $0x58] sm:$0xff]  ;;  %v704_v34 = vld [vmem:[%s1940_s12 + $0x50] sm:$0xff] }
  0x1a   : > { %1757 = vmatpush3.bf16.msra.mxu0 %v1816_v5  ;;  %1760 = vmatprep.mubr.msk.bf16.mxu0 %vm449_vm2, %v1822_v22  ;;  %v707_v35 = vld [vmem:[%s1940_s12 + $0x68] sm:$0xff]  ;;  %v2013_v36 = vld [vmem:[%s1940_s12 + $0x60] sm:$0xff]  ;;  %v2017_v37 = vld [vmem:[%s1940_s12 + $0x78] sm:$0xff] }
  0x1b   : > { %1758 = vmatprep.subr.bf16.mxu0 %v1818_v8  ;;  %1768 = vmatprep.mubr.msk.bf16.mxu1 %vm449_vm2, %v1824_v24  ;;  %v2020_v38 = vld [vmem:[%s1940_s12 + $0x70] sm:$0xff]  ;;  %v2112_v6 = vld [vmem:[%s2620_s8] ss:$0 sm:$0xff] }
  0x1c   : > { %739 = vperm.xlu1 %1796, %v1964_v20  }
  0x1d   : > { %734 = vperm.xlu0 %1795, %v1972_v21  }
  0x1e   : > { %1759 = vmatpush3.bf16.msra.mxu0 %v1818_v8 }
  0x20   : > { %1769 = vmatmul.mubr.msk.bf16.gmra.mrb[4].mxu1 %vm449_vm2, %v1825_v25  ;;  %749 = vperm.xlu1 %1796, %v1981_v26  }
  0x21   : > { %744 = vperm.xlu0 %1795, %v1985_v27   ;;  %1772 = vmatprep.mubr.msk.bf16.mxu1 %vm449_vm2, %v1826_v28 }
  0x22   : > { %1761 = vmatmul.mubr.msk.bf16.vlgmr.msra.gmra.mrb[4].mxu0 %vm449_vm2, %v1823_v29 }
  0x24   : > { %759 = vperm.xlu1 %1796, %v1995_v30  }
  0x25   : > { %754 = vperm.xlu0 %1795, %v1998_v31  }
  0x28   : > { %1773 = vmatmul.mubr.msk.bf16.gmra.mrb[8].mxu1 %vm449_vm2, %v1827_v32  ;;  %769 = vperm.xlu1 %1796, %v2006_v33  }
  0x29   : > { %764 = vperm.xlu0 %1795, %v704_v34  }
  0x2c   : > { %779 = vperm.xlu1 %1796, %v707_v35  }
  0x2d   : > { %774 = vperm.xlu0 %1795, %v2013_v36  }
  0x30   : > { %789 = vperm.xlu1 %1796, %v2017_v37  }
  0x31   : > { %784 = vperm.xlu0 %1795, %v2020_v38  }
  0x34   : > { %1798 = vset.pattern.permute.xlu1 %v1839_v39 }
  0x35   : > { %1797 = vset.pattern.permute.xlu0 %v1839_v39  ;;  %839 = vperm.xlu1 %1798, %v1961_v19  }
  0x36   : > { %835 = vperm.xlu0 %1797, %v1948_v14  }
  0x39   : > { %843 = vperm.xlu1 %1798, %v1945_v13  }
  0x3a   : > { %847 = vperm.xlu0 %1797, %v1957_v18  }
  0x3d   : > { %851 = vperm.xlu1 %1798, %v1972_v21  }
  0x3e   : > { %855 = vperm.xlu0 %1797, %v1964_v20  }
  0x41   : > { %859 = vperm.xlu1 %1798, %v1985_v27  }
  0x42   : > { %863 = vperm.xlu0 %1797, %v1981_v26  }
  0x45   : > { %867 = vperm.xlu1 %1798, %v1998_v31  }
  0x46   : > { %871 = vperm.xlu0 %1797, %v1995_v30  }
  0x49   : > { %875 = vperm.xlu1 %1798, %v704_v34  }
  0x4a   : > { %879 = vperm.xlu0 %1797, %v2006_v33  }
  0x4d   : > { %883 = vperm.xlu1 %1798, %v2013_v36  }
  0x4e   : > { %887 = vperm.xlu0 %1797, %v707_v35  }
  0x51   : > { %891 = vperm.xlu1 %1798, %v2020_v38  }
  0x52   : > { %895 = vperm.xlu0 %1797, %v2017_v37  }
  0x55   : > { %1799 = vset.pattern.permute.xlu1 %v1840_v40 }
  0x56   : > { %1800 = vset.pattern.permute.xlu0 %v1840_v40  ;;  %935 = vperm.xlu1 %1799, %v1948_v14  }
  0x57   : > { %939 = vperm.xlu0 %1800, %v1961_v19  }
  0x5a   : > { %943 = vperm.xlu1 %1799, %v1945_v13  }
  0x5b   : > { %1802 = vset.pattern.permute.xlu0 %v1841_v41 }
  0x5c   : > { %1039 = vperm.xlu0 %1802, %v1961_v19  }
  0x5e   : > { %1801 = vset.pattern.permute.xlu1 %v1841_v41 }
  0x5f   : > { %1035 = vperm.xlu1 %1801, %v1948_v14  }
  0x60   : > { %1051 = vperm.xlu0 %1802, %v1972_v21  }
  0x63   : > { %1803 = vset.pattern.permute.xlu1 %v1840_v40 }
  0x64   : > { %1063 = vperm.xlu0 %1802, %v1981_v26   ;;  %947 = vperm.xlu1 %1803, %v1957_v18  }
  0x68   : > { %1075 = vperm.xlu0 %1802, %v704_v34   ;;  %1804 = vset.pattern.permute.xlu1 %v1841_v41 }
  0x69   : > { %1043 = vperm.xlu1 %1804, %v1945_v13  }
  0x6c   : > { %1810 = vset.pattern.permute.xlu0 %v1840_v40 }
  0x6d   : > { %951 = vperm.xlu0 %1810, %v1972_v21   ;;  %1047 = vperm.xlu1 %1804, %v1957_v18  }
  0x71   : > { %963 = vperm.xlu0 %1810, %v1981_v26   ;;  %1805 = vset.pattern.permute.xlu1 %v1840_v40 }
  0x72   : > { %955 = vperm.xlu1 %1805, %v1964_v20  }
  0x75   : > { %975 = vperm.xlu0 %1810, %v704_v34  }
  0x76   : > { %959 = vperm.xlu1 %1805, %v1985_v27  }
  0x79   : > { %987 = vperm.xlu0 %1810, %v707_v35  }
  0x7a   : > { %1806 = vset.pattern.permute.xlu1 %v1841_v41 }
  0x7b   : > { %1055 = vperm.xlu1 %1806, %v1964_v20  }
  0x7d   : > { %1813 = vset.pattern.permute.xlu0 %v1841_v41 }
  0x7e   : > { %1087 = vperm.xlu0 %1813, %v707_v35  }
  0x7f   : > { %1059 = vperm.xlu1 %1806, %v1985_v27  }
  0x82   : > { %1095 = vperm.xlu0 %1813, %v2017_v37  }
  0x83   : > { %1807 = vset.pattern.permute.xlu1 %v1840_v40 }
  0x84   : > { %967 = vperm.xlu1 %1807, %v1998_v31  }
  0x88   : > { %971 = vperm.xlu1 %1807, %v1995_v30  }
  0x8c   : > { %1808 = vset.pattern.permute.xlu1 %v1841_v41 }
  0x8d   : > { %1067 = vperm.xlu1 %1808, %v1998_v31  }
  0x91   : > { %1071 = vperm.xlu1 %1808, %v1995_v30  }
  0x93   : > { %v2059_v42 = vpop.permute.xlu1 %724  ;;  %v2061_v43 = vpop.permute.xlu0 %714 }
  0x95   : > { %1809 = vset.pattern.permute.xlu1 %v1840_v40 }
  0x96   : > { %979 = vperm.xlu1 %1809, %v2006_v33  }
  0x97   : > { %v2064_v44 = vpop.permute.xlu1 %729 }
  0x98   : > { %v2066_v45 = vpop.permute.xlu0 %719 }
  0x9a   : > { %983 = vperm.xlu1 %1809, %v2013_v36  }
  0x9b   : > { %v2069_v46 = vpop.permute.xlu1 %739 }
  0x9c   : > { %v2071_v47 = vpop.permute.xlu0 %734 }
  0x9e   : > { %1811 = vset.pattern.permute.xlu1 %v1841_v41 }
  0x9f   : > { %v2073_v48 = vpop.permute.xlu1 %749  ;;  %1079 = vperm.xlu1 %1811, %v2006_v33  }
  0xa0   : > { %v745_v49 = vpop.permute.xlu0 %744 }
  0xa1   : > { %v802_v1 = vmul.f32 %v2099_v0, %v745_v49 }
  0xa3   : > { %v760_v50 = vpop.permute.xlu1 %759  ;;  %1083 = vperm.xlu1 %1811, %v2013_v36   ;;  %v824_v7 = vadd.f32 %v2112_v6, %v802_v1  ;;  %v1842_v1 = vmov 1966171168  }
  0xa4   : > { %v755_v51 = vpop.permute.xlu0 %754  ;;  %v805_v13 = vmul.f32 %v2099_v0, %v760_v50 }
  0xa5   : > { %v804_v8 = vmul.f32 %v2099_v0, %v755_v51 }
  0xa6   : > { %v827_v20 = vadd.f32 %v2112_v6, %v805_v13  ;;  %v2158_v13 = vsub.s32 2, %v1912_v4 }
  0xa7   : > { %v770_v52 = vpop.permute.xlu1 %769  ;;  %1812 = vset.pattern.permute.xlu1 %v1840_v40  ;;  %v826_v15 = vadd.f32 %v2112_v6, %v804_v8 }
  0xa8   : > { %v2077_v53 = vpop.permute.xlu0 %764  ;;  %991 = vperm.xlu1 %1812, %v2020_v38   ;;  %v807_v21 = vmul.f32 %v2099_v0, %v770_v52 }
  0xaa   : > { %v829_v28 = vadd.f32 %v2112_v6, %v807_v21  ;;  %v2623_v21 = vsub.s32 7, %v1912_v4 }
  0xab   : > { %v2080_v54 = vpop.permute.xlu1 %779 }
  0xac   : > { %v775_v55 = vpop.permute.xlu0 %774  ;;  %995 = vperm.xlu1 %1812, %v2017_v37  }
  0xad   : > { %v808_v29 = vmul.f32 %v2099_v0, %v775_v55 }
  0xaf   : > { %v790_v56 = vpop.permute.xlu1 %789  ;;  %v830_v34 = vadd.f32 %v2112_v6, %v808_v29  ;;  %v798_v29 = vmul.f32 %v2099_v0, %v2059_v42 }
  0xb0   : > { %v785_v57 = vpop.permute.xlu0 %784  ;;  %1814 = vset.pattern.permute.xlu1 %v1841_v41  ;;  %v811_v35 = vmul.f32 %v2099_v0, %v790_v56 }
  0xb1   : > { %1091 = vperm.xlu1 %1814, %v2020_v38   ;;  %v810_v36 = vmul.f32 %v2099_v0, %v785_v57 }
  0xb2   : > { %v833_v41 = vadd.f32 %v2112_v6, %v811_v35  ;;  %v797_v35 = vmul.f32 %v2099_v0, %v2066_v45 }
  0xb3   : > { %v832_v49 = vadd.f32 %v2112_v6, %v810_v36  ;;  %v801_v36 = vmul.f32 %v2099_v0, %v2069_v46 }
  0xb4   : > { %v2084_v58 = vpop.permute.xlu1 %839 }
  0xb5   : > { %v2086_v59 = vpop.permute.xlu0 %835 }
  0xb8   : > { %v2094_v62 = vpop.permute.xlu1 %843 }
  0xb9   : > { %v2096_v63 = vpop.permute.xlu0 %847 }
  0xbc   : > { %v2105_v3 = vpop.permute.xlu1 %851 }
  0xbd   : > { %v2107_v5 = vpop.permute.xlu0 %855 }
  0xc0   : > { %v860_v10 = vpop.permute.xlu1 %859 }
  0xc1   : > { %v2119_v11 = vpop.permute.xlu0 %863  ;;  %v908_v14 = vmul.f32 %v2117_v9, %v860_v10 }
  0xc3   : > { %v2124_v17 = vadd.f32 %v908_v14, %v824_v7  ;;  %v1138_v7 = vunpack.c.l.s4 %v1842_v1  ;;  %v2161_v14 = vsub.s32 3, %v1912_v4  ;;  %v809_v1 = vmul.f32 %v2099_v0, %v2080_v54 }
  0xc4   : > { %v868_v18 = vpop.permute.xlu1 %867  ;;  %v904_v54 = vmul.f32 %v2117_v9, %v2094_v62 }
  0xc5   : > { %v872_v19 = vpop.permute.xlu0 %871  ;;  %v910_v22 = vmul.f32 %v2117_v9, %v868_v18  ;;  %v2624_v18 = vsub.s32 4, %v1912_v4 }
  0xc6   : > { %v911_v23 = vmul.f32 %v2117_v9, %v872_v19 }
  0xc7   : > { %v2130_v24 = vadd.f32 %v910_v22, %v826_v15  ;;  %v1139_v15 = vunpack.c.0.s8 %v1138_v7  ;;  %v2168_v22 = vrot.slane %v710_v61, %v2158_v13 }
  0xc8   : > { %v2132_v25 = vadd.f32 %v911_v23, %v827_v20  ;;  %v2134_v26 = vpop.permute.xlu1 %875  ;;  %v2171_v23 = vrot.slane %v710_v61, %v2161_v14  ;;  %v799_v61 = vmul.f32 %v2099_v0, %v2064_v44  ;;  %v2205_v44 = vrot.slane %v1942_v12, %v2623_v21 }
  0xc9   : > { %v880_v27 = vpop.permute.xlu0 %879 }
  0xca   : > { %2625 = vst [vmem:[#allocation2_spill] sm:$0xff] %v2132_v25  ;;  %v913_v30 = vmul.f32 %v2117_v9, %v880_v27  ;;  %v2174_v27 = vsub.s32 %v1139_v15, %v1912_v4  ;;  %v903_v15 = vmul.f32 %v2117_v9, %v2084_v58  ;;  %v905_v58 = vmul.f32 %v2117_v9, %v2096_v63 }
  0xcc   : > { %v2139_v31 = vadd.f32 %v913_v30, %v829_v28  ;;  %v884_v32 = vpop.permute.xlu1 %883  ;;  %v1414_v28 = vsub.s32 5, %v1912_v4  ;;  %v796_v30 = vmul.f32 %v2099_v0, %v2061_v43 }
  0xcd   : > { %v2141_v33 = vpop.permute.xlu0 %887  ;;  %v914_v37 = vmul.f32 %v2117_v9, %v884_v32 }
  0xce   : > { %2626 = vst [vmem:[#allocation3_spill] sm:$0xff] %v2139_v31  ;;  %v2223_v7 = vrot.slane %v1953_v16, %v1414_v28  ;;  %v915_v63 = vmul.f32 %v2117_v9, %v2141_v33 }
  0xcf   : > { %v2147_v38 = vadd.f32 %v914_v37, %v830_v34  ;;  %v2186_v34 = vrot.slane %v1942_v12, %v2624_v18  ;;  %v800_v37 = vmul.f32 %v2099_v0, %v2071_v47  ;;  %v823_v18 = vadd.f32 %v2112_v6, %v801_v36 }
  0xd0   : > { %v892_v39 = vpop.permute.xlu1 %891  ;;  %2630 = vst [vmem:[#allocation7_spill] sm:$0xff] %v2223_v7  ;;  %v831_v36 = vadd.f32 %v2112_v6, %v809_v1 }
  0xd1   : > { %2627 = vst [vmem:[#allocation4_spill] sm:$0xff] %v2147_v38  ;;  %v896_v40 = vpop.permute.xlu0 %895  ;;  %v916_v50 = vmul.f32 %v2117_v9, %v892_v39 }
  0xd2   : > { %v917_v51 = vmul.f32 %v2117_v9, %v896_v40  ;;  %v803_v40 = vmul.f32 %v2099_v0, %v2073_v48  ;;  %v821_v48 = vadd.f32 %v2112_v6, %v799_v61 }
  0xd3   : > { %v2153_v52 = vadd.f32 %v916_v50, %v832_v49  ;;  %v2216_v49 = vrot.slane %v1942_v12, %v1414_v28  ;;  %v820_v50 = vadd.f32 %v2112_v6, %v798_v29  ;;  %v822_v29 = vadd.f32 %v2112_v6, %v800_v37 }
  0xd4   : > { %v2155_v55 = vadd.f32 %v917_v51, %v833_v41  ;;  %v806_v41 = vmul.f32 %v2099_v0, %v2077_v53  ;;  %v818_v51 = vadd.f32 %v2112_v6, %v796_v30  ;;  %v819_v53 = vadd.f32 %v2112_v6, %v797_v35 }
  0xd5   : > { %2628 = vst [vmem:[#allocation5_spill] sm:$0xff] %v2153_v52  ;;  %v936_v56 = vpop.permute.xlu1 %935  ;;  %v902_v30 = vmul.f32 %v2117_v9, %v2086_v59  ;;  %v825_v28 = vadd.f32 %v2112_v6, %v803_v40  ;;  %v906_v35 = vmul.f32 %v2117_v9, %v2105_v3  ;;  %v907_v37 = vmul.f32 %v2117_v9, %v2107_v5 }
  0xd6   : > { %2629 = vst [vmem:[#allocation6_spill] sm:$0xff] %v2155_v55  ;;  %v940_v57 = vpop.permute.xlu0 %939  ;;  %v828_v61 = vadd.f32 %v2112_v6, %v806_v41  ;;  %v909_v59 = vmul.f32 %v2117_v9, %v2119_v11  ;;  %v919_v40 = vadd.f32 %v903_v15, %v819_v53  ;;  %v912_v41 = vmul.f32 %v2117_v9, %v2134_v26  ;;  %v1707_v26 = vld [vmem:[%s2616_s4] ss:$0 sm:$0xff] }
  0xd7   : > { %v1003_v62 = vmul.f32 %v2168_v22, %v940_v57  ;;  %v1002_v3 = vmul.f32 %v2168_v22, %v936_v56  ;;  %v918_v47 = vadd.f32 %v902_v30, %v818_v51  ;;  %v920_v6 = vadd.f32 %v904_v54, %v820_v50 }
  0xd8   : > { %v921_v11 = vadd.f32 %v905_v58, %v821_v48  ;;  %v922_v43 = vadd.f32 %v906_v35, %v822_v29  ;;  %v2260_v56 = vadd.f32 %v907_v37, %v823_v18  ;;  %v925_v50 = vadd.f32 %v909_v59, %v825_v28 }
  0xd9   : > { %v944_v8 = vpop.permute.xlu1 %943  ;;  %v1019_v51 = vadd.f32 %v1003_v62, %v919_v40  ;;  %v2263_v48 = vadd.f32 %v912_v41, %v828_v61  ;;  %v2265_v29 = vadd.f32 %v915_v63, %v831_v36  ;;  %v2280_v40 = vld [vmem:[%s2618_s6] ss:$0 sm:$0xff] }
  0xda   : > { %v1004_v1 = vmul.f32 %v2168_v22, %v944_v8 }
  0xdb   : > { %v1040_v10 = vpop.permute.xlu0 %1039 }
  0xdc   : > { %v1103_v5 = vmul.f32 %v2171_v23, %v1040_v10  ;;  %v1020_v58 = vadd.f32 %v1004_v1, %v920_v6 }
  0xde   : > { %v1036_v19 = vpop.permute.xlu1 %1035  ;;  %v2268_v35 = vadd.f32 %v1103_v5, %v1019_v51 }
  0xdf   : > { %v2164_v20 = vpop.permute.xlu0 %1051  ;;  %v1102_v57 = vmul.f32 %v2171_v23, %v1036_v19  ;;  %v1018_v19 = vadd.f32 %v1002_v3, %v918_v47 }
  0xe0   : > { %v1106_v18 = vmul.f32 %v2171_v23, %v2164_v20 }
  0xe1   : > { %v2272_v59 = vadd.f32 %v1102_v57, %v1018_v19 }
  0xe3   : > { %v2200_v39 = vpop.permute.xlu0 %1063  ;;  %v948_v46 = vpop.permute.xlu1 %947 }
  0xe4   : > { %v1005_v53 = vmul.f32 %v2168_v22, %v948_v46  ;;  %v1109_v61 = vmul.f32 %v2171_v23, %v2200_v39 }
  0xe6   : > { %v1021_v62 = vadd.f32 %v1005_v53, %v921_v11 }
  0xe7   : > { %v1076_v0 = vpop.permute.xlu0 %1075 }
  0xe8   : > { %v1044_v21 = vpop.permute.xlu1 %1043  ;;  %v2284_v1 = vmul.f32 %v2171_v23, %v1076_v0 }
  0xe9   : > { %v1104_v46 = vmul.f32 %v2171_v23, %v1044_v21 }
  0xeb   : > { %v1766_v45 = vpop.f32.mrb[0].mxu1  ;;  %v2286_v5 = vadd.f32 %v1104_v46, %v1020_v58 }
  0xec   : > { %v952_v9 = vpop.permute.xlu0 %951  ;;  %v647_v33 = vpop.f32.mrb[1].mxu1  ;;  %v2290_v11 = vadd.f32 %v1766_v45, %v2280_v40 }
  0xed   : > { %v1006_v8 = vmul.f32 %v2168_v22, %v952_v9  ;;  %v1048_v10 = vpop.permute.xlu1 %1047  ;;  %v1767_v15 = vpop.f32.mrb[2].mxu1 }
  0xee   : > { %v487_v30 = vpop.f32.mrb[0].mxu0  ;;  %v650_v54 = vpop.f32.mrb[3].mxu1  ;;  %v1105_v47 = vmul.f32 %v2171_v23, %v1048_v10  ;;  %v648_v10 = vadd.f32 %v2280_v40, %v647_v33 }
  0xef   : > { %v488_v28 = vadd.f32 %v1707_v26, %v487_v30  ;;  %v1754_v37 = vpop.f32.mrb[1].mxu0  ;;  %v1022_v63 = vadd.f32 %v1006_v8, %v922_v43  ;;  %v2299_v8 = vadd.f32 %v1767_v15, %v2280_v40  ;;  %v2302_v19 = vadd.f32 %v2280_v40, %v650_v54 }
  0xf0   : > { %v490_v36 = vpop.f32.mrb[2].mxu0  ;;  %v964_v21 = vpop.permute.xlu0 %963  ;;  %v2307_v58 = vadd.f32 %v1105_v47, %v1021_v62 }
  0xf1   : > { %v1136_v41 = vcombine.high %v488_v28, %v488_v28  ;;  %v1143_v20 = vrot.slane %v488_v28, %v2174_v27  ;;  %v491_v3 = vadd.f32 %v1707_v26, %v490_v36  ;;  %v1755_v6 = vpop.f32.mrb[3].mxu0  ;;  %v1009_v39 = vmul.f32 %v2168_v22, %v964_v21  ;;  %v956_v57 = vpop.permute.xlu1 %955 }
  0xf2   : > { %v1122_v30 = vadd.f32 %v1106_v18, %v1022_v63  ;;  %v1007_v15 = vmul.f32 %v2168_v22, %v956_v57 }
  0xf3   : > { %v1150_v53 = vrot.slane %v1136_v41, %v2174_v27  ;;  %v1151_v9 = vcombine.high %v1143_v20, %v1143_v20  ;;  %v1185_v51 = vcombine.high %v491_v3, %v491_v3  ;;  %v1770_v43 = vpop.f32.mrb[4].mxu1  ;;  %v1159_v26 = vrot.slane %v1143_v20, %v2174_v27 }
  0xf4   : > { %v2296_v0 = vrot.slane %v491_v3, %v2174_v27  ;;  %v2304_v45 = vpop.f32.mrb[5].mxu1  ;;  %v1025_v33 = vadd.f32 %v1009_v39, %v925_v50  ;;  %v976_v28 = vpop.permute.xlu0 %975  ;;  %v2316_v20 = vadd.f32 %v1770_v43, %v2280_v40 }
  0xf5   : > { %v1166_v46 = vrot.slane %v1150_v53, %v2174_v27  ;;  %v2309_v37 = vpop.f32.mrb[6].mxu1  ;;  %v1152_v36 = vcombine.high %v1150_v53, %v1150_v53  ;;  %v1173_v21 = vrot.slane %v1151_v9, %v2174_v27  ;;  %v1762_v41 = vpop.f32.mrb[4].mxu0  ;;  %v2319_v18 = vrot.slane %v1185_v51, %v2174_v27 }
  0xf6   : > { %v2313_v54 = vpop.permute.xlu1 %959  ;;  %v1200_v50 = vcombine.high %v2296_v0, %v2296_v0  ;;  %v2325_v62 = vrot.slane %v2296_v0, %v2174_v27  ;;  %v631_v63 = vpop.f32.mrb[5].mxu0  ;;  %v640_v6 = vadd.f32 %v1762_v41, %v2280_v40  ;;  %v1181_v39 = vcombine.high %v1159_v26, %v1159_v26 }
  0xf7   : > { %v1182_v47 = vcombine.high %v1166_v46, %v1166_v46  ;;  %v2327_v3 = vpop.f32.mrb[7].mxu1  ;;  %v1253_v57 = vrot.slane %v1166_v46, %v2089_v60  ;;  %v632_v53 = vadd.f32 %v2280_v40, %v631_v63  ;;  %v1763_v9 = vpop.f32.mrb[6].mxu0  ;;  %v1237_v43 = vrot.slane %v1159_v26, %v2089_v60 }
  0xf8   : > { %v1012_v0 = vmul.f32 %v2168_v22, %v976_v28  ;;  %v643_v32 = vadd.f32 %v1763_v9, %v2280_v40  ;;  %v634_v42 = vpop.f32.mrb[7].mxu0  ;;  %v1245_v52 = vrot.slane %v1181_v39, %v2089_v60  ;;  %v1183_v55 = vcombine.high %v1173_v21, %v1173_v21 }
  0xf9   : > { %v2333_v51 = vrot.slane %v1182_v47, %v2089_v60  ;;  %v1318_v41 = vsub.f32 %v1253_v57, %v648_v10  ;;  %v1180_v46 = vrot.slane %v1152_v36, %v2174_v27  ;;  %v1125_v38 = vadd.f32 %v1109_v61, %v1025_v33 }
  0xfa   : > { %v1314_v47 = vsub.f32 %v1237_v43, %v632_v53  ;;  %v635_v31 = vadd.f32 %v2280_v40, %v634_v42  ;;  %v2343_v26 = vpop.permute.xlu1 %1055  ;;  %v1316_v9 = vsub.f32 %v1245_v52, %v640_v6  ;;  %v1249_v25 = vrot.slane %v1183_v55, %v2089_v60 }
  0xfb   : > { %v1320_v63 = vsub.f32 %v2333_v51, %v2290_v11  ;;  %v2345_v28 = vpop.f32.mrb[8].mxu1  ;;  %v1334_v7 = vadd.f32 %v1318_v41, %v1122_v30  ;;  %v1184_v39 = vcombine.high %v1180_v46, %v1180_v46  ;;  %v2358_v61 = vadd.f32 %v1007_v15, %v2260_v56 }
  0xfc   : > { %v2348_v10 = vpop.f32.mrb[9].mxu1  ;;  %v1330_v42 = vadd.f32 %v1314_v47, %v2272_v59  ;;  %v1028_v33 = vadd.f32 %v1012_v0, %v2263_v48  ;;  %v1241_v52 = vrot.slane %v1173_v21, %v2089_v60  ;;  %v1332_v30 = vadd.f32 %v1316_v9, %v2286_v5 }
  0xfd   : > { %v2363_v55 = vpop.f32.mrb[10].mxu1  ;;  %v1350_v36 = vpack.c.bf16 %v1334_v7, %v1334_v7  ;;  %v1476_v6 = vmul.f32 %v2186_v34, %v1334_v7  ;;  %v1317_v57 = vsub.f32 %v1249_v25, %v643_v32  ;;  %v2631_v59 = vrot.slane %v1942_v12, %v2089_v60 }
  0xfe   : > { %v2367_v53 = vpop.f32.mrb[11].mxu1  ;;  %v1346_v56 = vpack.c.bf16 %v1330_v42, %v1330_v42  ;;  %v1265_v15 = vrot.slane %v1184_v39, %v2089_v60  ;;  %v1315_v21 = vsub.f32 %v1241_v52, %v635_v31  ;;  %v2373_v43 = vpop.permute.xlu1 %1059  ;;  %v1201_v5 = vcombine.high %v2319_v18, %v2319_v18 }
  0xff   : > { %v1472_v48 = vmul.f32 %v2631_v59, %v1330_v42  ;;  %v1348_v0 = vpack.c.bf16 %v1332_v30, %v1332_v30  ;;  %v2632_v25 = vrot.slane %v1942_v12, %v2158_v13  ;;  %1367 = vst.msk [vmem:[%s2355_s11 + $0x10] sm:$0xf] %vm1362_vm4, %v1350_v36  ;;  %v1257_v34 = vrot.slane %v1180_v46, %v2089_v60 }
 0x100   : > { %v2385_v7 = vrot.slane %v2319_v18, %v2174_v27  ;;  %v1222_v31 = vrot.slane %v1200_v50, %v2174_v27  ;;  %1363 = vst.msk [vmem:[%s2355_s11] sm:$0xf] %vm1362_vm4, %v1346_v56  ;;  %v1333_v41 = vadd.f32 %v1317_v57, %v2307_v58  ;;  %v1321_v47 = vsub.f32 %v1265_v15, %v2299_v8 }
 0x101   : > { %v1474_v32 = vmul.f32 %v2632_v25, %v1332_v30  ;;  %1365 = vst.msk [vmem:[%s2355_s11 + $0x8] sm:$0xf] %vm1362_vm4, %v1348_v0  ;;  %v1529_v9 = vmul.f32 %v1476_v6, %v1476_v6  ;;  %v1525_v39 = vmul.f32 %v1472_v48, %v1472_v48  ;;  %v1128_v42 = vadd.f32 %v2284_v1, %v1028_v33 }
 0x102   : > { %v1331_v46 = vadd.f32 %v1315_v21, %v2268_v35  ;;  %v1349_v30 = vpack.c.bf16 %v1333_v41, %v1333_v41  ;;  %v2633_v50 = vrot.slane %v1942_v12, %v2161_v14  ;;  %v1337_v56 = vadd.f32 %v1321_v47, %v1125_v38  ;;  %v988_v47 = vpop.permute.xlu0 %987 }
 0x103   : > { %v1527_v52 = vmul.f32 %v1474_v32, %v1474_v32  ;;  %v1495_v58 = vsel %vm449_vm2, %v1476_v6, 0.0  ;;  %v2634_v57 = vrot.slane %v1942_v12, %v2103_v2  ;;  %v1319_v1 = vsub.f32 %v1257_v34, %v2302_v19  ;;  %v2404_v33 = vpop.permute.xlu1 %967 }
 0x104   : > { %v1475_v36 = vmul.f32 %v2633_v50, %v1333_v41  ;;  %v1347_v8 = vpack.c.bf16 %v1331_v46, %v1331_v46  ;;  %v1488_v35 = vsel %vm449_vm2, %v1472_v48, 0.0  ;;  %1366 = vst.msk [vmem:[%s2355_s11 + $0xc] sm:$0xf] %vm1362_vm4, %v1349_v30  ;;  %v1353_v21 = vpack.c.bf16 %v1337_v56, %v1337_v56 }
 0x105   : > { %v1473_v59 = vmul.f32 %v2634_v57, %v1331_v46  ;;  %v2410_v38 = vmul.f32 %v2205_v44, %v1337_v56  ;;  %v1491_v6 = vsel %vm449_vm2, %v1474_v32, 0.0  ;;  %v1230_v19 = vcombine.high %v2325_v62, %v2325_v62 }
 0x106   : > { %v1528_v15 = vmul.f32 %v1475_v36, %v1475_v36  ;;  %1364 = vst.msk [vmem:[%s2355_s11 + $0x4] sm:$0xf] %vm1362_vm4, %v1347_v8  ;;  %v1544_v34 = vsel %vm449_vm2, %v1527_v52, 0.0  ;;  %v1548_v48 = vsel %vm449_vm2, %v1529_v9, 0.0  ;;  %v1541_v41 = vsel %vm449_vm2, %v1525_v39, 0.0 }
 0x107   : > { %v1489_v0 = vsel %vm449_vm2, %v1473_v59, 0.0  ;;  %v1526_v25 = vmul.f32 %v1473_v59, %v1473_v59  ;;  %1370 = vst.msk [vmem:[%s2355_s11 + $0x1c] sm:$0xf] %vm1362_vm4, %v1353_v21  ;;  %v1493_v32 = vsel %vm449_vm2, %v1475_v36, 0.0  ;;  %v1008_v30 = vmul.f32 %v2168_v22, %v2313_v54  ;;  %v972_v56 = vpop.permute.xlu1 %971 }
 0x108   : > { %v1490_v44 = vadd.f32 %v1489_v0, %v1488_v35  ;;  %v1277_v50 = vrot.slane %v1230_v19, %v2089_v60  ;;  %v1546_v52 = vsel %vm449_vm2, %v1528_v15, 0.0  ;;  %v664_v39 = vadd.f32 %v2280_v40, %v2304_v45 }
 0x109   : > { %v1542_v46 = vsel %vm449_vm2, %v1526_v25, 0.0  ;;  %v1015_v59 = vmul.f32 %v2168_v22, %v988_v47  ;;  %v1269_v36 = vrot.slane %v2325_v62, %v2089_v60  ;;  %v2437_v54 = vadd.f32 %v2309_v37, %v2280_v40  ;;  %v1088_v47 = vpop.permute.xlu0 %1087 }
 0x10a   : > { %v1492_v8 = vadd.f32 %v1491_v6, %v1490_v44  ;;  %v1543_v9 = vadd.f32 %v1542_v46, %v1541_v41  ;;  %v1324_v57 = vsub.f32 %v1277_v50, %v2316_v20  ;;  %v1232_v21 = vcombine.high %v1222_v31, %v1222_v31 }
 0x10b   : > { %v667_v15 = vadd.f32 %v2280_v40, %v2327_v3  ;;  %v1273_v6 = vrot.slane %v1222_v31, %v2089_v60  ;;  %v2442_v45 = vsub.f32 %v1269_v36, %v664_v39  ;;  %v1107_v20 = vmul.f32 %v2171_v23, %v2343_v26 }
 0x10c   : > { %v1545_v35 = vadd.f32 %v1544_v34, %v1543_v9  ;;  %v1340_v0 = vadd.f32 %v1324_v57, %v1128_v42  ;;  %v1494_v25 = vadd.f32 %v1493_v32, %v1492_v8  ;;  %v2447_v62 = vrot.slane %v1232_v21, %v2089_v60  ;;  %v1068_v3 = vpop.permute.xlu1 %1067 }
 0x10d   : > { %v2449_v37 = vsub.f32 %v1273_v6, %v667_v15  ;;  %v2453_v34 = vadd.f32 %v2345_v28, %v2280_v40  ;;  %v2635_v42 = vrot.slane %v1953_v16, %v2158_v13  ;;  %v1123_v26 = vadd.f32 %v1107_v20, %v2358_v61 }
 0x10e   : > { %v1547_v19 = vadd.f32 %v1546_v52, %v1545_v35  ;;  %v1356_v31 = vpack.c.bf16 %v1340_v0, %v1340_v0  ;;  %v1496_v44 = vadd.f32 %v1495_v58, %v1494_v25  ;;  %v1325_v32 = vsub.f32 %v2447_v62, %v2437_v54 }
 0x10f   : > { %v2458_v41 = vmul.f32 %v2635_v42, %v1340_v0  ;;  %v1231_v50 = vcombine.high %v2385_v7, %v2385_v7  ;;  %v680_v28 = vadd.f32 %v2280_v40, %v2348_v10  ;;  %v1024_v52 = vadd.f32 %v1008_v30, %v2124_v17 }
 0x110   : > { %v1549_v46 = vadd.f32 %v1548_v48, %v1547_v19  ;;  %1373 = vst.msk [vmem:[%s2355_s11 + $0x28] sm:$0xf] %vm1362_vm4, %v1356_v31  ;;  %v1335_v13 = vadd.f32 %v1319_v1, %v1123_v26  ;;  %v1285_v61 = vrot.slane %v2385_v7, %v2089_v60  ;;  %v2636_v58 = vsub.s32 6, %v1912_v4  ;;  %v1072_v1 = vpop.permute.xlu1 %1071  ;;  %v2637_v26 = vld [vmem:[#allocation2_spill] sm:$0xff] }
 0x111   : > { %v1031_v48 = vadd.f32 %v1015_v59, %v2265_v29  ;;  %v2477_v9 = vrot.slane %v1231_v50, %v2089_v60  ;;  %v1115_v10 = vmul.f32 %v2171_v23, %v1088_v47  ;;  %v1229_v17 = vrot.slane %v1201_v5, %v2174_v27  ;;  %v2638_v50 = vld [vmem:[#allocation7_spill] sm:$0xff] }
 0x112   : > { %v1419_v8 = vrot.slane %v1942_v12, %v2636_v58  ;;  %v1351_v30 = vpack.c.bf16 %v1335_v13, %v1335_v13  ;;  %v1477_v7 = vmul.f32 %v2216_v49, %v1335_v13  ;;  %v2485_v39 = vsub.f32 %v1285_v61, %v680_v28 }
 0x113   : > { %v2489_v12 = vadd.f32 %v2363_v55, %v2280_v40  ;;  %v1328_v29 = vsub.f32 %v2477_v9, %v2453_v34  ;;  %v1131_v57 = vadd.f32 %v1115_v10, %v1031_v48  ;;  %v1233_v59 = vcombine.high %v1229_v17, %v1229_v17 }
 0x114   : > { %v683_v36 = vadd.f32 %v2280_v40, %v2367_v53  ;;  %1368 = vst.msk [vmem:[%s2355_s11 + $0x14] sm:$0xf] %vm1362_vm4, %v1351_v30  ;;  %v1497_v27 = vsel %vm449_vm2, %v1477_v7, 0.0  ;;  %v1530_v18 = vmul.f32 %v1477_v7, %v1477_v7  ;;  %v1289_v49 = vrot.slane %v1229_v17, %v2089_v60  ;;  %v2639_v7 = vld [vmem:[#allocation3_spill] sm:$0xff] }
 0x115   : > { %v1108_v5 = vmul.f32 %v2171_v23, %v2373_v43  ;;  %v1498_v55 = vadd.f32 %v1497_v27, %v1496_v44  ;;  %v2502_v35 = vrot.slane %v1233_v59, %v2089_v60  ;;  %v1010_v21 = vmul.f32 %v2168_v22, %v2404_v33  ;;  %v980_v20 = vpop.permute.xlu1 %979 }
 0x116   : > { %v1011_v15 = vmul.f32 %v2168_v22, %v972_v56  ;;  %v1550_v40 = vsel %vm449_vm2, %v1530_v18, 0.0  ;;  %v1327_v53 = vsub.f32 %v1289_v49, %v683_v36  ;;  %v1110_v0 = vmul.f32 %v2171_v23, %v1068_v3 }
 0x117   : > { %v1124_v6 = vadd.f32 %v1108_v5, %v1024_v52  ;;  %v1551_v25 = vadd.f32 %v1550_v40, %v1549_v46  ;;  %v1329_v43 = vsub.f32 %v2502_v35, %v2489_v12  ;;  %v1026_v19 = vadd.f32 %v1010_v21, %v2130_v24 }
 0x118   : > { %v1343_v31 = vadd.f32 %v1327_v53, %v1131_v57  ;;  %v1427_v56 = vrot.slane %v1953_v16, %v2089_v60  ;;  %v1111_v42 = vmul.f32 %v2171_v23, %v1072_v1  ;;  %v1532_v3 = vmul.f32 %v2410_v38, %v2410_v38 }
 0x119   : > { %v1336_v33 = vadd.f32 %v1320_v63, %v1124_v6  ;;  %v1027_v44 = vadd.f32 %v1011_v15, %v2637_v26  ;;  %v1126_v47 = vadd.f32 %v1110_v0, %v1026_v19  ;;  %v1013_v24 = vmul.f32 %v2168_v22, %v980_v20  ;;  %v984_v63 = vpop.permute.xlu1 %983 }
 0x11a   : > { %v1359_v46 = vpack.c.bf16 %v1343_v31, %v1343_v31  ;;  %v2523_v28 = vmul.f32 %v2638_v50, %v1343_v31  ;;  %v1431_v58 = vrot.slane %v1953_v16, %v2103_v2  ;;  %v1554_v1 = vsel %vm449_vm2, %v1532_v3, 0.0 }
 0x11b   : > { %v1352_v11 = vpack.c.bf16 %v1336_v33, %v1336_v33  ;;  %v1478_v51 = vmul.f32 %v1419_v8, %v1336_v33  ;;  %v1338_v52 = vadd.f32 %v2442_v45, %v1126_v47  ;;  %v1127_v60 = vadd.f32 %v1111_v42, %v1027_v44  ;;  %v2640_v42 = vld [vmem:[#allocation4_spill] sm:$0xff] }
 0x11c   : > { %1376 = vst.msk [vmem:[%s2355_s11 + $0x34] sm:$0xf] %vm1362_vm4, %v1359_v46  ;;  %v1501_v45 = vsel %vm449_vm2, %v2410_v38, 0.0  ;;  %v1029_v57 = vadd.f32 %v1013_v24, %v2639_v7  ;;  %v1014_v5 = vmul.f32 %v2168_v22, %v984_v63  ;;  %v1439_v40 = vrot.slane %v1953_v16, %v2161_v14 }
 0x11d   : > { %1369 = vst.msk [vmem:[%s2355_s11 + $0x18] sm:$0xf] %vm1362_vm4, %v1352_v11  ;;  %v1499_v13 = vsel %vm449_vm2, %v1478_v51, 0.0  ;;  %v1531_v61 = vmul.f32 %v1478_v51, %v1478_v51  ;;  %v1354_v10 = vpack.c.bf16 %v1338_v52, %v1338_v52  ;;  %v1480_v17 = vmul.f32 %v1427_v56, %v1338_v52 }
 0x11e   : > { %v1500_v48 = vadd.f32 %v1499_v13, %v1498_v55  ;;  %v1339_v8 = vadd.f32 %v2449_v37, %v1127_v60  ;;  %v1080_v18 = vpop.permute.xlu1 %1079  ;;  %v1535_v53 = vmul.f32 %v2458_v41, %v2458_v41  ;;  %v1030_v14 = vadd.f32 %v1014_v5, %v2640_v42 }
 0x11f   : > { %v1552_v30 = vsel %vm449_vm2, %v1531_v61, 0.0  ;;  %1371 = vst.msk [vmem:[%s2355_s11 + $0x20] sm:$0xf] %vm1362_vm4, %v1354_v10  ;;  %v1503_v2 = vsel %vm449_vm2, %v1480_v17, 0.0  ;;  %v1533_v27 = vmul.f32 %v1480_v17, %v1480_v17  ;;  %v1113_v38 = vmul.f32 %v2171_v23, %v1080_v18 }
 0x120   : > { %v1553_v59 = vadd.f32 %v1552_v30, %v1551_v25  ;;  %v1502_v36 = vadd.f32 %v1501_v45, %v1500_v48  ;;  %v1355_v49 = vpack.c.bf16 %v1339_v8, %v1339_v8  ;;  %v1481_v37 = vmul.f32 %v1431_v58, %v1339_v8  ;;  %v1096_v48 = vpop.permute.xlu0 %1095 }
 0x121   : > { %v1556_v15 = vsel %vm449_vm2, %v1533_v27, 0.0  ;;  %v1129_v20 = vadd.f32 %v1113_v38, %v1029_v57  ;;  %v1507_v25 = vsel %vm449_vm2, %v2458_v41, 0.0  ;;  %v2641_v24 = vsub.s32 4, %v1912_v4  ;;  %v2642_v27 = vld [vmem:[#allocation6_spill] sm:$0xff] }
 0x122   : > { %v1504_v55 = vadd.f32 %v1503_v2, %v1502_v36  ;;  %v1555_v21 = vadd.f32 %v1554_v1, %v1553_v59  ;;  %1372 = vst.msk [vmem:[%s2355_s11 + $0x24] sm:$0xf] %vm1362_vm4, %v1355_v49  ;;  %v1505_v6 = vsel %vm449_vm2, %v1481_v37, 0.0  ;;  %v1534_v0 = vmul.f32 %v1481_v37, %v1481_v37  ;;  %v1084_v33 = vpop.permute.xlu1 %1083 }
 0x123   : > { %v1341_v3 = vadd.f32 %v1325_v32, %v1129_v20  ;;  %v1114_v26 = vmul.f32 %v2171_v23, %v1084_v33  ;;  %v1443_v41 = vrot.slane %v1953_v16, %v2641_v24  ;;  %v1560_v46 = vsel %vm449_vm2, %v1535_v53, 0.0 }
 0x124   : > { %v1557_v19 = vadd.f32 %v1556_v15, %v1555_v21  ;;  %v1506_v31 = vadd.f32 %v1505_v6, %v1504_v55  ;;  %v1558_v56 = vsel %vm449_vm2, %v1534_v0, 0.0  ;;  %v1538_v17 = vmul.f32 %v2523_v28, %v2523_v28 }
 0x125   : > { %v1357_v50 = vpack.c.bf16 %v1341_v3, %v1341_v3  ;;  %v1483_v11 = vmul.f32 %v1439_v40, %v1341_v3  ;;  %v1130_v51 = vadd.f32 %v1114_v26, %v1030_v14  ;;  %v1117_v7 = vmul.f32 %v2171_v23, %v1096_v48 }
 0x126   : > { %v1559_v44 = vadd.f32 %v1558_v56, %v1557_v19  ;;  %v1508_v47 = vadd.f32 %v1507_v25, %v1506_v31  ;;  %v1513_v57 = vsel %vm449_vm2, %v2523_v28, 0.0  ;;  %v1566_v37 = vsel %vm449_vm2, %v1538_v17, 0.0  ;;  %v2644_v28 = vld [vmem:[#allocation5_spill] sm:$0xff] }
 0x127   : > { %1374 = vst.msk [vmem:[%s2355_s11 + $0x2c] sm:$0xf] %vm1362_vm4, %v1357_v50  ;;  %v1509_v54 = vsel %vm449_vm2, %v1483_v11, 0.0  ;;  %v1536_v62 = vmul.f32 %v1483_v11, %v1483_v11  ;;  %v1342_v32 = vadd.f32 %v2485_v39, %v1130_v51  ;;  %v992_v52 = vpop.permute.xlu1 %991  ;;  %v2643_v5 = vsub.s32 7, %v1912_v4 }
 0x128   : > { %v1561_v63 = vadd.f32 %v1560_v46, %v1559_v44  ;;  %v1510_v60 = vadd.f32 %v1509_v54, %v1508_v47  ;;  %v1016_v36 = vmul.f32 %v2168_v22, %v992_v52  ;;  %v2645_v6 = vsub.s32 6, %v1912_v4 }
 0x129   : > { %v1562_v13 = vsel %vm449_vm2, %v1536_v62, 0.0  ;;  %v1358_v61 = vpack.c.bf16 %v1342_v32, %v1342_v32  ;;  %v1484_v58 = vmul.f32 %v1443_v41, %v1342_v32  ;;  %v1455_v38 = vrot.slane %v1953_v16, %v2643_v5 }
 0x12a   : > { %v1563_v10 = vadd.f32 %v1562_v13, %v1561_v63  ;;  %v1032_v40 = vadd.f32 %v1016_v36, %v2644_v28  ;;  %v1451_v0 = vrot.slane %v1953_v16, %v2645_v6 }
 0x12b   : > { %1375 = vst.msk [vmem:[%s2355_s11 + $0x30] sm:$0xf] %vm1362_vm4, %v1358_v61  ;;  %v1511_v8 = vsel %vm449_vm2, %v1484_v58, 0.0  ;;  %v1537_v45 = vmul.f32 %v1484_v58, %v1484_v58  ;;  %v996_v1 = vpop.permute.xlu1 %995 }
 0x12c   : > { %v1512_v30 = vadd.f32 %v1511_v8, %v1510_v60  ;;  %v1017_v39 = vmul.f32 %v2168_v22, %v996_v1 }
 0x12d   : > { %v1564_v59 = vsel %vm449_vm2, %v1537_v45, 0.0 }
 0x12e   : > { %v1565_v2 = vadd.f32 %v1564_v59, %v1563_v10  ;;  %v1033_v18 = vadd.f32 %v1017_v39, %v2642_v27  ;;  %v1514_v49 = vadd.f32 %v1513_v57, %v1512_v30 }
 0x130   : > { %v1133_v55 = vadd.f32 %v1117_v7, %v1033_v18  ;;  %v1092_v21 = vpop.permute.xlu1 %1091  ;;  %v1567_v15 = vadd.f32 %v1566_v37, %v1565_v2 }
 0x131   : > { %v1116_v53 = vmul.f32 %v2171_v23, %v1092_v21 }
 0x132   : > { %v1345_v22 = vadd.f32 %v1329_v43, %v1133_v55 }
 0x133   : > { %v1132_v20 = vadd.f32 %v1116_v53, %v1032_v40 }
 0x134   : > { %v1361_v25 = vpack.c.bf16 %v1345_v22, %v1345_v22  ;;  %v1487_v19 = vmul.f32 %v1455_v38, %v1345_v22 }
 0x135   : > { %v1344_v31 = vadd.f32 %v1328_v29, %v1132_v20 }
 0x136   : > { %1378 = vst.msk [vmem:[%s2355_s11 + $0x3c] sm:$0xf] %vm1362_vm4, %v1361_v25  ;;  %v1540_v56 = vmul.f32 %v1487_v19, %v1487_v19  ;;  %v1517_v35 = vsel %vm449_vm2, %v1487_v19, 0.0 }
 0x137   : > { %v1360_v33 = vpack.c.bf16 %v1344_v31, %v1344_v31  ;;  %v1486_v23 = vmul.f32 %v1451_v0, %v1344_v31 }
 0x138   : > { %v1570_v9 = vsel %vm449_vm2, %v1540_v56, 0.0 }
 0x139   : > { %1377 = vst.msk [vmem:[%s2355_s11 + $0x38] sm:$0xf] %vm1362_vm4, %v1360_v33  ;;  %v1515_v4 = vsel %vm449_vm2, %v1486_v23, 0.0  ;;  %v1539_v12 = vmul.f32 %v1486_v23, %v1486_v23 }
 0x13a   : > { %v1516_v16 = vadd.f32 %v1515_v4, %v1514_v49 }
 0x13b   : > { %v1568_v43 = vsel %vm449_vm2, %v1539_v12, 0.0 }
 0x13c   : > { %v1518_v42 = vadd.f32 %v1517_v35, %v1516_v16  ;;  %v1569_v34 = vadd.f32 %v1568_v43, %v1567_v15 }
 0x13e   : > { %v1519_v29 = vrot.slane %v1518_v42, 4  ;;  %v1571_v14 = vadd.f32 %v1570_v9, %v1569_v34 }
 0x140   : > { %v1520_v3 = vadd.f32 %v1519_v29, %v1518_v42  ;;  %v1572_v26 = vrot.slane %v1571_v14, 4 }
 0x142   : > { %v1521_v44 = vrot.slane %v1520_v3, 2  ;;  %v1573_v47 = vadd.f32 %v1572_v26, %v1571_v14 }
 0x144   : > { %v1522_v24 = vadd.f32 %v1521_v44, %v1520_v3  ;;  %v1574_v41 = vrot.slane %v1573_v47, 2 }
 0x146   : > { %v1523_v46 = vrot.slane %v1522_v24, 1  ;;  %v1575_v50 = vadd.f32 %v1574_v41, %v1573_v47 }
 0x148   : > { %v1576_v11 = vrot.slane %v1575_v50, 1  ;;  %v1524_v51 = vadd.f32 %v1523_v46, %v1522_v24 }
 0x14a   : > { %v1577_v63 = vadd.f32 %v1576_v11, %v1575_v50 }
 0x14c   : > { %v1579_v54 = vsel %vm1578_vm5, %v1524_v51, %v1577_v63 }
 0x14d   : > { %1581 = vst.msk [vmem:[%s417_s16] sm:$0x3] %vm1580_vm6, %v1579_v54 }
 0x14e PF: > { %s21_s13 = sadd.s32 1, %s1834_s13  }
 0x14f   : > { %p18_p6 = scmp.ge.s32.totalorder %s21_s13, 4  }
 0x151   :  { %20 = sbr.rel (!%p18_p6) target bundleno = 1 (0x1), region = 104 }

// kernel: point_transformer_layer.5
= control target key start
LH: loop header
LB: loop body
LE: loop exit
PB: predicated region body
PF: predicated region fallthrough
CT: control target
= control target key end

     0   :  { %16 = vsyncpa [#allocation3], 0  ;;  %s3405_s0 = inlined_call_operand.vmem [shape: bf16[32,8,32], index: 0, kind: input, shape index: {}]   ;;  %s3406_s1 = inlined_call_operand.vmem [shape: bf16[32,8,32], index: 1, kind: input, shape index: {}]   ;;  %s3407_s2 = inlined_call_operand.vmem [shape: f32[32,8,4], index: 2, kind: input, shape index: {}]   ;;  %s3408_s3 = inlined_call_operand.vmem [shape: bf16[32,32], index: 3, kind: input, shape index: {}]   ;;  %s3409_s4 = inlined_call_operand.vmem [shape: f32[1,32], index: 4, kind: input, shape index: {}]   ;;  %s3410_s5 = inlined_call_operand.vmem [shape: bf16[32,32], index: 5, kind: input, shape index: {}]   ;;  %s3411_s6 = inlined_call_operand.vmem [shape: f32[1,32], index: 6, kind: input, shape index: {}]   ;;  %s3412_s7 = inlined_call_operand.vmem [shape: f32[4,32], index: 7, kind: input, shape index: {}]   ;;  %s3413_s8 = inlined_call_operand.vmem [shape: f32[1,32], index: 8, kind: input, shape index: {}]   ;;  %s3414_s9 = inlined_call_operand.vmem [shape: f32[1,32], index: 9, kind: input, shape index: {}]   ;;  %s3415_s10 = inlined_call_operand.vmem [shape: f32[1,32], index: 10, kind: input, shape index: {}]   ;;  %s3416_s11 = inlined_call_operand.hbm [shape: f32[32,32], index: 11, kind: output, shape index: {}]  }
   0x1   :  { %18 = vsyncpa [#allocation3 + $0x1], 0  ;;  %s2482_s17 = smov 0   ;;  %s2484_s18 = smov 0  }
   0x2   :  { %s2486_s19 = smov 0   ;;  %s2488_s20 = smov 0  }
   0x3 LB: > { %s2503_s21 = sadd.s32 4294967295, %s2413_s20   ;;  %s2037_s22 = sadd.s32 4294967294, %s2413_s20   ;;  %s2413_s20 = sphi %s2488_s20, %s3422_s20   ;;  %s2409_s19 = sphi %s2486_s19, %s3421_s19   ;;  %s2405_s18 = sphi %s2484_s18, %s3420_s18   ;;  %s2401_s17 = sphi %s2482_s17, %s3419_s17  }
   0x4   : > { %s2507_s23 = sadd.s32 1, %s2413_s20   ;;  %s277_s24 = sadd.s32 1, %s2409_s19 }
   0x5   : > { %s274_s25 = ssub.s32 %s2413_s20, %s2507_s23  ;;  %p287_p0 = scmp.ne.s32.totalorder %s2409_s19, %s2405_s18 }
   0x6   : > { %p275_p1 = scmp.eq.s32.totalorder %s274_s25, 0  ;;  %p288_p2 = scmp.eq.s32.totalorder %s2503_s21, 1 }
   0x7   : > { %p293_p3 = scmp.ne.s32.totalorder %s2405_s18, %s2401_s17  ;;  %p294_p4 = scmp.eq.s32.totalorder %s2037_s22, 1 }
   0x8   : > { %s2518_s26 = scalar_select %p275_p1, %s2409_s19, %s277_s24  }
   0x9   : > { %p2520_p5 = por %p288_p2, %p287_p0  ;;  %p2524_p6 = por %p294_p4, %p293_p3 }
   0xa   : > { %p2040_p7 = scmp.ge.s32.totalorder %s2413_s20, 1  ;;  %p363_p8 = scmp.lt.s32.totalorder %s2413_s20, 3 }
   0xc   : > { %p364_p9 = pnand %p2040_p7, %p363_p8 }
   0xd   : > { %v2243_v0 = vld [vmem:[%s3410_s5] sm:$0xff] (!%p364_p9)   ;;  %v2415_v1 = vmov (!%p364_p9), 0   ;;  %v2244_v2 = vld [vmem:[%s3410_s5 + $0x8] sm:$0xff] (!%p364_p9)   ;;  %s2042_s14 = sshll.u32 (!%p364_p9), %s2503_s21, 4  ;;  %vm686_vm0 = vcmask (!%p364_p9), 261120   ;;  %vm1912_vm1 = vcmask (!%p364_p9), 1041409  }
   0xe   : > { %367 = sbr.rel (%p364_p9) target bundleno = 458 (0x1ca), region = 64  ;;  %2232 = vset.pattern.permute.xlu1 (!%p364_p9), %v2415_v1  ;;  %2231 = vset.pattern.permute.xlu0 (!%p364_p9), %v2415_v1  ;;  %p414_p10 = scmp.lt.s32.totalorder (!%p364_p9), %s2042_s14, 31  ;;  %v2251_v3 = vld [vmem:[%s3408_s3] sm:$0xff] (!%p364_p9)   ;;  %v2254_v4 = vld [vmem:[%s3408_s3 + $0x8] sm:$0xff] (!%p364_p9)   ;;  %vm1914_vm2 = vcmask (!%p364_p9), 1042434   ;;  %vm1916_vm3 = vcmask (!%p364_p9), 1043459  }
   0xf   : > { %2166 = vmatprep.subr.bf16.mxu1 (!%p364_p9), %v2243_v0  ;;  %2146 = vmatprep.subr.bf16.mxu0 (!%p364_p9), %v2251_v3  ;;  %v2608_v18 = vld [vmem:[%s3414_s9] ss:$0 sm:$0xff] (!%p364_p9)  ;;  %vm1918_vm4 = vcmask (!%p364_p9), 1044484   ;;  %vm1920_vm5 = vcmask (!%p364_p9), 1045509   ;;  %vm1922_vm6 = vcmask (!%p364_p9), 1046534   ;;  %vm1924_vm7 = vcmask (!%p364_p9), 1047559  }
  0x10   : > { %2167 = vmatpush3.bf16.msra.mxu1 (!%p364_p9), %v2243_v0  ;;  %2147 = vmatpush3.bf16.msra.mxu0 (!%p364_p9), %v2251_v3  ;;  %v2626_v29 = vld [vmem:[%s3415_s10] ss:$0 sm:$0xff] (!%p364_p9)  ;;  %s2086_s16 = sshll.u32 (!%p364_p9), %s2503_s21, 8  ;;  %s2419_s15 = smov (!%p364_p9), [#allocation2]  }
  0x11   : > { %2168 = vmatprep.subr.bf16.mxu1 (!%p364_p9), %v2244_v2  ;;  %2148 = vmatprep.subr.bf16.mxu0 (!%p364_p9), %v2254_v4 }
  0x14   : > { %2169 = vmatpush3.bf16.msra.mxu1 (!%p364_p9), %v2244_v2  ;;  %2149 = vmatpush3.bf16.msra.mxu0 (!%p364_p9), %v2254_v4 }
  0x15   : > { %s3424_s14 = smov (!%p414_p10, %s2042_s14), 31 }
  0x16   : > { %s2047_s25 = sshll.u32 %s3424_s14, 3  ;;  %s2043_s29 = sshll.u32 %s3424_s14, 2 }
  0x17   : > { %s2550_s13 = scalar_lea.vmem %s3407_s2, %s2047_s25  ;;  %s2557_s22 = scalar_lea.vmem %s3406_s1, %s2043_s29 }
  0x18   : > { %v2560_v5 = vld [vmem:[%s2550_s13 + $0x10] sm:$0xff]  ;;  %v2563_v6 = vld [vmem:[%s2550_s13] sm:$0xff]  ;;  %v2246_v8 = vld [vmem:[%s2557_s22 + $0x8] sm:$0xff]   ;;  %s2602_s30 = scalar_lea.vmem %s3405_s0, %s2043_s29  ;;  %s410_s14 = sand.u32 1, %s2405_s18  }
  0x19   : > { %1038 = vperm.xlu1 %2232, %v2560_v5   ;;  %1028 = vperm.xlu0 %2231, %v2563_v6   ;;  %v2245_v7 = vld [vmem:[%s2557_s22] sm:$0xff]   ;;  %v2570_v9 = vld [vmem:[%s2550_s13 + $0x18] sm:$0xff]  ;;  %v2574_v10 = vld [vmem:[%s2550_s13 + $0x8] sm:$0xff]  ;;  %s2041_s29 = sshll.u32 %s410_s14, 4  ;;  %s3364_s21 = scalar_lea.sflag [#allocation3], %s410_s14 }
  0x1a   : > { %2170 = vmatprep.mubr.msk.bf16.mxu1 %vm686_vm0, %v2245_v7  ;;  %v2247_v11 = vld [vmem:[%s2557_s22 + $0x10] sm:$0xff]   ;;  %v2581_v12 = vld [vmem:[%s2550_s13 + $0x28] sm:$0xff]  ;;  %v2584_v13 = vld [vmem:[%s2550_s13 + $0x20] sm:$0xff] }
  0x1b   : > { %2171 = vmatmul.mubr.msk.bf16.vlgmr.msra.gmra.mrb[0].mxu1 %vm686_vm0, %v2246_v8  ;;  %v2248_v14 = vld [vmem:[%s2557_s22 + $0x18] sm:$0xff]   ;;  %v2594_v16 = vld [vmem:[%s2550_s13 + $0x30] sm:$0xff]  ;;  %v2249_v17 = vld [vmem:[%s2557_s22 + $0x20] sm:$0xff]  }
  0x1c   : > { %2174 = vmatprep.mubr.msk.bf16.mxu1 %vm686_vm0, %v2247_v11  ;;  %v2591_v15 = vld [vmem:[%s2550_s13 + $0x38] sm:$0xff]  ;;  %v2613_v19 = vld [vmem:[%s2550_s13 + $0x48] sm:$0xff]  ;;  %v2088_v20 = vld [vmem:[%s2602_s30] sm:$0xff]  }
  0x1d   : > { %1043 = vperm.xlu1 %2232, %v2570_v9   ;;  %1033 = vperm.xlu0 %2231, %v2574_v10   ;;  %v2119_v21 = vld [vmem:[%s2602_s30 + $0x8] sm:$0xff]   ;;  %v2618_v22 = vld [vmem:[%s2550_s13 + $0x40] sm:$0xff]  ;;  %v2089_v23 = vunpack.c.l.bf16 %v2088_v20  ;;  %v2090_v24 = vunpack.c.h.bf16 %v2088_v20  ;;  %v2120_v27 = vld [vmem:[%s2602_s30 + $0x10] sm:$0xff]  }
  0x1e   : > { %v2093_v25 = vunpack.c.l.bf16 %v2119_v21  ;;  %v2094_v26 = vunpack.c.h.bf16 %v2119_v21  ;;  %v2121_v28 = vld [vmem:[%s2602_s30 + $0x18] sm:$0xff]   ;;  %v2097_v30 = vunpack.c.l.bf16 %v2120_v27  ;;  %v2098_v31 = vunpack.c.h.bf16 %v2120_v27  ;;  %v2250_v34 = vld [vmem:[%s2557_s22 + $0x28] sm:$0xff]   ;;  %v2642_v43 = vld [vmem:[%s2550_s13 + $0x50] sm:$0xff] }
  0x1f   : > { %v2101_v32 = vunpack.c.l.bf16 %v2121_v28  ;;  %v2102_v33 = vunpack.c.h.bf16 %v2121_v28  ;;  %v472_v35 = vmul.f32 %v2089_v23, %v2608_v18  ;;  %v473_v36 = vmul.f32 %v2090_v24, %v2608_v18  ;;  %v2636_v39 = vld [vmem:[%s2550_s13 + $0x58] sm:$0xff]  ;;  %v2252_v44 = vld [vmem:[%s2557_s22 + $0x30] sm:$0xff]   ;;  %v2650_v49 = vld [vmem:[%s2602_s30 + $0x20] sm:$0xff]  }
  0x20   : > { %v474_v37 = vmul.f32 %v2093_v25, %v2608_v18  ;;  %v475_v38 = vmul.f32 %v2094_v26, %v2608_v18  ;;  %v476_v40 = vmul.f32 %v2097_v30, %v2608_v18  ;;  %v477_v41 = vmul.f32 %v2098_v31, %v2608_v18  ;;  %v2667_v59 = vld [vmem:[%s2550_s13 + $0x68] sm:$0xff]  ;;  %v2670_v60 = vld [vmem:[%s2550_s13 + $0x60] sm:$0xff]  ;;  %v2253_v7 = vld [vmem:[%s2557_s22 + $0x38] sm:$0xff]  }
  0x21   : > { %1053 = vperm.xlu1 %2232, %v2581_v12   ;;  %1048 = vperm.xlu0 %2231, %v2584_v13   ;;  %v478_v42 = vmul.f32 %v2101_v32, %v2608_v18  ;;  %v495_v45 = vadd.f32 %v2626_v29, %v472_v35  ;;  %v496_v46 = vadd.f32 %v2626_v29, %v473_v36  ;;  %v2105_v58 = vunpack.c.l.bf16 %v2650_v49  ;;  %v2690_v25 = vld [vmem:[%s2550_s13 + $0x78] sm:$0xff]  ;;  %v2693_v26 = vld [vmem:[%s2550_s13 + $0x70] sm:$0xff]  ;;  %s3317_s13 = scalar_lea.vmem [#allocation2], %s2041_s29  ;;  %s2355_s29 = sshll.u32 %s2419_s15, 4  ;;  %s2356_s29 = int_to_ptr.vmem [resolvable:$false] %s2355_s29 }
  0x22   : > { %v497_v47 = vadd.f32 %v2626_v29, %v474_v37  ;;  %v498_v48 = vadd.f32 %v2626_v29, %v475_v38  ;;  %v2653_v50 = vadd.f32 %v2626_v29, %v476_v40  ;;  %v2656_v51 = vadd.f32 %v2626_v29, %v477_v41  ;;  %s1951_s22 = sshll.u32 %s3317_s13, 4  ;;  %s3356_s22 = int_to_ptr.vmem [resolvable:$true] %s1951_s22 }
  0x23   : > { %2175 = vmatmul.mubr.msk.bf16.gmra.mrb[4].mxu1 %vm686_vm0, %v2248_v14  ;;  %v527_v52 = vmul.f32 0.044715, %v495_v45  ;;  %v528_v53 = vmul.f32 0.044715, %v496_v46  ;;  %v479_v54 = vmul.f32 %v2102_v33, %v2608_v18  ;;  %v2663_v57 = vadd.f32 %v2626_v29, %v478_v42  ;;  %s2351_s12 = scalar_lea.vmem %s3356_s22, 256  ;;  %p2358_p0 = scmp.lt.s32.totalorder %s3356_s22, %s2356_s29 }
  0x24   : > { %2178 = vmatprep.mubr.msk.bf16.mxu1 %vm686_vm0, %v2249_v17  ;;  %v529_v55 = vmul.f32 0.044715, %v497_v47  ;;  %v530_v56 = vmul.f32 0.044715, %v498_v48  ;;  %v2673_v61 = vmul.f32 0.5, %v495_v45  ;;  %v2675_v62 = vmul.f32 0.5, %v496_v46  ;;  %p2352_p11 = scmp.ne.s32.totalorder %s3356_s22, %s2351_s12 }
  0x25   : > { %1063 = vperm.xlu1 %2232, %v2591_v15   ;;  %1058 = vperm.xlu0 %2231, %v2594_v16   ;;  %v543_v63 = vmul.f32 %v527_v52, %v495_v45  ;;  %v544_v0 = vmul.f32 %v528_v53, %v496_v46  ;;  %v531_v3 = vmul.f32 0.044715, %v2653_v50  ;;  %v532_v4 = vmul.f32 0.044715, %v2656_v51  ;;  %v2123_v52 = vld [vmem:[%s2602_s30 + $0x28] sm:$0xff]  }
  0x26   : > { %v545_v1 = vmul.f32 %v529_v55, %v497_v47  ;;  %v546_v2 = vmul.f32 %v530_v56, %v498_v48  ;;  %v2680_v14 = vmul.f32 0.5, %v497_v47  ;;  %v2683_v17 = vadd.f32 %v2626_v29, %v479_v54  ;;  %p2353_p12 = pnand %p2352_p11, %p2520_p5 }
  0x27   : > { %v559_v8 = vmul.f32 %v543_v63, %v495_v45  ;;  %v560_v11 = vmul.f32 %v544_v0, %v496_v46  ;;  %v547_v23 = vmul.f32 %v531_v3, %v2653_v50  ;;  %v533_v24 = vmul.f32 0.044715, %v2663_v57 }
  0x28   : > { %v561_v20 = vmul.f32 %v545_v1, %v497_v47  ;;  %v562_v21 = vmul.f32 %v546_v2, %v498_v48  ;;  %v2695_v30 = vmul.f32 0.5, %v498_v48  ;;  %v548_v31 = vmul.f32 %v532_v4, %v2656_v51  ;;  %p2354_p13 = pneg %p2353_p12 }
  0x29   : > { %1073 = vperm.xlu1 %2232, %v2613_v19   ;;  %1068 = vperm.xlu0 %2231, %v2618_v22   ;;  %v575_v27 = vadd.f32 %v559_v8, %v495_v45  ;;  %v576_v28 = vadd.f32 %v560_v11, %v496_v46  ;;  %v534_v35 = vmul.f32 0.044715, %v2683_v17  ;;  %v549_v40 = vmul.f32 %v533_v24, %v2663_v57  ;;  %v2124_v8 = vld [vmem:[%s2602_s30 + $0x30] sm:$0xff]  }
  0x2a   : > { %v577_v32 = vadd.f32 %v561_v20, %v497_v47  ;;  %v578_v33 = vadd.f32 %v562_v21, %v498_v48  ;;  %v564_v38 = vmul.f32 %v548_v31, %v2656_v51  ;;  %v2106_v48 = vunpack.c.h.bf16 %v2650_v49 }
  0x2b   : > { %2179 = vmatmul.mubr.msk.bf16.gmra.mrb[8].mxu1 %vm686_vm0, %v2250_v34  ;;  %v563_v34 = vmul.f32 %v547_v23, %v2653_v50  ;;  %v591_v36 = vmul.f32 0.7978846, %v575_v27  ;;  %v592_v37 = vmul.f32 0.7978846, %v576_v28  ;;  %v550_v45 = vmul.f32 %v534_v35, %v2683_v17 }
  0x2c   : > { %2182 = vmatprep.mubr.msk.bf16.mxu1 %vm686_vm0, %v2252_v44  ;;  %v593_v41 = vmul.f32 0.7978846, %v577_v32  ;;  %v594_v42 = vmul.f32 0.7978846, %v578_v33  ;;  %v580_v46 = vadd.f32 %v564_v38, %v2656_v51  ;;  %v565_v47 = vmul.f32 %v549_v40, %v2663_v57 }
  0x2d   : > { %1083 = vperm.xlu1 %2232, %v2636_v39   ;;  %1078 = vperm.xlu0 %2231, %v2642_v43   ;;  %v579_v44 = vadd.f32 %v563_v34, %v2653_v50  ;;  %2255 = vtanh.f32 %v591_v36  ;;  %v566_v54 = vmul.f32 %v550_v45, %v2683_v17  ;;  %v480_v55 = vmul.f32 %v2105_v58, %v2608_v18 }
  0x2e   : > { %2257 = vtanh.f32 %v592_v37  ;;  %v596_v56 = vmul.f32 0.7978846, %v580_v46  ;;  %v581_v63 = vadd.f32 %v565_v47, %v2663_v57  ;;  %v481_v0 = vmul.f32 %v2106_v48, %v2608_v18 }
  0x2f   : > { %v595_v53 = vmul.f32 0.7978846, %v579_v44  ;;  %2259 = vtanh.f32 %v593_v41  ;;  %v2416_v1 = vmov 1   ;;  %v582_v49 = vadd.f32 %v566_v54, %v2683_v17 }
  0x30   : > { %2261 = vtanh.f32 %v594_v42  ;;  %v2717_v2 = vadd.f32 %v2626_v29, %v480_v55  ;;  %v2109_v3 = vunpack.c.l.bf16 %v2123_v52  ;;  %v597_v58 = vmul.f32 0.7978846, %v581_v63 }
  0x31   : > { %1093 = vperm.xlu1 %2232, %v2667_v59   ;;  %1088 = vperm.xlu0 %2231, %v2670_v60   ;;  %2263 = vtanh.f32 %v595_v53  ;;  %v2722_v4 = vadd.f32 %v2626_v29, %v481_v0  ;;  %v2726_v11 = vmul.f32 0.5, %v2653_v50  ;;  %v598_v20 = vmul.f32 0.7978846, %v582_v49  ;;  %v2737_v50 = vld [vmem:[%s2602_s30 + $0x38] sm:$0xff]   ;;  %s3354_s30 = scalar_lea.hbm %s3416_s11, %s2086_s16  ;;  %s2357_s16 = scalar_lea.vmem %s2356_s29, 512 }
  0x32   : > { %2265 = vtanh.f32 %v596_v56  ;;  %v535_v21 = vmul.f32 0.044715, %v2717_v2  ;;  %v2730_v23 = vmul.f32 0.5, %v2656_v51  ;;  %v482_v27 = vmul.f32 %v2109_v3, %v2608_v18  ;;  %p2359_p1 = scmp.lt.s32.totalorder %s2357_s16, %s2351_s12 }
  0x33   : > { %2183 = vmatmul.mubr.msk.bf16.gmra.mrb[12].mxu1 %vm686_vm0, %v2253_v7  ;;  %v2110_v7 = vunpack.c.h.bf16 %v2123_v52  ;;  %2267 = vtanh.f32 %v597_v58  ;;  %v536_v24 = vmul.f32 0.044715, %v2722_v4  ;;  %v2113_v32 = vunpack.c.l.bf16 %v2124_v8 }
  0x34   : > { %2269 = vtanh.f32 %v598_v20  ;;  %v551_v28 = vmul.f32 %v535_v21, %v2717_v2  ;;  %v517_v51 = vmul.f32 0.5, %v2663_v57  ;;  %v2744_v34 = vadd.f32 %v2626_v29, %v482_v27  ;;  %p2360_p2 = por %p2359_p1, %p2358_p0 }
  0x35   : > { %1103 = vperm.xlu1 %2232, %v2690_v25   ;;  %1098 = vperm.xlu0 %2231, %v2693_v26   ;;  %v483_v31 = vmul.f32 %v2110_v7, %v2608_v18  ;;  %v552_v33 = vmul.f32 %v536_v24, %v2722_v4  ;;  %v2114_v35 = vunpack.c.h.bf16 %v2124_v8  ;;  %v518_v36 = vmul.f32 0.5, %v2683_v17 }
  0x36   : > { %v567_v37 = vmul.f32 %v551_v28, %v2717_v2  ;;  %v484_v40 = vmul.f32 %v2113_v32, %v2608_v18  ;;  %v537_v57 = vmul.f32 0.044715, %v2744_v34  ;;  %v2117_v44 = vunpack.c.l.bf16 %v2737_v50  ;;  %p2361_p3 = pnand %p2360_p2, %p2354_p13 }
  0x37   : > { %v2749_v38 = vadd.f32 %v2626_v29, %v483_v31  ;;  %v2256_v41 = vpop.eup %2255  ;;  %v568_v42 = vmul.f32 %v552_v33, %v2722_v4  ;;  %v2118_v45 = vunpack.c.h.bf16 %v2737_v50  ;;  %v485_v52 = vmul.f32 %v2114_v35, %v2608_v18 }
  0x38   : > { %v2258_v46 = vpop.eup %2257  ;;  %v623_v47 = vadd.f32 1.0, %v2256_v41  ;;  %v583_v17 = vadd.f32 %v567_v37, %v2717_v2  ;;  %v553_v56 = vmul.f32 %v537_v57, %v2744_v34  ;;  %v2764_v63 = vadd.f32 %v2626_v29, %v484_v40 }
  0x39   : > { %2234 = vset.pattern.permute.xlu1 %v2416_v1  ;;  %2233 = vset.pattern.permute.xlu0 %v2416_v1  ;;  %v538_v48 = vmul.f32 0.044715, %v2749_v38  ;;  %v2260_v53 = vpop.eup %2259  ;;  %v624_v54 = vadd.f32 1.0, %v2258_v46  ;;  %v584_v55 = vadd.f32 %v568_v42, %v2722_v4  ;;  %v2781_v46 = vadd.f32 %v2626_v29, %v485_v52 }
  0x3a   : > { %1153 = vperm.xlu1 %2234, %v2574_v10   ;;  %1149 = vperm.xlu0 %2233, %v2563_v6   ;;  %v2262_v0 = vpop.eup %2261  ;;  %v639_v1 = vmul.f32 %v623_v47, %v2673_v61  ;;  %v625_v49 = vadd.f32 1.0, %v2260_v53  ;;  %v599_v3 = vmul.f32 0.7978846, %v583_v17  ;;  %v569_v24 = vmul.f32 %v553_v56, %v2744_v34 }
  0x3b   : > { %v554_v58 = vmul.f32 %v538_v48, %v2749_v38  ;;  %v2264_v7 = vpop.eup %2263  ;;  %v640_v8 = vmul.f32 %v624_v54, %v2675_v62  ;;  %v626_v20 = vadd.f32 1.0, %v2262_v0  ;;  %v600_v21 = vmul.f32 0.7978846, %v584_v55 }
  0x3c   : > { %v2266_v27 = vpop.eup %2265  ;;  %v641_v28 = vmul.f32 %v625_v49, %v2680_v14  ;;  %v627_v31 = vadd.f32 1.0, %v2264_v7  ;;  %2271 = vtanh.f32 %v599_v3  ;;  %v585_v14 = vadd.f32 %v569_v24, %v2744_v34 }
  0x3d   : > { %v570_v32 = vmul.f32 %v554_v58, %v2749_v38  ;;  %v2268_v50 = vpop.eup %2267  ;;  %v655_v61 = vpack.c.bf16 %v640_v8, %v639_v1  ;;  %v642_v33 = vmul.f32 %v626_v20, %v2695_v30  ;;  %v628_v35 = vadd.f32 1.0, %v2266_v27 }
  0x3e   : > { %1157 = vperm.xlu1 %2234, %v2560_v5   ;;  %1161 = vperm.xlu0 %2233, %v2570_v9   ;;  %2273 = vtanh.f32 %v600_v21  ;;  %v2270_v62 = vpop.eup %2269  ;;  %v643_v37 = vmul.f32 %v627_v31, %v2726_v11  ;;  %v629_v40 = vadd.f32 1.0, %v2268_v50  ;;  %v601_v47 = vmul.f32 0.7978846, %v585_v14 }
  0x3f   : > { %v586_v41 = vadd.f32 %v570_v32, %v2749_v38  ;;  %2150 = vmatprep.mubr.msk.bf16.mxu0 %vm686_vm0, %v655_v61  ;;  %v656_v42 = vpack.c.bf16 %v642_v33, %v641_v28  ;;  %v644_v57 = vmul.f32 %v628_v35, %v2730_v23  ;;  %v630_v30 = vadd.f32 1.0, %v2270_v62 }
  0x40   : > { %v645_v11 = vmul.f32 %v629_v40, %v517_v51  ;;  %v539_v54 = vmul.f32 0.044715, %v2764_v63  ;;  %2275 = vtanh.f32 %v601_v47  ;;  %v540_v23 = vmul.f32 0.044715, %v2781_v46 }
  0x41   : > { %v602_v17 = vmul.f32 0.7978846, %v586_v41  ;;  %2151 = vmatmul.mubr.msk.bf16.vlgmr.msra.gmra.mrb[0].mxu0 %vm686_vm0, %v656_v42  ;;  %v657_v48 = vpack.c.bf16 %v644_v57, %v643_v37  ;;  %v646_v53 = vmul.f32 %v630_v30, %v518_v36  ;;  %v486_v55 = vmul.f32 %v2117_v44, %v2608_v18 }
  0x42   : > { %1165 = vperm.xlu1 %2234, %v2584_v13   ;;  %1169 = vperm.xlu0 %2233, %v2581_v12   ;;  %v487_v52 = vmul.f32 %v2118_v45, %v2608_v18  ;;  %v555_v56 = vmul.f32 %v539_v54, %v2764_v63  ;;  %v556_v51 = vmul.f32 %v540_v23, %v2781_v46  ;;  %v519_v49 = vmul.f32 0.5, %v2717_v2 }
  0x43   : > { %2154 = vmatprep.mubr.msk.bf16.mxu0 %vm686_vm0, %v657_v48  ;;  %2277 = vtanh.f32 %v602_v17  ;;  %v2794_v36 = vadd.f32 %v2626_v29, %v486_v55  ;;  %v658_v1 = vpack.c.bf16 %v646_v53, %v645_v11  ;;  %v520_v45 = vmul.f32 0.5, %v2722_v4 }
  0x44   : > { %v2797_v0 = vadd.f32 %v2626_v29, %v487_v52  ;;  %v571_v18 = vmul.f32 %v555_v56, %v2764_v63  ;;  %v572_v3 = vmul.f32 %v556_v51, %v2781_v46  ;;  %v521_v61 = vmul.f32 0.5, %v2744_v34 }
  0x45   : > { %v541_v58 = vmul.f32 0.044715, %v2794_v36  ;;  %v522_v37 = vmul.f32 0.5, %v2749_v38  ;;  %v2417_v38 = vmov 2   ;;  %v523_v11 = vmul.f32 0.5, %v2764_v63 }
  0x46   : > { %1173 = vperm.xlu1 %2234, %v2594_v16   ;;  %1177 = vperm.xlu0 %2233, %v2591_v15   ;;  %v2272_v44 = vpop.eup %2271  ;;  %v587_v29 = vadd.f32 %v571_v18, %v2764_v63  ;;  %v542_v20 = vmul.f32 0.044715, %v2797_v0  ;;  %v588_v21 = vadd.f32 %v572_v3, %v2781_v46  ;;  %v524_v54 = vmul.f32 0.5, %v2781_v46 }
  0x47   : > { %v631_v8 = vadd.f32 1.0, %v2272_v44  ;;  %v557_v24 = vmul.f32 %v541_v58, %v2794_v36  ;;  %v526_v18 = vmul.f32 0.5, %v2797_v0 }
  0x48   : > { %v2274_v7 = vpop.eup %2273  ;;  %v603_v27 = vmul.f32 0.7978846, %v587_v29  ;;  %v558_v28 = vmul.f32 %v542_v20, %v2797_v0  ;;  %v604_v32 = vmul.f32 0.7978846, %v588_v21 }
  0x49   : > { %v632_v2 = vadd.f32 1.0, %v2274_v7  ;;  %2155 = vmatmul.mubr.msk.bf16.gmra.mrb[4].mxu0 %vm686_vm0, %v658_v1  ;;  %v647_v4 = vmul.f32 %v631_v8, %v519_v49  ;;  %v573_v50 = vmul.f32 %v557_v24, %v2794_v36  ;;  %v525_v1 = vmul.f32 0.5, %v2794_v36 }
  0x4a   : > { %1181 = vperm.xlu1 %2234, %v2618_v22   ;;  %1185 = vperm.xlu0 %2233, %v2613_v19   ;;  %2279 = vtanh.f32 %v603_v27  ;;  %v574_v33 = vmul.f32 %v558_v28, %v2797_v0  ;;  %v2276_v35 = vpop.eup %2275 }
  0x4b   : > { %v648_v31 = vmul.f32 %v632_v2, %v520_v45  ;;  %2281 = vtanh.f32 %v604_v32  ;;  %v589_v40 = vadd.f32 %v573_v50, %v2794_v36  ;;  %v633_v41 = vadd.f32 1.0, %v2276_v35 }
  0x4c   : > { %v590_v42 = vadd.f32 %v574_v33, %v2797_v0  ;;  %v2418_v0 = vmov 3  }
  0x4d   : > { %v659_v62 = vpack.c.bf16 %v648_v31, %v647_v4  ;;  %v2278_v14 = vpop.eup %2277  ;;  %v605_v34 = vmul.f32 0.7978846, %v589_v40  ;;  %v649_v30 = vmul.f32 %v633_v41, %v521_v61 }
  0x4e   : > { %1189 = vperm.xlu1 %2234, %v2642_v43   ;;  %1193 = vperm.xlu0 %2233, %v2636_v39   ;;  %v634_v57 = vadd.f32 1.0, %v2278_v14  ;;  %v606_v47 = vmul.f32 0.7978846, %v590_v42 }
  0x4f   : > { %2158 = vmatprep.mubr.msk.bf16.mxu0 %vm686_vm0, %v659_v62  ;;  %2283 = vtanh.f32 %v605_v34 }
  0x50   : > { %v650_v17 = vmul.f32 %v634_v57, %v522_v37  ;;  %2285 = vtanh.f32 %v606_v47 }
  0x52   : > { %1197 = vperm.xlu1 %2234, %v2670_v60   ;;  %1201 = vperm.xlu0 %2233, %v2667_v59   ;;  %v660_v48 = vpack.c.bf16 %v650_v17, %v649_v30 }
  0x54   : > { %2159 = vmatmul.mubr.msk.bf16.gmra.mrb[8].mxu0 %vm686_vm0, %v660_v48  ;;  %v2280_v53 = vpop.eup %2279 }
  0x55   : > { %v2282_v23 = vpop.eup %2281  ;;  %v635_v55 = vadd.f32 1.0, %v2280_v53 }
  0x56   : > { %1205 = vperm.xlu1 %2234, %v2693_v26   ;;  %1209 = vperm.xlu0 %2233, %v2690_v25   ;;  %v636_v52 = vadd.f32 1.0, %v2282_v23 }
  0x57   : > { %v651_v56 = vmul.f32 %v635_v55, %v523_v11 }
  0x58   : > { %v652_v51 = vmul.f32 %v636_v52, %v524_v54 }
  0x59   : > { %v2284_v49 = vpop.eup %2283 }
  0x5a   : > { %2235 = vset.pattern.permute.xlu1 %v2417_v38  ;;  %2236 = vset.pattern.permute.xlu0 %v2417_v38  ;;  %v2286_v63 = vpop.eup %2285  ;;  %v661_v44 = vpack.c.bf16 %v652_v51, %v651_v56  ;;  %v637_v45 = vadd.f32 1.0, %v2284_v49 }
  0x5b   : > { %1249 = vperm.xlu1 %2235, %v2563_v6   ;;  %1253 = vperm.xlu0 %2236, %v2574_v10   ;;  %v638_v46 = vadd.f32 1.0, %v2286_v63 }
  0x5c   : > { %2162 = vmatprep.mubr.msk.bf16.mxu0 %vm686_vm0, %v661_v44  ;;  %v653_v3 = vmul.f32 %v637_v45, %v525_v1 }
  0x5d   : > { %v654_v58 = vmul.f32 %v638_v46, %v526_v18 }
  0x5f   : > { %1257 = vperm.xlu1 %2235, %v2560_v5   ;;  %1265 = vperm.xlu0 %2236, %v2584_v13   ;;  %v662_v36 = vpack.c.bf16 %v654_v58, %v653_v3 }
  0x61   : > { %2163 = vmatmul.mubr.msk.bf16.gmra.mrb[12].mxu0 %vm686_vm0, %v662_v36 }
  0x63   : > { %1261 = vperm.xlu1 %2235, %v2570_v9   ;;  %1273 = vperm.xlu0 %2236, %v2594_v16  }
  0x67   : > { %1269 = vperm.xlu1 %2235, %v2581_v12   ;;  %1281 = vperm.xlu0 %2236, %v2618_v22  }
  0x6b   : > { %1277 = vperm.xlu1 %2235, %v2591_v15   ;;  %1289 = vperm.xlu0 %2236, %v2642_v43  }
  0x6f   : > { %1285 = vperm.xlu1 %2235, %v2613_v19   ;;  %1301 = vperm.xlu0 %2236, %v2667_v59  }
  0x73   : > { %1293 = vperm.xlu1 %2235, %v2636_v39   ;;  %1305 = vperm.xlu0 %2236, %v2693_v26  }
  0x77   : > { %2237 = vset.pattern.permute.xlu1 %v2418_v0  ;;  %2240 = vset.pattern.permute.xlu0 %v2418_v0 }
  0x78   : > { %1353 = vperm.xlu1 %2237, %v2574_v10   ;;  %1349 = vperm.xlu0 %2240, %v2563_v6   ;;  %v1106_v10 = vlaneseq }
  0x7c   : > { %1381 = vperm.xlu1 %2237, %v2618_v22   ;;  %1385 = vperm.xlu0 %2240, %v2613_v19   ;;  %v2864_v22 = vshrl.u32 %v1106_v10, 7 }
  0x7e   : > { %v1214_v14 = vsub.s32 1, %v2864_v22 }
  0x80   : > { %2238 = vset.pattern.permute.xlu1 %v2417_v38  ;;  %1357 = vperm.xlu0 %2240, %v2560_v5  }
  0x81   : > { %1297 = vperm.xlu1 %2238, %v2670_v60  }
  0x84   : > { %1397 = vperm.xlu0 %2240, %v2670_v60  }
  0x85   : > { %2239 = vset.pattern.permute.xlu1 %v2418_v0 }
  0x86   : > { %1389 = vperm.xlu1 %2239, %v2642_v43  }
  0x88   : > { %1401 = vperm.xlu0 %2240, %v2667_v59   ;;  %v2873_v59 = vld [vmem:[%s3412_s7] sm:$0xf] }
  0x89   : > { %v2907_v17 = vrot.slane %v2873_v59, %v1214_v14 }
  0x8a   : > { %1361 = vperm.xlu1 %2239, %v2570_v9  }
  0x8c   : > { %1405 = vperm.xlu0 %2240, %v2693_v26  }
  0x8e   : > { %1393 = vperm.xlu1 %2239, %v2636_v39  }
  0x90   : > { %1409 = vperm.xlu0 %2240, %v2690_v25  }
  0x92   : > { %1365 = vperm.xlu1 %2239, %v2584_v13   ;;  %v1108_v13 = vsub.s32 0, %v2864_v22 }
  0x96   : > { %2241 = vset.pattern.permute.xlu1 %v2417_v38 }
  0x97   : > { %1309 = vperm.xlu1 %2241, %v2690_v25   ;;  %v2879_v25 = vrot.slane %v2873_v59, %v1108_v13 }
  0x98   : > { %v2859_v5 = vpop.permute.xlu0 %1028  ;;  %v1039_v6 = vpop.permute.xlu1 %1038 }
  0x99   : > { %v1112_v30 = vmul.f32 %v2879_v25, %v1039_v6 }
  0x9b   : > { %2242 = vset.pattern.permute.xlu1 %v2418_v0 }
  0x9c   : > { %1369 = vperm.xlu1 %2242, %v2581_v12   ;;  %v1034_v19 = vpop.permute.xlu0 %1033  ;;  %v2862_v9 = vpop.permute.xlu1 %1043 }
  0x9d   : > { %v1111_v62 = vmul.f32 %v2879_v25, %v1034_v19 }
  0xa0   : > { %1373 = vperm.xlu1 %2242, %v2594_v16   ;;  %v1049_v39 = vpop.permute.xlu0 %1048  ;;  %v2867_v43 = vpop.permute.xlu1 %1053  ;;  %v2884_v16 = vld [vmem:[%s3413_s8] ss:$0 sm:$0xff] }
  0xa1   : > { %v1133_v47 = vadd.f32 %v2884_v16, %v1111_v62  ;;  %v1134_v53 = vadd.f32 %v2884_v16, %v1112_v30  ;;  %v1114_v54 = vmul.f32 %v2879_v25, %v1049_v39  ;;  %v1314_v30 = vsub.s32 2, %v2864_v22 }
  0xa3   : > { %v1136_v51 = vadd.f32 %v2884_v16, %v1114_v54 }
  0xa4   : > { %1377 = vperm.xlu1 %2242, %v2591_v15   ;;  %v1059_v12 = vpop.permute.xlu0 %1058  ;;  %v2876_v60 = vpop.permute.xlu1 %1063 }
  0xa5   : > { %v1116_v1 = vmul.f32 %v2879_v25, %v1059_v12 }
  0xa7   : > { %v1138_v45 = vadd.f32 %v2884_v16, %v1116_v1 }
  0xa8   : > { %v1069_v26 = vpop.permute.xlu0 %1068  ;;  %v1074_v7 = vpop.permute.xlu1 %1073 }
  0xa9   : > { %v1118_v8 = vmul.f32 %v2879_v25, %v1069_v26  ;;  %v1119_v29 = vmul.f32 %v2879_v25, %v1074_v7 }
  0xab   : > { %v1140_v20 = vadd.f32 %v2884_v16, %v1118_v8  ;;  %v1141_v15 = vadd.f32 %v2884_v16, %v1119_v29 }
  0xac   : > { %v1079_v2 = vpop.permute.xlu0 %1078  ;;  %v1084_v21 = vpop.permute.xlu1 %1083 }
  0xad   : > { %v1120_v24 = vmul.f32 %v2879_v25, %v1079_v2  ;;  %v1121_v4 = vmul.f32 %v2879_v25, %v1084_v21 }
  0xaf   : > { %v1142_v27 = vadd.f32 %v2884_v16, %v1120_v24  ;;  %v1143_v28 = vadd.f32 %v2884_v16, %v1121_v4 }
  0xb0   : > { %v1089_v31 = vpop.permute.xlu0 %1088  ;;  %v1094_v32 = vpop.permute.xlu1 %1093 }
  0xb1   : > { %v1122_v50 = vmul.f32 %v2879_v25, %v1089_v31  ;;  %v1123_v61 = vmul.f32 %v2879_v25, %v1094_v32 }
  0xb3   : > { %v1144_v33 = vadd.f32 %v2884_v16, %v1122_v50  ;;  %v1145_v35 = vadd.f32 %v2884_v16, %v1123_v61 }
  0xb4   : > { %v1099_v37 = vpop.permute.xlu0 %1098  ;;  %v1104_v40 = vpop.permute.xlu1 %1103 }
  0xb5   : > { %v1124_v41 = vmul.f32 %v2879_v25, %v1099_v37  ;;  %v1125_v42 = vmul.f32 %v2879_v25, %v1104_v40 }
  0xb7   : > { %v1146_v57 = vadd.f32 %v2884_v16, %v1124_v41  ;;  %v1147_v34 = vadd.f32 %v2884_v16, %v1125_v42 }
  0xb9   : > { %v2909_v38 = vpop.permute.xlu0 %1149  ;;  %v1154_v48 = vpop.permute.xlu1 %1153 }
  0xba   : > { %v1217_v11 = vmul.f32 %v2907_v17, %v1154_v48 }
  0xbc   : > { %v2914_v23 = vadd.f32 %v1217_v11, %v1133_v47 }
  0xbd   : > { %v2916_v55 = vpop.permute.xlu0 %1161  ;;  %v1158_v52 = vpop.permute.xlu1 %1157 }
  0xbe   : > { %v1218_v56 = vmul.f32 %v2907_v17, %v1158_v52 }
  0xc0   : > { %v2921_v49 = vadd.f32 %v1218_v56, %v1134_v53  ;;  %v1110_v56 = vmul.f32 %v2879_v25, %v2859_v5 }
  0xc1   : > { %v2923_v18 = vpop.permute.xlu0 %1169  ;;  %v1166_v63 = vpop.permute.xlu1 %1165 }
  0xc2   : > { %v1220_v44 = vmul.f32 %v2907_v17, %v1166_v63 }
  0xc4   : > { %v2927_v46 = vadd.f32 %v1220_v44, %v1136_v51 }
  0xc5   : > { %v2929_v3 = vpop.permute.xlu0 %1177  ;;  %v1174_v58 = vpop.permute.xlu1 %1173 }
  0xc6   : > { %v1222_v36 = vmul.f32 %v2907_v17, %v1174_v58 }
  0xc8   : > { %v2932_v0 = vadd.f32 %v1222_v36, %v1138_v45  ;;  %v1414_v36 = vsub.s32 3, %v2864_v22 }
  0xc9   : > { %v1182_v6 = vpop.permute.xlu1 %1181  ;;  %v1186_v10 = vpop.permute.xlu0 %1185 }
  0xca   : > { %v1224_v19 = vmul.f32 %v2907_v17, %v1182_v6  ;;  %v1225_v39 = vmul.f32 %v2907_v17, %v1186_v10  ;;  %v1132_v10 = vadd.f32 %v2884_v16, %v1110_v56 }
  0xcc   : > { %v1240_v13 = vadd.f32 %v1224_v19, %v1140_v20  ;;  %v1241_v12 = vadd.f32 %v1225_v39, %v1141_v15  ;;  %v1216_v19 = vmul.f32 %v2907_v17, %v2909_v38 }
  0xcd   : > { %v1190_v26 = vpop.permute.xlu1 %1189  ;;  %v1194_v7 = vpop.permute.xlu0 %1193 }
  0xce   : > { %v1226_v8 = vmul.f32 %v2907_v17, %v1190_v26  ;;  %v1227_v29 = vmul.f32 %v2907_v17, %v1194_v7 }
  0xd0   : > { %v1242_v2 = vadd.f32 %v1226_v8, %v1142_v27  ;;  %v1243_v21 = vadd.f32 %v1227_v29, %v1143_v28 }
  0xd1   : > { %v1198_v24 = vpop.permute.xlu1 %1197  ;;  %v1202_v4 = vpop.permute.xlu0 %1201 }
  0xd2   : > { %v1228_v31 = vmul.f32 %v2907_v17, %v1198_v24  ;;  %v1229_v32 = vmul.f32 %v2907_v17, %v1202_v4  ;;  %v2980_v24 = vrot.slane %v2873_v59, %v1414_v36  ;;  %v1232_v4 = vadd.f32 %v1216_v19, %v1132_v10 }
  0xd3   : > { %v1113_v36 = vmul.f32 %v2879_v25, %v2862_v9 }
  0xd4   : > { %v2940_v50 = vadd.f32 %v1228_v31, %v1144_v33  ;;  %v1245_v61 = vadd.f32 %v1229_v32, %v1145_v35  ;;  %v2954_v35 = vrot.slane %v2873_v59, %v1314_v30  ;;  %v2988_v31 = vld [vmem:[%s3411_s6] ss:$0 sm:$0xff] }
  0xd5   : > { %v1206_v62 = vpop.permute.xlu1 %1205  ;;  %v1210_v20 = vpop.permute.xlu0 %1209 }
  0xd6   : > { %v1230_v15 = vmul.f32 %v2907_v17, %v1206_v62  ;;  %v1231_v37 = vmul.f32 %v2907_v17, %v1210_v20 }
  0xd8   : > { %v1246_v40 = vadd.f32 %v1230_v15, %v1146_v57  ;;  %v2944_v14 = vadd.f32 %v1231_v37, %v1147_v34 }
  0xda   : > { %v1250_v27 = vpop.permute.xlu1 %1249  ;;  %v1254_v28 = vpop.permute.xlu0 %1253 }
  0xdb   : > { %v1316_v38 = vmul.f32 %v2954_v35, %v1250_v27 }
  0xde   : > { %v1258_v41 = vpop.permute.xlu1 %1257  ;;  %v2946_v42 = vpop.permute.xlu0 %1265 }
  0xe2   : > { %v2949_v47 = vpop.permute.xlu1 %1261  ;;  %v2951_v33 = vpop.permute.xlu0 %1273 }
  0xe6   : > { %v2956_v48 = vpop.permute.xlu1 %1269  ;;  %v1282_v11 = vpop.permute.xlu0 %1281 }
  0xe7   : > { %v1324_v57 = vmul.f32 %v2954_v35, %v1282_v11 }
  0xe9   : > { %v1340_v34 = vadd.f32 %v1324_v57, %v1240_v13 }
  0xea   : > { %v2959_v53 = vpop.permute.xlu1 %1277  ;;  %v1290_v54 = vpop.permute.xlu0 %1289 }
  0xeb   : > { %v1326_v52 = vmul.f32 %v2954_v35, %v1290_v54 }
  0xed   : > { %v2964_v51 = vadd.f32 %v1326_v52, %v1242_v2  ;;  %v1317_v2 = vmul.f32 %v2954_v35, %v1254_v28 }
  0xee   : > { %v1286_v1 = vpop.permute.xlu1 %1285  ;;  %v1302_v44 = vpop.permute.xlu0 %1301 }
  0xef   : > { %v1325_v63 = vmul.f32 %v2954_v35, %v1286_v1  ;;  %v2172_v45 = vpop.f32.mrb[0].mxu1  ;;  %v1329_v58 = vmul.f32 %v2954_v35, %v1302_v44  ;;  %v1333_v20 = vadd.f32 %v1317_v2, %v2914_v23 }
  0xf0   : > { %v945_v6 = vpop.f32.mrb[1].mxu1  ;;  %v954_v2 = vadd.f32 %v2172_v45, %v2988_v31 }
  0xf1   : > { %v1341_v39 = vadd.f32 %v1325_v63, %v1241_v12  ;;  %v2972_v13 = vpop.f32.mrb[2].mxu1  ;;  %v2974_v5 = vadd.f32 %v1329_v58, %v1245_v61  ;;  %v946_v30 = vadd.f32 %v2988_v31, %v945_v6  ;;  %v1318_v63 = vmul.f32 %v2954_v35, %v1258_v41 }
  0xf2   : > { %v1294_v26 = vpop.permute.xlu1 %1293  ;;  %v948_v7 = vpop.f32.mrb[3].mxu1 }
  0xf3   : > { %v1327_v8 = vmul.f32 %v2954_v35, %v1294_v26  ;;  %v1306_v29 = vpop.permute.xlu0 %1305  ;;  %v949_v37 = vadd.f32 %v2988_v31, %v948_v7 }
  0xf4   : > { %v1330_v22 = vmul.f32 %v2954_v35, %v1306_v29  ;;  %v1334_v29 = vadd.f32 %v1318_v63, %v2921_v49 }
  0xf5   : > { %v2983_v12 = vadd.f32 %v1327_v8, %v1243_v21  ;;  %v1332_v21 = vadd.f32 %v1316_v38, %v1232_v4  ;;  %v1135_v38 = vadd.f32 %v2884_v16, %v1113_v36 }
  0xf6   : > { %v2990_v32 = vadd.f32 %v1330_v22, %v1246_v40  ;;  %v2992_v62 = vpop.f32.mrb[4].mxu1 }
  0xf7   : > { %v1354_v61 = vpop.permute.xlu1 %1353  ;;  %v1350_v15 = vpop.permute.xlu0 %1349 }
  0xf8   : > { %v1417_v59 = vmul.f32 %v2980_v24, %v1354_v61  ;;  %v2997_v27 = vpop.f32.mrb[5].mxu1  ;;  %v1416_v28 = vmul.f32 %v2980_v24, %v1350_v15 }
  0xf9   : > { %v3001_v11 = vpop.f32.mrb[6].mxu1 }
  0xfa   : > { %v1433_v40 = vadd.f32 %v1417_v59, %v1333_v20  ;;  %v3003_v57 = vpop.f32.mrb[7].mxu1  ;;  %v1432_v54 = vadd.f32 %v1416_v28, %v1332_v21  ;;  %v1319_v21 = vmul.f32 %v2954_v35, %v2949_v47 }
  0xfb   : > { %v1382_v52 = vpop.permute.xlu1 %1381  ;;  %v1386_v1 = vpop.permute.xlu0 %1385 }
  0xfc   : > { %v3005_v23 = vadd.f32 %v1433_v40, %v949_v37  ;;  %v1424_v56 = vmul.f32 %v2980_v24, %v1382_v52  ;;  %v3009_v44 = vadd.f32 %v1432_v54, %v946_v30  ;;  %v1425_v58 = vmul.f32 %v2980_v24, %v1386_v1 }
  0xfe   : > { %v1440_v6 = vadd.f32 %v1424_v56, %v1340_v34  ;;  %v1441_v10 = vadd.f32 %v1425_v58, %v1341_v39  ;;  %v2180_v19 = vpop.f32.mrb[8].mxu1  ;;  %v1219_v39 = vmul.f32 %v2907_v17, %v2916_v55 }
  0xff   : > { %v1358_v26 = vpop.permute.xlu0 %1357  ;;  %v986_v7 = vadd.f32 %v2180_v19, %v2988_v31  ;;  %v977_v4 = vpop.f32.mrb[9].mxu1 }
 0x100   : > { %v1298_v8 = vpop.permute.xlu1 %1297  ;;  %v1418_v41 = vmul.f32 %v2980_v24, %v1358_v26  ;;  %v978_v9 = vadd.f32 %v2988_v31, %v977_v4  ;;  %v2181_v34 = vpop.f32.mrb[10].mxu1  ;;  %v1235_v54 = vadd.f32 %v1219_v39, %v1135_v38 }
 0x101   : > { %v1328_v22 = vmul.f32 %v2954_v35, %v1298_v8  ;;  %v989_v49 = vadd.f32 %v2181_v34, %v2988_v31  ;;  %v980_v59 = vpop.f32.mrb[11].mxu1 }
 0x102   : > { %v1434_v61 = vadd.f32 %v1418_v41, %v1334_v29  ;;  %v3025_v45 = vadd.f32 %v1440_v6, %v978_v9  ;;  %v981_v15 = vadd.f32 %v2988_v31, %v980_v59  ;;  %v1335_v6 = vadd.f32 %v1319_v21, %v1235_v54 }
 0x103   : > { %v1344_v20 = vadd.f32 %v1328_v22, %v2940_v50  ;;  %v1398_v37 = vpop.permute.xlu0 %1397 }
 0x104   : > { %v3030_v28 = vadd.f32 %v1434_v61, %v954_v2  ;;  %v1428_v30 = vmul.f32 %v2980_v24, %v1398_v37  ;;  %v3033_v55 = vadd.f32 %v1441_v10, %v981_v15  ;;  %v957_v10 = vadd.f32 %v2972_v13, %v2988_v31 }
 0x105   : > { %v1390_v40 = vpop.permute.xlu1 %1389  ;;  %v1115_v37 = vmul.f32 %v2879_v25, %v2867_v43 }
 0x106   : > { %v1426_v50 = vmul.f32 %v2980_v24, %v1390_v40  ;;  %v1444_v52 = vadd.f32 %v1428_v30, %v1344_v20  ;;  %v2184_v56 = vpop.f32.mrb[12].mxu1 }
 0x107   : > { %v1402_v63 = vpop.permute.xlu0 %1401  ;;  %v1002_v58 = vadd.f32 %v2184_v56, %v2988_v31  ;;  %v993_v36 = vpop.f32.mrb[13].mxu1 }
 0x108   : > { %v1442_v1 = vadd.f32 %v1426_v50, %v2964_v51  ;;  %v1429_v47 = vmul.f32 %v2980_v24, %v1402_v63  ;;  %v994_v19 = vadd.f32 %v2988_v31, %v993_v36  ;;  %v2185_v8 = vpop.f32.mrb[14].mxu1  ;;  %v962_v50 = vadd.f32 %v2988_v31, %v2997_v27 }
 0x109   : > { %v1362_v26 = vpop.permute.xlu1 %1361  ;;  %v1005_v51 = vadd.f32 %v2185_v8, %v2988_v31  ;;  %v996_v41 = vpop.f32.mrb[15].mxu1  ;;  %v1321_v27 = vmul.f32 %v2954_v35, %v2956_v48  ;;  %v965_v48 = vadd.f32 %v2988_v31, %v3003_v57  ;;  %v970_v57 = vadd.f32 %v2992_v62, %v2988_v31 }
 0x10a   : > { %v3042_v29 = vadd.f32 %v1442_v1, %v986_v7  ;;  %v1419_v2 = vmul.f32 %v2980_v24, %v1362_v26  ;;  %v1445_v22 = vadd.f32 %v1429_v47, %v2974_v5  ;;  %v3047_v4 = vadd.f32 %v1444_v52, %v994_v19 }
 0x10b   : > { %v997_v38 = vadd.f32 %v2988_v31, %v996_v41  ;;  %v1406_v34 = vpop.permute.xlu0 %1405  ;;  %v1320_v7 = vmul.f32 %v2954_v35, %v2946_v42  ;;  %v1223_v41 = vmul.f32 %v2907_v17, %v2929_v3  ;;  %v1323_v3 = vmul.f32 %v2954_v35, %v2959_v53 }
 0x10c   : > { %v1435_v9 = vadd.f32 %v1419_v2, %v1335_v6  ;;  %v1430_v61 = vmul.f32 %v2980_v24, %v1406_v34  ;;  %v1322_v6 = vmul.f32 %v2954_v35, %v2951_v33 }
 0x10d   : > { %v3050_v39 = vadd.f32 %v1445_v22, %v997_v38  ;;  %v1394_v13 = vpop.permute.xlu1 %1393  ;;  %v1336_v40 = vadd.f32 %v1320_v7, %v2927_v46 }
 0x10e   : > { %v3055_v20 = vadd.f32 %v1435_v9, %v957_v10  ;;  %v1427_v59 = vmul.f32 %v2980_v24, %v1394_v13  ;;  %v1446_v5 = vadd.f32 %v1430_v61, %v2990_v32  ;;  %v1137_v32 = vadd.f32 %v2884_v16, %v1115_v37 }
 0x10f   : > { %v1410_v56 = vpop.permute.xlu0 %1409  ;;  %v1338_v22 = vadd.f32 %v1322_v6, %v2932_v0 }
 0x110   : > { %v1443_v15 = vadd.f32 %v1427_v59, %v2983_v12  ;;  %v3062_v21 = vadd.f32 %v1446_v5, %v1002_v58  ;;  %v1221_v12 = vmul.f32 %v2907_v17, %v2923_v18  ;;  %v1431_v46 = vmul.f32 %v2980_v24, %v1410_v56  ;;  %v3087_v18 = vld [vmem:[%s3409_s4] ss:$0 sm:$0xff] }
 0x111   : > { %v1366_v30 = vpop.permute.xlu1 %1365  ;;  %v1117_v58 = vmul.f32 %v2879_v25, %v2876_v60 }
 0x112   : > { %v3067_v42 = vadd.f32 %v1443_v15, %v989_v49  ;;  %v1420_v54 = vmul.f32 %v2980_v24, %v1366_v30  ;;  %v1237_v36 = vadd.f32 %v1221_v12, %v1137_v32 }
 0x113   : > { %v1139_v60 = vadd.f32 %v2884_v16, %v1117_v58 }
 0x114   : > { %v1436_v52 = vadd.f32 %v1420_v54, %v1336_v40  ;;  %v1337_v26 = vadd.f32 %v1321_v27, %v1237_v36  ;;  %v2152_v8 = vpop.f32.mrb[0].mxu0 }
 0x115   : > { %v3096_v25 = vadd.f32 %v2152_v8, %v3087_v18  ;;  %v745_v33 = vpop.f32.mrb[1].mxu0  ;;  %v1239_v37 = vadd.f32 %v1223_v41, %v1139_v60 }
 0x116   : > { %v3073_v43 = vadd.f32 %v1436_v52, %v962_v50  ;;  %v1310_v1 = vpop.permute.xlu1 %1309  ;;  %v3104_v38 = vadd.f32 %v3087_v18, %v745_v33 }
 0x117   : > { %v1331_v63 = vmul.f32 %v2954_v35, %v1310_v1  ;;  %v1478_v16 = vsel %vm686_vm0, %v3096_v25, -inf  ;;  %v1339_v32 = vadd.f32 %v1323_v3, %v1239_v37 }
 0x118   : > { %v1479_v0 = vrot.slane %v1478_v16, 4  ;;  %v1464_v62 = vsel %vm686_vm0, %v3104_v38, -inf }
 0x119   : > { %v1347_v49 = vadd.f32 %v1331_v63, %v2944_v14  ;;  %v1465_v59 = vrot.slane %v1464_v62, 4 }
 0x11a   : > { %v1480_v30 = vmax.f32 %v1478_v16, %v1479_v0 }
 0x11b   : > { %v1447_v47 = vadd.f32 %v1431_v46, %v1347_v49  ;;  %v1370_v19 = vpop.permute.xlu1 %1369  ;;  %v1466_v35 = vmax.f32 %v1464_v62, %v1465_v59  ;;  %v3130_v46 = vadd.f32 %v3001_v11, %v2988_v31 }
 0x11c   : > { %v1421_v14 = vmul.f32 %v2980_v24, %v1370_v19  ;;  %v1481_v12 = vrot.slane %v1480_v30, 2 }
 0x11d   : > { %v3092_v10 = vadd.f32 %v1447_v47, %v1005_v51  ;;  %v2153_v51 = vpop.f32.mrb[2].mxu0  ;;  %v1467_v27 = vrot.slane %v1466_v35, 2 }
 0x11e   : > { %v1437_v2 = vadd.f32 %v1421_v14, %v1337_v26  ;;  %v3109_v34 = vadd.f32 %v2153_v51, %v3087_v18  ;;  %v748_v61 = vpop.f32.mrb[3].mxu0  ;;  %v1482_v6 = vmax.f32 %v1480_v30, %v1481_v12 }
 0x11f   : > { %v1374_v9 = vpop.permute.xlu1 %1373  ;;  %v3119_v7 = vadd.f32 %v3087_v18, %v748_v61  ;;  %v2156_v63 = vpop.f32.mrb[4].mxu0 }
 0x120   : > { %v3111_v13 = vadd.f32 %v1437_v2, %v965_v48  ;;  %v1422_v17 = vmul.f32 %v2980_v24, %v1374_v9  ;;  %v1485_v5 = vsel %vm686_vm0, %v3109_v34, -inf  ;;  %v3133_v58 = vadd.f32 %v2156_v63, %v3087_v18  ;;  %v761_v36 = vpop.f32.mrb[5].mxu0 }
 0x121   : > { %v1486_v40 = vrot.slane %v1485_v5, 4  ;;  %v1471_v50 = vsel %vm686_vm0, %v3119_v7, -inf  ;;  %v3136_v19 = vadd.f32 %v3087_v18, %v761_v36  ;;  %v1468_v48 = vmax.f32 %v1466_v35, %v1467_v27 }
 0x122   : > { %v1438_v15 = vadd.f32 %v1422_v17, %v1338_v22  ;;  %v1472_v53 = vrot.slane %v1471_v50, 4  ;;  %v1506_v31 = vsel %vm686_vm0, %v3133_v58, -inf  ;;  %v1483_v60 = vrot.slane %v1482_v6, 1 }
 0x123   : > { %v1378_v54 = vpop.permute.xlu1 %1377  ;;  %v1487_v1 = vmax.f32 %v1485_v5, %v1486_v40  ;;  %v1507_v2 = vrot.slane %v1506_v31, 4  ;;  %v1492_v41 = vsel %vm686_vm0, %v3136_v19, -inf  ;;  %v1469_v22 = vrot.slane %v1468_v48, 1 }
 0x124   : > { %v3125_v52 = vadd.f32 %v1438_v15, %v970_v57  ;;  %v1423_v56 = vmul.f32 %v2980_v24, %v1378_v54  ;;  %v1473_v49 = vmax.f32 %v1471_v50, %v1472_v53  ;;  %v2157_v24 = vpop.f32.mrb[6].mxu0  ;;  %v1493_v51 = vrot.slane %v1492_v41, 4 }
 0x125   : > { %v1488_v47 = vrot.slane %v1487_v1, 2  ;;  %v3143_v11 = vadd.f32 %v2157_v24, %v3087_v18  ;;  %v764_v8 = vpop.f32.mrb[7].mxu0  ;;  %v1484_v16 = vmax.f32 %v1482_v6, %v1483_v60  ;;  %v1508_v17 = vmax.f32 %v1506_v31, %v1507_v2 }
 0x126   : > { %v3138_v26 = vadd.f32 %v1423_v56, %v1339_v32  ;;  %v1474_v14 = vrot.slane %v1473_v49, 2  ;;  %v1470_v0 = vmax.f32 %v1468_v48, %v1469_v22  ;;  %v1494_v59 = vmax.f32 %v1492_v41, %v1493_v51 }
 0x127   : > { %v1489_v33 = vmax.f32 %v1487_v1, %v1488_v47  ;;  %v1513_v9 = vsel %vm686_vm0, %v3143_v11, -inf  ;;  %v3150_v5 = vadd.f32 %v3087_v18, %v764_v8  ;;  %v1578_v15 = vsub.f32 %v3096_v25, %v1484_v16  ;;  %v2160_v36 = vpop.f32.mrb[8].mxu0 }
 0x128   : > { %v1475_v57 = vmax.f32 %v1473_v49, %v1474_v14  ;;  %v1514_v3 = vrot.slane %v1513_v9, 4  ;;  %v1509_v30 = vrot.slane %v1508_v17, 2  ;;  %v1576_v50 = vsub.f32 %v3104_v38, %v1470_v0  ;;  %v777_v24 = vpop.f32.mrb[9].mxu0 }
 0x129   : > { %v1490_v61 = vrot.slane %v1489_v33, 1  ;;  %v1495_v35 = vrot.slane %v1494_v59, 2  ;;  %v1499_v53 = vsel %vm686_vm0, %v3150_v5, -inf  ;;  %v1596_v56 = vmul.f32 1.442695, %v1578_v15  ;;  %v2161_v8 = vpop.f32.mrb[10].mxu0 }
 0x12a   : > { %v1476_v62 = vrot.slane %v1475_v57, 1  ;;  %v1515_v40 = vmax.f32 %v1513_v9, %v1514_v3  ;;  %v1510_v12 = vmax.f32 %v1508_v17, %v1509_v30  ;;  %v1592_v63 = vmul.f32 1.442695, %v1576_v50 }
 0x12b   : > { %v1491_v37 = vmax.f32 %v1489_v33, %v1490_v61  ;;  %v1496_v49 = vmax.f32 %v1494_v59, %v1495_v35  ;;  %v1500_v25 = vrot.slane %v1499_v53, 4  ;;  %2287 = vpow2.f32 %v1596_v56 }
 0x12c   : > { %v1477_v54 = vmax.f32 %v1475_v57, %v1476_v62  ;;  %v1516_v1 = vrot.slane %v1515_v40, 2  ;;  %v1511_v47 = vrot.slane %v1510_v12, 1  ;;  %2289 = vpow2.f32 %v1592_v63 }
 0x12d   : > { %v1579_v32 = vsub.f32 %v3109_v34, %v1491_v37  ;;  %v1497_v14 = vrot.slane %v1496_v49, 1  ;;  %v1501_v31 = vmax.f32 %v1499_v53, %v1500_v25  ;;  %v3159_v33 = vadd.f32 %v2160_v36, %v3087_v18 }
 0x12e   : > { %v1577_v27 = vsub.f32 %v3119_v7, %v1477_v54  ;;  %v1517_v38 = vmax.f32 %v1515_v40, %v1516_v1  ;;  %v1512_v34 = vmax.f32 %v1510_v12, %v1511_v47  ;;  %v780_v7 = vpop.f32.mrb[11].mxu0  ;;  %v3162_v22 = vadd.f32 %v3087_v18, %v777_v24 }
 0x12f   : > { %v1598_v6 = vmul.f32 1.442695, %v1579_v32  ;;  %v1498_v2 = vmax.f32 %v1496_v49, %v1497_v14  ;;  %v1502_v41 = vrot.slane %v1501_v31, 2  ;;  %v1534_v9 = vsel %vm686_vm0, %v3159_v33, -inf }
 0x130   : > { %v1594_v48 = vmul.f32 1.442695, %v1577_v27  ;;  %v1518_v60 = vrot.slane %v1517_v38, 1  ;;  %v1582_v57 = vsub.f32 %v3133_v58, %v1512_v34  ;;  %v3168_v16 = vadd.f32 %v2161_v8, %v3087_v18 }
 0x131   : > { %2291 = vpow2.f32 %v1598_v6  ;;  %v1580_v61 = vsub.f32 %v3136_v19, %v1498_v2  ;;  %v1503_v17 = vmax.f32 %v1501_v31, %v1502_v41  ;;  %v1535_v3 = vrot.slane %v1534_v9, 4 }
 0x132   : > { %2293 = vpow2.f32 %v1594_v48  ;;  %v1519_v51 = vmax.f32 %v1517_v38, %v1518_v60  ;;  %v1520_v0 = vsel %vm686_vm0, %v3162_v22, -inf  ;;  %v1604_v62 = vmul.f32 1.442695, %v1582_v57 }
 0x133   : > { %v1521_v15 = vrot.slane %v1520_v0, 4  ;;  %v1541_v58 = vsel %vm686_vm0, %v3168_v16, -inf  ;;  %v1600_v37 = vmul.f32 1.442695, %v1580_v61  ;;  %v1504_v30 = vrot.slane %v1503_v17, 1 }
 0x134   : > { %v1583_v59 = vsub.f32 %v3143_v11, %v1519_v51  ;;  %v1536_v40 = vmax.f32 %v1534_v9, %v1535_v3  ;;  %v1542_v50 = vrot.slane %v1541_v58, 4  ;;  %2295 = vpow2.f32 %v1604_v62  ;;  %v3200_v60 = vpop.f32.mrb[12].mxu0 }
 0x135   : > { %v1522_v35 = vmax.f32 %v1520_v0, %v1521_v15  ;;  %v3177_v19 = vadd.f32 %v3087_v18, %v780_v7  ;;  %2297 = vpow2.f32 %v1600_v37  ;;  %v1505_v53 = vmax.f32 %v1503_v17, %v1504_v30  ;;  %v3179_v12 = vpop.eup %2287  ;;  %v3204_v57 = vpop.f32.mrb[13].mxu0 }
 0x136   : > { %v1606_v54 = vmul.f32 1.442695, %v1583_v59  ;;  %v1537_v56 = vrot.slane %v1536_v40, 2  ;;  %v1543_v32 = vmax.f32 %v1541_v58, %v1542_v50  ;;  %v3185_v63 = vadd.f32 %v3138_v26, %v3130_v46  ;;  %v3187_v27 = vpop.eup %2289  ;;  %v3206_v17 = vpop.f32.mrb[14].mxu0 }
 0x137   : > { %v1523_v11 = vrot.slane %v1522_v35, 2  ;;  %v1527_v1 = vsel %vm686_vm0, %v3177_v19, -inf  ;;  %v1638_v49 = vsel %vm686_vm0, %v3179_v12, 0.0  ;;  %v1581_v25 = vsub.f32 %v3150_v5, %v1505_v53  ;;  %v3208_v15 = vpop.f32.mrb[15].mxu0 }
 0x138   : > { %2299 = vpow2.f32 %v1606_v54  ;;  %v1538_v36 = vmax.f32 %v1536_v40, %v1537_v56  ;;  %v1544_v6 = vrot.slane %v1543_v32, 2  ;;  %v1639_v38 = vrot.slane %v1638_v49, 4 }
 0x139   : > { %v1624_v24 = vsel %vm686_vm0, %v3187_v27, 0.0  ;;  %v1524_v48 = vmax.f32 %v1522_v35, %v1523_v11  ;;  %v1528_v14 = vrot.slane %v1527_v1, 4  ;;  %v1602_v8 = vmul.f32 1.442695, %v1581_v25 }
 0x13a   : > { %v1625_v46 = vrot.slane %v1624_v24, 4  ;;  %v1539_v34 = vrot.slane %v1538_v36, 1  ;;  %v1640_v5 = vadd.f32 %v1639_v38, %v1638_v49  ;;  %v1545_v59 = vmax.f32 %v1543_v32, %v1544_v6 }
 0x13b   : > { %v3192_v47 = vpop.eup %2291  ;;  %v1525_v41 = vrot.slane %v1524_v48, 1  ;;  %2301 = vpow2.f32 %v1602_v8  ;;  %v1529_v40 = vmax.f32 %v1527_v1, %v1528_v14 }
 0x13c   : > { %v3196_v31 = vpop.eup %2293  ;;  %v1645_v26 = vsel %vm686_vm0, %v3192_v47, 0.0  ;;  %v1626_v51 = vadd.f32 %v1625_v46, %v1624_v24  ;;  %v1540_v61 = vmax.f32 %v1538_v36, %v1539_v34  ;;  %v1641_v3 = vrot.slane %v1640_v5, 2 }
 0x13d   : > { %v1646_v7 = vrot.slane %v1645_v26, 4  ;;  %v1631_v2 = vsel %vm686_vm0, %v3196_v31, 0.0  ;;  %v1526_v62 = vmax.f32 %v1524_v48, %v1525_v41  ;;  %v1546_v56 = vrot.slane %v1545_v59, 1 }
 0x13e   : > { %v1632_v9 = vrot.slane %v1631_v2, 4  ;;  %v1627_v58 = vrot.slane %v1626_v51, 2  ;;  %v1586_v30 = vsub.f32 %v3159_v33, %v1540_v61  ;;  %v3211_v50 = vpop.eup %2295  ;;  %v1642_v54 = vadd.f32 %v1641_v3, %v1640_v5 }
 0x13f   : > { %v1647_v0 = vadd.f32 %v1646_v7, %v1645_v26  ;;  %v1584_v53 = vsub.f32 %v3162_v22, %v1526_v62  ;;  %v3214_v11 = vpop.eup %2297  ;;  %v1666_v32 = vsel %vm686_vm0, %v3211_v50, 0.0 }
 0x140   : > { %v1633_v37 = vadd.f32 %v1632_v9, %v1631_v2  ;;  %v1628_v49 = vadd.f32 %v1627_v58, %v1626_v51  ;;  %v1612_v36 = vmul.f32 1.442695, %v1586_v30  ;;  %v1643_v38 = vrot.slane %v1642_v54, 1 }
 0x141   : > { %v1648_v35 = vrot.slane %v1647_v0, 2  ;;  %v1667_v1 = vrot.slane %v1666_v32, 4  ;;  %v1652_v24 = vsel %vm686_vm0, %v3214_v11, 0.0  ;;  %v1608_v58 = vmul.f32 1.442695, %v1584_v53 }
 0x142   : > { %v1634_v25 = vrot.slane %v1633_v37, 2  ;;  %v3218_v6 = vpop.eup %2299  ;;  %v1629_v48 = vrot.slane %v1628_v49, 1  ;;  %v1653_v22 = vrot.slane %v1652_v24, 4  ;;  %v1644_v26 = vadd.f32 %v1643_v38, %v1642_v54 }
 0x143   : > { %v1649_v33 = vadd.f32 %v1648_v35, %v1647_v0  ;;  %v1673_v46 = vsel %vm686_vm0, %v3218_v6, 0.0  ;;  %v1668_v34 = vadd.f32 %v1667_v1, %v1666_v32  ;;  %2303 = vpow2.f32 %v1612_v36 }
 0x144   : > { %v1635_v14 = vadd.f32 %v1634_v25, %v1633_v37  ;;  %v1674_v5 = vrot.slane %v1673_v46, 4  ;;  %v1630_v7 = vadd.f32 %v1629_v48, %v1628_v49  ;;  %v1654_v41 = vadd.f32 %v1653_v22, %v1652_v24 }
 0x145   : > { %v1650_v8 = vrot.slane %v1649_v33, 1  ;;  %2305 = vrcp.f32 %v1644_v26  ;;  %v1669_v9 = vrot.slane %v1668_v34, 2  ;;  %v3224_v3 = vpop.eup %2301  ;;  %v1547_v25 = vmax.f32 %v1545_v59, %v1546_v56 }
 0x146   : > { %v1636_v2 = vrot.slane %v1635_v14, 1  ;;  %v1675_v61 = vadd.f32 %v1674_v5, %v1673_v46  ;;  %2307 = vrcp.f32 %v1630_v7  ;;  %v1655_v62 = vrot.slane %v1654_v41, 2 }
 0x147   : > { %v1651_v51 = vadd.f32 %v1650_v8, %v1649_v33  ;;  %v1670_v37 = vadd.f32 %v1669_v9, %v1668_v34  ;;  %v1659_v54 = vsel %vm686_vm0, %v3224_v3, 0.0  ;;  %v1530_v38 = vrot.slane %v1529_v40, 2 }
 0x148   : > { %v1637_v0 = vadd.f32 %v1636_v2, %v1635_v14  ;;  %v1676_v30 = vrot.slane %v1675_v61, 2  ;;  %v1656_v35 = vadd.f32 %v1655_v62, %v1654_v41  ;;  %v1660_v49 = vrot.slane %v1659_v54, 4 }
 0x149   : > { %2309 = vrcp.f32 %v1651_v51  ;;  %v1671_v32 = vrot.slane %v1670_v37, 1  ;;  %v1587_v24 = vsub.f32 %v3168_v16, %v1547_v25  ;;  %v3231_v53 = vadd.f32 %v3200_v60, %v3087_v18 }
 0x14a   : > { %2311 = vrcp.f32 %v1637_v0  ;;  %v1677_v36 = vadd.f32 %v1676_v30, %v1675_v61  ;;  %v1657_v33 = vrot.slane %v1656_v35, 1  ;;  %v1661_v1 = vadd.f32 %v1660_v49, %v1659_v54 }
 0x14b   : > { %2313 = vpow2.f32 %v1608_v58  ;;  %v1672_v48 = vadd.f32 %v1671_v32, %v1670_v37  ;;  %v1531_v22 = vmax.f32 %v1529_v40, %v1530_v38  ;;  %v3235_v46 = vadd.f32 %v3087_v18, %v3204_v57 }
 0x14c   : > { %v1678_v14 = vrot.slane %v1677_v36, 1  ;;  %v1658_v59 = vadd.f32 %v1657_v33, %v1656_v35  ;;  %v1662_v56 = vrot.slane %v1661_v1, 2  ;;  %v1614_v26 = vmul.f32 1.442695, %v1587_v24 }
 0x14d   : > { %v1562_v8 = vsel %vm686_vm0, %v3231_v53, -inf  ;;  %2315 = vrcp.f32 %v1672_v48  ;;  %v1532_v16 = vrot.slane %v1531_v22, 1  ;;  %v3239_v7 = vpop.eup %2303  ;;  %v3247_v51 = vsel %vm686_vm0, %v3235_v46, -inf }
 0x14e   : > { %v1679_v34 = vadd.f32 %v1678_v14, %v1677_v36  ;;  %v1563_v5 = vrot.slane %v1562_v8, 4  ;;  %2317 = vrcp.f32 %v1658_v59  ;;  %v1663_v60 = vadd.f32 %v1662_v56, %v1661_v1 }
 0x14f   : > { %v2306_v2 = vpop.eup %2305  ;;  %v1694_v40 = vsel %vm686_vm0, %v3239_v7, 0.0  ;;  %v1533_v57 = vmax.f32 %v1531_v22, %v1532_v16  ;;  %2319 = vpow2.f32 %v1614_v26  ;;  %v3254_v54 = vadd.f32 %v3206_v17, %v3087_v18 }
 0x150   : > { %v3243_v41 = vmax.f32 %v1562_v8, %v1563_v5  ;;  %v2308_v9 = vpop.eup %2307  ;;  %v1754_v61 = vmul.f32 %v2306_v2, %v3179_v12  ;;  %v1664_v0 = vrot.slane %v1663_v60, 1  ;;  %v1695_v62 = vrot.slane %v1694_v40, 4 }
 0x151   : > { %v1752_v37 = vmul.f32 %v2308_v9, %v3187_v27  ;;  %v1585_v30 = vsub.f32 %v3177_v19, %v1533_v57  ;;  %2321 = vrcp.f32 %v1679_v34 }
 0x152   : > { %v1770_v49 = vmul.f32 %v1754_v61, %v3030_v28  ;;  %v1665_v32 = vadd.f32 %v1664_v0, %v1663_v60  ;;  %v1696_v12 = vadd.f32 %v1695_v62, %v1694_v40  ;;  %v1565_v19 = vrot.slane %v3243_v41, 2 }
 0x153   : > { %v2310_v58 = vpop.eup %2309  ;;  %v1768_v38 = vmul.f32 %v1752_v37, %v3009_v44  ;;  %v1610_v33 = vmul.f32 1.442695, %v1585_v30 }
 0x154   : > { %v2312_v35 = vpop.eup %2311  ;;  %v1755_v25 = vmul.f32 %v2310_v58, %v3192_v47  ;;  %v1798_v1 = vsel %vm686_vm0, %v1770_v49, 0.0  ;;  %2323 = vrcp.f32 %v1665_v32  ;;  %v1697_v24 = vrot.slane %v1696_v12, 2 }
 0x155   : > { %v3258_v36 = vpop.eup %2313  ;;  %v1753_v27 = vmul.f32 %v2312_v35, %v3196_v31  ;;  %v1799_v28 = vrot.slane %v1798_v1, 4  ;;  %v1784_v47 = vsel %vm686_vm0, %v1768_v38, 0.0  ;;  %2325 = vpow2.f32 %v1610_v33 }
 0x156   : > { %v1771_v17 = vmul.f32 %v1755_v25, %v3055_v20  ;;  %v1680_v14 = vsel %vm686_vm0, %v3258_v36, 0.0  ;;  %v1785_v44 = vrot.slane %v1784_v47, 4  ;;  %v1698_v22 = vadd.f32 %v1697_v24, %v1696_v12 }
 0x157   : > { %v1769_v48 = vmul.f32 %v1753_v27, %v3005_v23  ;;  %v1681_v59 = vrot.slane %v1680_v14, 4  ;;  %v2316_v56 = vpop.eup %2315  ;;  %v1800_v26 = vadd.f32 %v1799_v28, %v1798_v1 }
 0x158   : > { %v1805_v31 = vsel %vm686_vm0, %v1771_v17, 0.0  ;;  %v2318_v34 = vpop.eup %2317  ;;  %v1786_v16 = vadd.f32 %v1785_v44, %v1784_v47  ;;  %v1699_v60 = vrot.slane %v1698_v22, 1  ;;  %v1758_v23 = vmul.f32 %v2316_v56, %v3211_v50 }
 0x159   : > { %v1806_v8 = vrot.slane %v1805_v31, 4  ;;  %v1791_v20 = vsel %vm686_vm0, %v1769_v48, 0.0  ;;  %v1801_v2 = vrot.slane %v1800_v26, 2  ;;  %v1756_v57 = vmul.f32 %v2318_v34, %v3214_v11  ;;  %v3273_v61 = vpop.eup %2319 }
 0x15a   : > { %v1792_v5 = vrot.slane %v1791_v20, 4  ;;  %v1682_v9 = vadd.f32 %v1681_v59, %v1680_v14  ;;  %v1787_v0 = vrot.slane %v1786_v16, 2  ;;  %v1700_v58 = vadd.f32 %v1699_v60, %v1698_v22 }
 0x15b   : > { %v1807_v40 = vadd.f32 %v1806_v8, %v1805_v31  ;;  %v1774_v37 = vmul.f32 %v1758_v23, %v3125_v52  ;;  %v2322_v30 = vpop.eup %2321  ;;  %v1802_v35 = vadd.f32 %v1801_v2, %v1800_v26  ;;  %v1772_v25 = vmul.f32 %v1756_v57, %v3073_v43 }
 0x15c   : > { %v1793_v62 = vadd.f32 %v1792_v5, %v1791_v20  ;;  %v1683_v50 = vrot.slane %v1682_v9, 2  ;;  %v1788_v32 = vadd.f32 %v1787_v0, %v1786_v16  ;;  %2327 = vrcp.f32 %v1700_v58 }
 0x15d   : > { %v1808_v49 = vrot.slane %v1807_v40, 2  ;;  %v1826_v11 = vsel %vm686_vm0, %v1774_v37, 0.0  ;;  %v1803_v38 = vrot.slane %v1802_v35, 1  ;;  %v1812_v33 = vsel %vm686_vm0, %v1772_v25, 0.0 }
 0x15e   : > { %v1794_v12 = vrot.slane %v1793_v62, 2  ;;  %v1827_v1 = vrot.slane %v1826_v11, 4  ;;  %v2324_v17 = vpop.eup %2323  ;;  %v1789_v24 = vrot.slane %v1788_v32, 1  ;;  %v1813_v28 = vrot.slane %v1812_v33, 4 }
 0x15f   : > { %v1809_v27 = vadd.f32 %v1808_v49, %v1807_v40  ;;  %v1684_v47 = vadd.f32 %v1683_v50, %v1682_v9  ;;  %v1757_v43 = vmul.f32 %v2324_v17, %v3224_v3  ;;  %v1566_v44 = vmax.f32 %v3243_v41, %v1565_v19  ;;  %v3281_v26 = vpop.eup %2325 }
 0x160   : > { %v1795_v52 = vadd.f32 %v1794_v12, %v1793_v62  ;;  %v1828_v14 = vadd.f32 %v1827_v1, %v1826_v11  ;;  %v1804_v31 = vadd.f32 %v1803_v38, %v1802_v35  ;;  %v1814_v59 = vadd.f32 %v1813_v28, %v1812_v33 }
 0x161   : > { %v1810_v48 = vrot.slane %v1809_v27, 1  ;;  %v1685_v56 = vrot.slane %v1684_v47, 1  ;;  %v1790_v8 = vadd.f32 %v1789_v24, %v1788_v32  ;;  %v1773_v34 = vmul.f32 %v1757_v43, %v3111_v13 }
 0x162   : > { %v1796_v22 = vrot.slane %v1795_v52, 1  ;;  %v1701_v16 = vsel %vm686_vm0, %v3273_v61, 0.0  ;;  %v1815_v60 = vrot.slane %v1814_v59, 2  ;;  %v1829_v41 = vrot.slane %v1828_v14, 2 }
 0x163   : > { %v1811_v20 = vadd.f32 %v1810_v48, %v1809_v27  ;;  %v1686_v23 = vadd.f32 %v1685_v56, %v1684_v47  ;;  %v1702_v3 = vrot.slane %v1701_v16, 4  ;;  %v1819_v2 = vsel %vm686_vm0, %v1773_v34, 0.0 }
 0x164   : > { %v1797_v5 = vadd.f32 %v1796_v22, %v1795_v52  ;;  %v1687_v19 = vsel %vm686_vm0, %v3281_v26, 0.0  ;;  %v1759_v40 = vmul.f32 %v2322_v30, %v3218_v6  ;;  %v1816_v57 = vadd.f32 %v1815_v60, %v1814_v59 }
 0x165   : > { %v1820_v9 = vrot.slane %v1819_v2, 4  ;;  %2329 = vrcp.f32 %v1686_v23  ;;  %v1703_v62 = vadd.f32 %v1702_v3, %v1701_v16  ;;  %v1688_v58 = vrot.slane %v1687_v19, 4 }
 0x166   : > { %v1913_v0 = vsel %vm1912_vm1, %v1797_v5, %v1790_v8  ;;  %v1549_v37 = vrot.slane %v3247_v51, 4  ;;  %v2328_v35 = vpop.eup %2327  ;;  %v1817_v49 = vrot.slane %v1816_v57, 1  ;;  %v1775_v32 = vmul.f32 %v1759_v40, %v3185_v63 }
 0x167   : > { %v1915_v13 = vsel %vm1914_vm2, %v1804_v31, %v1913_v0  ;;  %v1821_v25 = vadd.f32 %v1820_v9, %v1819_v2  ;;  %v1762_v6 = vmul.f32 %v2328_v35, %v3239_v7  ;;  %v1830_v30 = vadd.f32 %v1829_v41, %v1828_v14 }
 0x168   : > { %v1917_v50 = vsel %vm1916_vm3, %v1811_v20, %v1915_v13  ;;  %v1704_v12 = vrot.slane %v1703_v62, 2  ;;  %v1689_v11 = vadd.f32 %v1688_v58, %v1687_v19  ;;  %v1818_v38 = vadd.f32 %v1817_v49, %v1816_v57 }
 0x169   : > { %v1822_v27 = vrot.slane %v1821_v25, 2  ;;  %v1833_v33 = vsel %vm686_vm0, %v1775_v32, 0.0  ;;  %v1567_v1 = vrot.slane %v1566_v44, 1  ;;  %v1778_v17 = vmul.f32 %v1762_v6, %v3042_v29 }
 0x16a   : > { %v1705_v24 = vadd.f32 %v1704_v12, %v1703_v62  ;;  %v1690_v52 = vrot.slane %v1689_v11, 2  ;;  %v1834_v28 = vrot.slane %v1833_v33, 4  ;;  %v1919_v48 = vsel %vm1918_vm4, %v1818_v38, %v1917_v50 }
 0x16b   : > { %v1823_v47 = vadd.f32 %v1822_v27, %v1821_v25  ;;  %v1568_v43 = vmax.f32 %v1566_v44, %v1567_v1  ;;  %v1550_v63 = vmax.f32 %v3247_v51, %v1549_v37  ;;  %v1831_v59 = vrot.slane %v1830_v30, 1 }
 0x16c   : > { %v1706_v7 = vrot.slane %v1705_v24, 1  ;;  %v1691_v14 = vadd.f32 %v1690_v52, %v1689_v11  ;;  %v1835_v31 = vadd.f32 %v1834_v28, %v1833_v33  ;;  %v1569_v51 = vsel %vm686_vm0, %v3254_v54, -inf }
 0x16d   : > { %v1824_v22 = vrot.slane %v1823_v47, 1  ;;  %v1590_v56 = vsub.f32 %v3231_v53, %v1568_v43  ;;  %v1551_v8 = vrot.slane %v1550_v63, 2  ;;  %v1832_v41 = vadd.f32 %v1831_v59, %v1830_v30 }
 0x16e   : > { %v1707_v29 = vadd.f32 %v1706_v7, %v1705_v24  ;;  %v1692_v20 = vrot.slane %v1691_v14, 1  ;;  %v1836_v34 = vrot.slane %v1835_v31, 2  ;;  %v1570_v9 = vrot.slane %v1569_v51, 4 }
 0x16f   : > { %v2330_v16 = vpop.eup %2329  ;;  %v1825_v5 = vadd.f32 %v1824_v22, %v1823_v47  ;;  %v1620_v60 = vmul.f32 1.442695, %v1590_v56  ;;  %v1552_v44 = vmax.f32 %v1550_v63, %v1551_v8  ;;  %v797_v13 = vadd.f32 %v3087_v18, %v3208_v15 }
 0x170   : > { %v1760_v23 = vmul.f32 %v2330_v16, %v3258_v36  ;;  %2331 = vrcp.f32 %v1707_v29  ;;  %v1693_v3 = vadd.f32 %v1692_v20, %v1691_v14  ;;  %v1837_v2 = vadd.f32 %v1836_v34, %v1835_v31 }
 0x171   : > { %v1921_v53 = vsel %vm1920_vm5, %v1825_v5, %v1919_v48  ;;  %2333 = vpow2.f32 %v1620_v60  ;;  %v1553_v19 = vrot.slane %v1552_v44, 1  ;;  %v1571_v62 = vmax.f32 %v1569_v51, %v1570_v9 }
 0x172   : > { %v1776_v40 = vmul.f32 %v1760_v23, %v3025_v45  ;;  %2335 = vrcp.f32 %v1693_v3  ;;  %v1838_v57 = vrot.slane %v1837_v2, 1  ;;  %v1923_v58 = vsel %vm1922_vm6, %v1832_v41, %v1921_v53 }
 0x173   : > { %v1554_v0 = vmax.f32 %v1552_v44, %v1553_v19  ;;  %v1555_v45 = vsel %vm686_vm0, %v797_v13, -inf  ;;  %v1854_v49 = vsel %vm686_vm0, %v1778_v17, 0.0  ;;  %v1572_v25 = vrot.slane %v1571_v62, 2 }
 0x174   : > { %v1840_v36 = vsel %vm686_vm0, %v1776_v40, 0.0  ;;  %v1839_v37 = vadd.f32 %v1838_v57, %v1837_v2  ;;  %v1556_v50 = vrot.slane %v1555_v45, 4  ;;  %v1855_v12 = vrot.slane %v1854_v49, 4 }
 0x175   : > { %v1588_v35 = vsub.f32 %v3235_v46, %v1554_v0  ;;  %v1841_v32 = vrot.slane %v1840_v36, 4  ;;  %v1573_v15 = vmax.f32 %v1571_v62, %v1572_v25 }
 0x176   : > { %v1925_v18 = vsel %vm1924_vm7, %v1839_v37, %v1923_v58  ;;  %v1557_v30 = vmax.f32 %v1555_v45, %v1556_v50  ;;  %v1856_v47 = vadd.f32 %v1855_v12, %v1854_v49 }
 0x177   : > { %v1616_v6 = vmul.f32 1.442695, %v1588_v35  ;;  %1935 = vst.msk [vmem:[%s3317_s13] sm:$0xff] %vm686_vm0, %v1925_v18  ;;  %v1574_v11 = vrot.slane %v1573_v15, 1  ;;  %v1842_v33 = vadd.f32 %v1841_v32, %v1840_v36 }
 0x178   : > { %v1558_v38 = vrot.slane %v1557_v30, 2  ;;  %v1857_v20 = vrot.slane %v1856_v47, 2 }
 0x179   : > { %2337 = vpow2.f32 %v1616_v6  ;;  %v1575_v52 = vmax.f32 %v1573_v15, %v1574_v11  ;;  %v1843_v31 = vrot.slane %v1842_v33, 2 }
 0x17a   : > { %v2332_v46 = vpop.eup %2331  ;;  %v1559_v28 = vmax.f32 %v1557_v30, %v1558_v38  ;;  %v1858_v2 = vadd.f32 %v1857_v20, %v1856_v47 }
 0x17b   : > { %v3321_v27 = vpop.eup %2333  ;;  %v1763_v1 = vmul.f32 %v2332_v46, %v3273_v61  ;;  %v1591_v7 = vsub.f32 %v3254_v54, %v1575_v52  ;;  %v1844_v54 = vadd.f32 %v1843_v31, %v1842_v33 }
 0x17c   : > { %v2336_v17 = vpop.eup %2335  ;;  %v1722_v24 = vsel %vm686_vm0, %v3321_v27, 0.0  ;;  %v1560_v14 = vrot.slane %v1559_v28, 1  ;;  %v1859_v62 = vrot.slane %v1858_v2, 1 }
 0x17d   : > { %v1779_v48 = vmul.f32 %v1763_v1, %v3067_v42  ;;  %v1761_v43 = vmul.f32 %v2336_v17, %v3281_v26  ;;  %v1723_v63 = vrot.slane %v1722_v24, 4  ;;  %v1622_v8 = vmul.f32 1.442695, %v1591_v7 }
 0x17e   : > { %v1561_v29 = vmax.f32 %v1559_v28, %v1560_v14  ;;  %v1845_v0 = vrot.slane %v1844_v54, 1  ;;  %v1860_v50 = vadd.f32 %v1859_v62, %v1858_v2 }
 0x17f   : > { %v1861_v22 = vsel %vm686_vm0, %v1779_v48, 0.0  ;;  %v1777_v61 = vmul.f32 %v1761_v43, %v3033_v55  ;;  %v1724_v59 = vadd.f32 %v1723_v63, %v1722_v24  ;;  %2339 = vpow2.f32 %v1622_v8 }
 0x180   : > { %v1862_v56 = vrot.slane %v1861_v22, 4  ;;  %v1589_v26 = vsub.f32 %v797_v13, %v1561_v29  ;;  %v1846_v49 = vadd.f32 %v1845_v0, %v1844_v54 }
 0x181   : > { %v1847_v34 = vsel %vm686_vm0, %v1777_v61, 0.0  ;;  %v1725_v16 = vrot.slane %v1724_v59, 2 }
 0x182   : > { %v1863_v42 = vadd.f32 %v1862_v56, %v1861_v22  ;;  %v1848_v5 = vrot.slane %v1847_v34, 4  ;;  %v1618_v55 = vmul.f32 1.442695, %v1589_v26 }
 0x183   : > { %v2338_v60 = vpop.eup %2337  ;;  %v1726_v44 = vadd.f32 %v1725_v16, %v1724_v59 }
 0x184   : > { %v1864_v51 = vrot.slane %v1863_v42, 2  ;;  %v1849_v23 = vadd.f32 %v1848_v5, %v1847_v34  ;;  %v1708_v3 = vsel %vm686_vm0, %v2338_v60, 0.0  ;;  %2341 = vpow2.f32 %v1618_v55 }
 0x185   : > { %v1727_v53 = vrot.slane %v1726_v44, 1  ;;  %v1709_v41 = vrot.slane %v1708_v3, 4 }
 0x186   : > { %v1865_v19 = vadd.f32 %v1864_v51, %v1863_v42  ;;  %v1850_v40 = vrot.slane %v1849_v23, 2 }
 0x187   : > { %v1728_v57 = vadd.f32 %v1727_v53, %v1726_v44  ;;  %v1710_v9 = vadd.f32 %v1709_v41, %v1708_v3 }
 0x188   : > { %v1851_v36 = vadd.f32 %v1850_v40, %v1849_v23  ;;  %v1866_v58 = vrot.slane %v1865_v19, 1 }
 0x189   : > { %2343 = vrcp.f32 %v1728_v57  ;;  %v1711_v13 = vrot.slane %v1710_v9, 2  ;;  %v2340_v45 = vpop.eup %2339 }
 0x18a   : > { %v1852_v37 = vrot.slane %v1851_v36, 1  ;;  %v1729_v6 = vsel %vm686_vm0, %v2340_v45, 0.0  ;;  %v1867_v18 = vadd.f32 %v1866_v58, %v1865_v19 }
 0x18b   : > { %v1712_v35 = vadd.f32 %v1711_v13, %v1710_v9  ;;  %v1730_v15 = vrot.slane %v1729_v6, 4 }
 0x18c   : > { %v1853_v25 = vadd.f32 %v1852_v37, %v1851_v36 }
 0x18d   : > { %v1713_v32 = vrot.slane %v1712_v35, 1  ;;  %v1731_v38 = vadd.f32 %v1730_v15, %v1729_v6 }
 0x18e   : > { %v1926_v30 = vsel %vm1912_vm1, %v1853_v25, %v1846_v49  ;;  %v2342_v11 = vpop.eup %2341 }
 0x18f   : > { %v1714_v12 = vadd.f32 %v1713_v32, %v1712_v35  ;;  %v1927_v46 = vsel %vm1914_vm2, %v1860_v50, %v1926_v30  ;;  %v1715_v1 = vsel %vm686_vm0, %v2342_v11, 0.0  ;;  %v1732_v17 = vrot.slane %v1731_v38, 2 }
 0x190   : > { %v1928_v33 = vsel %vm1916_vm3, %v1867_v18, %v1927_v46  ;;  %v1716_v24 = vrot.slane %v1715_v1, 4 }
 0x191   : > { %2345 = vrcp.f32 %v1714_v12  ;;  %v1733_v47 = vadd.f32 %v1732_v17, %v1731_v38 }
 0x192   : > { %v1717_v48 = vadd.f32 %v1716_v24, %v1715_v1 }
 0x193   : > { %v2344_v52 = vpop.eup %2343  ;;  %v1734_v63 = vrot.slane %v1733_v47, 1 }
 0x194   : > { %v1766_v28 = vmul.f32 %v2344_v52, %v3321_v27  ;;  %v1718_v7 = vrot.slane %v1717_v48, 2 }
 0x195   : > { %v1735_v14 = vadd.f32 %v1734_v63, %v1733_v47 }
 0x196   : > { %v1782_v43 = vmul.f32 %v1766_v28, %v3062_v21  ;;  %v1719_v31 = vadd.f32 %v1718_v7, %v1717_v48 }
 0x197   : > { %2347 = vrcp.f32 %v1735_v14 }
 0x198   : > { %v1720_v22 = vrot.slane %v1719_v31, 1  ;;  %v1882_v27 = vsel %vm686_vm0, %v1782_v43, 0.0 }
 0x199   : > { %v1883_v21 = vrot.slane %v1882_v27, 4 }
 0x19a   : > { %v1721_v56 = vadd.f32 %v1720_v22, %v1719_v31 }
 0x19b   : > { %v2346_v61 = vpop.eup %2345  ;;  %v1884_v51 = vadd.f32 %v1883_v21, %v1882_v27 }
 0x19c   : > { %v1764_v59 = vmul.f32 %v2346_v61, %v2338_v60  ;;  %2349 = vrcp.f32 %v1721_v56 }
 0x19d   : > { %v1885_v41 = vrot.slane %v1884_v51, 2 }
 0x19e   : > { %v1780_v8 = vmul.f32 %v1764_v59, %v3047_v4 }
 0x19f   : > { %v1886_v0 = vadd.f32 %v1885_v41, %v1884_v51 }
 0x1a0   : > { %v1868_v29 = vsel %vm686_vm0, %v1780_v8, 0.0 }
 0x1a1   : > { %v1869_v20 = vrot.slane %v1868_v29, 4  ;;  %v2348_v16 = vpop.eup %2347  ;;  %v1887_v58 = vrot.slane %v1886_v0, 1 }
 0x1a2   : > { %v1767_v5 = vmul.f32 %v2348_v16, %v2340_v45 }
 0x1a3   : > { %v1870_v34 = vadd.f32 %v1869_v20, %v1868_v29  ;;  %v1888_v45 = vadd.f32 %v1887_v58, %v1886_v0 }
 0x1a4   : > { %v1783_v54 = vmul.f32 %v1767_v5, %v3092_v10 }
 0x1a5   : > { %v1871_v42 = vrot.slane %v1870_v34, 2 }
 0x1a6   : > { %v2350_v44 = vpop.eup %2349  ;;  %v1889_v23 = vsel %vm686_vm0, %v1783_v54, 0.0 }
 0x1a7   : > { %v1872_v26 = vadd.f32 %v1871_v42, %v1870_v34  ;;  %v1765_v4 = vmul.f32 %v2350_v44, %v2342_v11  ;;  %v1890_v3 = vrot.slane %v1889_v23, 4 }
 0x1a9   : > { %v1873_v60 = vrot.slane %v1872_v26, 1  ;;  %v1781_v2 = vmul.f32 %v1765_v4, %v3050_v39  ;;  %v1891_v53 = vadd.f32 %v1890_v3, %v1889_v23 }
 0x1ab   : > { %v1874_v55 = vadd.f32 %v1873_v60, %v1872_v26  ;;  %v1875_v19 = vsel %vm686_vm0, %v1781_v2, 0.0  ;;  %v1892_v57 = vrot.slane %v1891_v53, 2 }
 0x1ac   : > { %v1876_v10 = vrot.slane %v1875_v19, 4 }
 0x1ad   : > { %v1929_v40 = vsel %vm1918_vm4, %v1874_v55, %v1928_v33  ;;  %v1893_v62 = vadd.f32 %v1892_v57, %v1891_v53 }
 0x1ae   : > { %v1877_v9 = vadd.f32 %v1876_v10, %v1875_v19 }
 0x1af   : > { %v1894_v39 = vrot.slane %v1893_v62, 1 }
 0x1b0   : > { %v1878_v36 = vrot.slane %v1877_v9, 2 }
 0x1b1   : > { %v1895_v49 = vadd.f32 %v1894_v39, %v1893_v62 }
 0x1b2   : > { %v1879_v13 = vadd.f32 %v1878_v36, %v1877_v9 }
 0x1b4   : > { %v1880_v37 = vrot.slane %v1879_v13, 1 }
 0x1b6   : > { %v1881_v35 = vadd.f32 %v1880_v37, %v1879_v13 }
 0x1b8   : > { %v1930_v25 = vsel %vm1920_vm5, %v1881_v35, %v1929_v40 }
 0x1b9   : > { %v1931_v50 = vsel %vm1922_vm6, %v1888_v45, %v1930_v25 }
 0x1ba   : > { %v1932_v32 = vsel %vm1924_vm7, %v1895_v49, %v1931_v50 }
 0x1bb   : > { %1936 = vst.msk [vmem:[%s3317_s13 + $0x8] sm:$0xff] %vm686_vm0, %v1932_v32 }
 0x1bc   : > { %2364 = shalt.err (!%p2361_p3)
}
 0x1bd   : > { %s2365_s14 = scalar_lea.hbm %s3354_s30, 256  ;;  %s2369_s25 = scalar_lea.hbm %s3416_s11, 512 }
 0x1be   : > { %p2366_p4 = scmp.ne.s32.totalorder %s3354_s30, %s2365_s14  ;;  %p2370_p9 = scmp.lt.u32.totalorder %s3354_s30, %s3416_s11 }
 0x1bf   : > { %p2371_p10 = scmp.lt.u32.totalorder %s2369_s25, %s2365_s14  ;;  %p2373_p12 = scmp.lt.u32.totalorder %s2365_s14, %s3354_s30 }
 0x1c0   : > { %p2367_p7 = pnand %p2366_p4, %p2520_p5 }
 0x1c1   : > { %p2372_p11 = por %p2371_p10, %p2370_p9 }
 0x1c2   : > { %p2368_p8 = pneg %p2367_p7 }
 0x1c3   : > { %p2374_p13 = por %p2373_p12, %p2372_p11 }
 0x1c5   : > { %p2375_p0 = pnand %p2374_p13, %p2368_p8 }
 0x1c7   : > { %2378 = shalt.err (!%p2375_p0)
}
 0x1c8   : > { %s2420_s12 = smov 128   ;;  %s2421_s16 = smov 8  }
 0x1c9   : > { %2186 = dma.vmem_to_hbm [thread:$0]  (%p2520_p5), %s3356_s22, 256, %s3354_s30, %s3364_s21, %s2420_s12, %s2420_s12, %s2421_s16  }
 0x1ca PF: > { %p2192_p1 = scmp.ge.s32.totalorder %s2413_s20, 2  ;;  %s1966_s13 = sand.u32 1, %s2401_s17  }
 0x1cb   : > { %s1967_s14 = scalar_lea.sflag [#allocation3], %s1966_s13 }
 0x1cc   : > { %p2189_p2 = pnand %p2192_p1, %p2524_p6 }
 0x1ce   : > { %2396 = dma.done.wait (!%p2189_p2), %s1967_s14, 256  }
 0x1cf   : > { %2398 = vsyncadd (!%p2189_p2), %s1967_s14, 4294967040  ;;  %p21_p3 = scmp.ge.s32.totalorder %s2507_s23, 4   ;;  %s3419_s17 = smov %s2405_s18 }
 0x1d0   : > { %s3420_s18 = smov %s2409_s19  ;;  %s3421_s19 = smov %s2518_s26 }
 0x1d1   : > { %s3422_s20 = smov %s2507_s23  ;;  %23 = sbr.rel (!%p21_p3) target bundleno = 3 (0x3), region = 105 }
 0x1d8   :  { %1972 = vsyncpa [#allocation3], 1 }
 0x1d9   :  { %1974 = vsyncpa [#allocation3 + $0x1], 1 }

</bundles_post_ra>
